<compile_context>
chip_gen: v6e
topology: v6e:2x2x1
jax: 0.10.0
libtpu: 0.0.40
codegen_flags: <defaults>
</compile_context>

<pallas_src>
import functools
import math

import jax
import jax.numpy as jnp
from jax.experimental import pallas as pl
from jax.experimental.pallas import tpu as pltpu


def _round_up(x, m):
    return (x + m - 1) // m * m


def _largest_pow2_leq(x):
    x = int(x)
    return 1 << (x.bit_length() - 1) if x >= 1 else 1


# ----------------------------------------------------------------------------
# Pallas kernels
# ----------------------------------------------------------------------------
def _mm_kernel_single(*refs, relu, n_ops):
    """Single K-step:  relu( sum_i A_i @ W_i + shift )  — no accumulator scratch."""
    b_ref = refs[2 * n_ops]
    o_ref = refs[2 * n_ops + 1]
    acc = jnp.dot(refs[0][...], refs[1][...], preferred_element_type=jnp.float32)
    for i in range(1, n_ops):
        acc = acc + jnp.dot(refs[2 * i][...], refs[2 * i + 1][...],
                            preferred_element_type=jnp.float32)
    y = acc + b_ref[...]
    if relu:
        y = jnp.maximum(y, 0.0)
    o_ref[...] = y.astype(o_ref.dtype)


def _mm_kernel_ktiled(a_ref, w_ref, b_ref, o_ref, acc_ref, *, relu):
    """K-tiled fallback (very large K only): f32 VMEM accumulator over the K grid axis."""
    k = pl.program_id(2)

    @pl.when(k == 0)
    def _():
        acc_ref[...] = jnp.zeros_like(acc_ref)

    acc_ref[...] += jnp.dot(a_ref[...], w_ref[...], preferred_element_type=jnp.float32)

    @pl.when(k == pl.num_programs(2) - 1)
    def _():
        y = acc_ref[...] + b_ref[...]
        if relu:
            y = jnp.maximum(y, 0.0)
        o_ref[...] = y.astype(o_ref.dtype)


# ----------------------------------------------------------------------------
# Fused matmul wrapper:  relu( sum_i a_i @ w_i + shift )
# ----------------------------------------------------------------------------
_VMEM_TILE_BUDGET = 12 * 1024 * 1024   # ample headroom vs v7x 64 MiB / 32 MiB scoped


def _matmul_ktiled(a, w, shift_row, relu, out_dtype):
    # TODO(synk): only reached for K > 8192 (never at hourglass channel counts <= 64).
    M, K = a.shape
    N = w.shape[1]
    TM, TK = 256, 2048
    TN = min(256, _round_up(N, 128))
    Mp, Np, Kp = _round_up(M, TM), _round_up(N, TN), _round_up(K, TK)
    a = jnp.pad(a, ((0, Mp - M), (0, Kp - K)))
    w = jnp.pad(w, ((0, Kp - K), (0, Np - N)))
    shift_row = jnp.pad(shift_row, ((0, 0), (0, Np - N)))
    out = pl.pallas_call(
        functools.partial(_mm_kernel_ktiled, relu=relu),
        out_shape=jax.ShapeDtypeStruct((Mp, Np), out_dtype),
        grid_spec=pltpu.PrefetchScalarGridSpec(
            num_scalar_prefetch=0,
            grid=(Mp // TM, Np // TN, Kp // TK),
            in_specs=[pl.BlockSpec((TM, TK), lambda i, j, k: (i, k)),
                      pl.BlockSpec((TK, TN), lambda i, j, k: (k, j)),
                      pl.BlockSpec((1, TN), lambda i, j, k: (0, j))],
            out_specs=pl.BlockSpec((TM, TN), lambda i, j, k: (i, j)),
            scratch_shapes=[pltpu.VMEM((TM, TN), jnp.float32)],
        ),
        compiler_params=pltpu.CompilerParams(
            dimension_semantics=("parallel", "parallel", "arbitrary"),
            vmem_limit_bytes=32 * 1024 * 1024,
        ),
    )(a, w, shift_row)
    return out[:M, :N]


def fused_matmul_bn_act(a_list, w_list, shift, *, relu=True, out_dtype=jnp.bfloat16):
    """a_i: (M, K_i) ; w_i: (K_i, N) with BN scale pre-folded ; shift: (N,) f32.

    Returns  act( sum_i a_i @ w_i + shift )  in `out_dtype` (bf16 by default).
    bf16 MXU operands, f32 accumulation + epilogue.
    """
    n_ops = len(a_list)
    M = a_list[0].shape[0]
    N = w_list[0].shape[1]
    ks = [int(a.shape[1]) for a in a_list]
    k_total = sum(ks)

    a_list = [a.astype(jnp.bfloat16) for a in a_list]
    w_list = [w.astype(jnp.bfloat16) for w in w_list]
    shift_row = shift.astype(jnp.float32).reshape(1, N)

    if n_ops == 1 and k_total > 8192:
        return _matmul_ktiled(a_list[0], w_list[0], shift_row, relu, out_dtype)

    # --- N blocks: full-N up to 256 lanes (no padding); tile larger N. ---------------
    if N <= 256:
        TN, Np = N, N
    else:
        TN = 256 if N % 256 == 0 else 128
        Np = _round_up(N, TN)
    if Np != N:
        w_list = [jnp.pad(w, ((0, 0), (0, Np - N))) for w in w_list]
        shift_row = jnp.pad(shift_row, ((0, 0), (0, Np - N)))

    # --- M tiles: largest pow2 tile under the VMEM budget; guarantee >= 2 tiles. -----
    per_row = 4 * k_total + 6 * Np           # dbl-buffered bf16 A rows + out rows + f32 temp
    fixed = 4 * k_total * Np + 8 * Np        # dbl-buffered bf16 weights + shift
    TM = 8
    for cand in (8, 16, 32, 64, 128, 256, 512, 1024):
        if cand * per_row + fixed <= _VMEM_TILE_BUDGET:
            TM = cand
    TM = min(TM, max(8, _largest_pow2_leq(M)))
    Mp = _round_up(M, TM)
    if Mp // TM < 2 and TM >= 16:            # >= 2 parallel M tiles (megacore / 2-TC v7x)
        TM //= 2
    if Mp != M:
        a_list = [jnp.pad(a, ((0, Mp - M), (0, 0))) for a in a_list]

    in_specs, inputs = [], []
    for a, w, k in zip(a_list, w_list, ks):
        in_specs.append(pl.BlockSpec((TM, k), lambda i, j: (i, 0)))    # full-K block
        in_specs.append(pl.BlockSpec((k, TN), lambda i, j: (0, j)))
        inputs += [a, w]
    in_specs.append(pl.BlockSpec((1, TN), lambda i, j: (0, j)))
    inputs.append(shift_row)

    flops = 2 * Mp * Np * k_total
    bytes_accessed = (sum(a.size for a in a_list) * 2 + sum(w.size for w in w_list) * 2
                      + Mp * Np * 2 + Np * 4)

    out = pl.pallas_call(
        functools.partial(_mm_kernel_single, relu=relu, n_ops=n_ops),
        out_shape=jax.ShapeDtypeStruct((Mp, Np), out_dtype),
        grid_spec=pltpu.PrefetchScalarGridSpec(
            num_scalar_prefetch=0,
            grid=(Mp // TM, Np // TN),
            in_specs=in_specs,
            out_specs=pl.BlockSpec((TM, TN), lambda i, j: (i, j)),
        ),
        compiler_params=pltpu.CompilerParams(
            dimension_semantics=("parallel", "parallel"),
            vmem_limit_bytes=32 * 1024 * 1024,
        ),
        cost_estimate=pl.CostEstimate(flops=int(flops), transcendentals=0,
                                      bytes_accessed=int(bytes_accessed)),
    )(*inputs)
    if Mp != M or Np != N:
        out = out[:M, :N]
    return out


# ----------------------------------------------------------------------------
# Layers (NDHWC, bf16 activations)
# ----------------------------------------------------------------------------
def conv3d_bn_relu(x, p, *, stride, relu=True):
    """3x3x3 Conv3d(pad=1, bias-free) + folded BN (+ReLU).  x: (B,D,H,W,C) bf16."""
    B, D, H, W, C = x.shape
    cout = p["shift"].shape[0]
    s = stride
    xp = jnp.pad(x, ((0, 0), (1, 1), (1, 1), (1, 1), (0, 0)))
    Do = (D + 2 - 3) // s + 1
    Ho = (H + 2 - 3) // s + 1
    Wo = (W + 2 - 3) // s + 1
    # TODO(synk): im2col slab materialized in HBM (27x read duplication); fuse taps into
    # the kernel via shifted-window DMA in a later pass.
    cols = [xp[:, a:a + s * (Do - 1) + 1:s,
               b:b + s * (Ho - 1) + 1:s,
               c:c + s * (Wo - 1) + 1:s, :]
            for a in range(3) for b in range(3) for c in range(3)]
    A = jnp.stack(cols, axis=-2).reshape(B * Do * Ho * Wo, 27 * C)
    y = fused_matmul_bn_act([A], [p["wm"]], p["shift"], relu=relu)
    return y.reshape(B, Do, Ho, Wo, cout)


def deconv3d_bn_skip_relu(x, skip, p):
    """relu( BN(ConvTranspose3d(x; k=3,s=2,p=1,op=1)) + BN(Conv1x1(skip)) ).

    The 8 sub-pixel output phases are consolidated into ONE matmul (K=8*Cin, N=8*Cout);
    the redir 1x1 convbn rides along as a second block-diagonal operand pair (K=8*Cskip).
    x: (B,D,H,W,Cin); skip: (B,2D,2H,2W,Cskip); returns (B,2D,2H,2W,Cout) bf16.
    """
    B, D, H, W, Cin = x.shape
    Cs = skip.shape[-1]
    cout = p["shift"].shape[0] // 8
    # 2x2x2 tap im2col of x, padded by one trailing row per spatial dim.
    xp = jnp.pad(x, ((0, 0), (0, 1), (0, 1), (0, 1), (0, 0)))
    cols = [xp[:, a:a + D, b:b + H, c:c + W, :]
            for a in (0, 1) for b in (0, 1) for c in (0, 1)]
    A1 = jnp.stack(cols, axis=-2).reshape(B * D * H * W, 8 * Cin)
    # space-to-depth of the skip tensor: one gather instead of 8 strided slices.
    A2 = skip.reshape(B, D, 2, H, 2, W, 2, Cs).transpose(0, 1, 3, 5, 2, 4, 6, 7)
    A2 = A2.reshape(B * D * H * W, 8 * Cs)
    y = fused_matmul_bn_act([A1, A2], [p["w_deconv"], p["w_skip"]], p["shift"], relu=True)
    # depth-to-space back to (B, 2D, 2H, 2W, Cout).
    y = y.reshape(B, D, H, W, 2, 2, 2, cout).transpose(0, 1, 4, 2, 5, 3, 6, 7)
    return y.reshape(B, 2 * D, 2 * H, 2 * W, cout)


# ----------------------------------------------------------------------------
# Parameter construction (PyTorch layouts, eval-mode BN folded, bf16 matmul layouts)
# ----------------------------------------------------------------------------
def _fold_bn(keys, cout):
    kg, kb, km, kv = keys
    gamma = 1.0 + 0.1 * jax.random.normal(kg, (cout,), jnp.float32)
    beta = 0.1 * jax.random.normal(kb, (cout,), jnp.float32)
    mean = 0.1 * jax.random.normal(km, (cout,), jnp.float32)
    var = jnp.abs(1.0 + 0.1 * jax.random.normal(kv, (cout,), jnp.float32))
    scale = gamma / jnp.sqrt(var + 1e-5)
    shift = beta - mean * scale
    return scale, shift


def _make_convbn(key, cin, cout, k=3):
    kw_, kg, kb, km, kv = jax.random.split(key, 5)
    fan = cin * k ** 3
    w = jax.random.normal(kw_, (cout, cin, k, k, k), jnp.float32) / math.sqrt(fan)
    scale, shift = _fold_bn((kg, kb, km, kv), cout)
    # (Cout,Cin,kd,kh,kw) -> (kd,kh,kw,Cin,Cout) -> (k^3*Cin, Cout); fold BN scale in.
    wm = jnp.transpose(w, (2, 3, 4, 1, 0)).reshape(k ** 3 * cin, cout)
    wm = (wm * scale[None, :]).astype(jnp.bfloat16)
    return {"wm": wm, "shift": shift}


def _make_deconv_skip(key, cin, cskip, cout):
    keys = jax.random.split(key, 10)
    w_d = jax.random.normal(keys[0], (cin, cout, 3, 3, 3), jnp.float32) / math.sqrt(cin * 27)
    scale_d, shift_d = _fold_bn(tuple(keys[1:5]), cout)
    w_r = jax.random.normal(keys[5], (cout, cskip, 1, 1, 1), jnp.float32) / math.sqrt(cskip)
    scale_r, shift_r = _fold_bn(tuple(keys[6:10]), cout)

    # Kernel tap index used by output parity p at 2x2x2 window offset `off`
    # (od = 2*id + kd - 1): even parity -> kd=1 at off=0; odd -> kd=2 at off=0, kd=0 at off=1.
    def kidx(p, off):
        if p == 0:
            return 1 if off == 0 else None
        return 2 if off == 0 else 0

    octs = [(a, b, c) for a in (0, 1) for b in (0, 1) for c in (0, 1)]
    Wd = jnp.zeros((8 * cin, 8 * cout), jnp.float32)
    for ti, (a, b, c) in enumerate(octs):              # input taps
        for pi, (pd, ph, pw) in enumerate(octs):       # output sub-pixel phases
            kd, kh, kw = kidx(pd, a), kidx(ph, b), kidx(pw, c)
            if kd is None or kh is None or kw is None:
                continue
            blk = w_d[:, :, kd, kh, kw] * scale_d[None, :]          # (Cin, Cout)
            Wd = Wd.at[ti * cin:(ti + 1) * cin, pi * cout:(pi + 1) * cout].set(blk)

    wr_mat = w_r[:, :, 0, 0, 0].T * scale_r[None, :]                # (Cskip, Cout)
    Ws = jnp.zeros((8 * cskip, 8 * cout), jnp.float32)
    for pi in range(8):
        Ws = Ws.at[pi * cskip:(pi + 1) * cskip, pi * cout:(pi + 1) * cout].set(wr_mat)

    shift = jnp.tile(shift_d + shift_r, 8)
    return {"w_deconv": Wd.astype(jnp.bfloat16), "w_skip": Ws.astype(jnp.bfloat16),
            "shift": shift}


def init_params(key, in_channels):
    C = in_channels
    keys = jax.random.split(key, 6)
    return {
        "conv1": _make_convbn(keys[0], C, 2 * C),
        "conv2": _make_convbn(keys[1], 2 * C, 2 * C),
        "conv3": _make_convbn(keys[2], 2 * C, 4 * C),
        "conv4": _make_convbn(keys[3], 4 * C, 4 * C),
        "conv5": _make_deconv_skip(keys[4], 4 * C, 2 * C, 2 * C),   # deconv + redir2 fused
        "conv6": _make_deconv_skip(keys[5], 2 * C, C, C),           # deconv + redir1 fused
    }


# ----------------------------------------------------------------------------
# hourglass forward
# ----------------------------------------------------------------------------
def hourglass_forward(params, x_ncdhw):
    x = jnp.transpose(x_ncdhw, (0, 2, 3, 4, 1)).astype(jnp.bfloat16)    # NCDHW -> NDHWC bf16
    c1 = conv3d_bn_relu(x, params["conv1"], stride=2)
    c2 = conv3d_bn_relu(c1, params["conv2"], stride=1)
    c3 = conv3d_bn_relu(c2, params["conv3"], stride=2)
    c4 = conv3d_bn_relu(c3, params["conv4"], stride=1)
    c5 = deconv3d_bn_skip_relu(c4, c2, params["conv5"])   # relu(bn(deconv5) + redir2(conv2))
    c6 = deconv3d_bn_skip_relu(c5, x, params["conv6"])    # relu(bn(deconv6) + redir1(x))
    return jnp.transpose(c6, (0, 4, 1, 2, 3)).astype(jnp.float32)       # back to NCDHW, f32


# ----------------------------------------------------------------------------
if __name__ == "__main__":
    key = jax.random.PRNGKey(0)
    pkey, xkey = jax.random.split(key)

    in_channels = 16
    B, D, H, W = 2, 8, 16, 16   # D,H,W divisible by 4 (two stride-2 stages)

    params = init_params(pkey, in_channels)
    x = jax.random.normal(xkey, (B, in_channels, D, H, W), jnp.float32)

    fwd = jax.jit(hourglass_forward)
    out = jax.block_until_ready(fwd(params, x))

    assert out.shape == (B, in_channels, D, H, W), out.shape
    assert bool(jnp.all(jnp.isfinite(out)))
    assert bool(jnp.all(out >= 0.0))   # final op is ReLU
    print("KERNEL_OK")
</pallas_src>

<mosaic_0001>
module attributes {stable_mosaic.version = 11 : i64} {
  func.func @_mm_kernel_single(%arg0: i32, %arg1: i32, %arg2: memref<256x432xbf16, #tpu.memory_space<vmem>>, %arg3: memref<432x32xbf16, #tpu.memory_space<vmem>>, %arg4: memref<1x32xf32, #tpu.memory_space<vmem>>, %arg5: memref<256x32xbf16, #tpu.memory_space<vmem>>) attributes {dimension_semantics = [#tpu.dimension_semantics<parallel>, #tpu.dimension_semantics<parallel>], iteration_bounds = array<i64: 2, 1>, scalar_prefetch = 0 : i64, scratch_operands = 0 : i64, tpu.core_type = #tpu.core_type<tc>, window_params = [{transform_indices = @transform_0, window_bounds = array<i64: 256, 432>}, {transform_indices = @transform_1, window_bounds = array<i64: 432, 32>}, {transform_indices = @transform_2, window_bounds = array<i64: 1, 32>}, {transform_indices = @transform_3, window_bounds = array<i64: 256, 32>}]} {
    %c0 = arith.constant 0 : index
    %c0_0 = arith.constant 0 : index
    %0 = vector.load %arg2[%c0, %c0_0] : memref<256x432xbf16, #tpu.memory_space<vmem>>, vector<256x432xbf16>
    %c0_1 = arith.constant 0 : index
    %c0_2 = arith.constant 0 : index
    %1 = vector.load %arg3[%c0_1, %c0_2] : memref<432x32xbf16, #tpu.memory_space<vmem>>, vector<432x32xbf16>
    %cst = arith.constant dense<0.000000e+00> : vector<256x32xf32>
    %2 = tpu.matmul %0, %1, %cst {dimension_numbers = #tpu.dot_dimension_numbers<[1], [0], [0], [1], [0, 0, 1, 1], [], []>} : vector<256x432xbf16>, vector<432x32xbf16>, vector<256x32xf32> -> vector<256x32xf32>
    %c0_3 = arith.constant 0 : index
    %c0_4 = arith.constant 0 : index
    %3 = vector.load %arg4[%c0_3, %c0_4] : memref<1x32xf32, #tpu.memory_space<vmem>>, vector<1x32xf32>
    %4 = vector.broadcast %3 : vector<1x32xf32> to vector<256x32xf32>
    %5 = arith.addf %2, %4 : vector<256x32xf32>
    %cst_5 = arith.constant 0.000000e+00 : f32
    %6 = vector.broadcast %cst_5 : f32 to vector<256x32xf32>
    %7 = arith.maximumf %5, %6 : vector<256x32xf32>
    %8 = arith.truncf %7 : vector<256x32xf32> to vector<256x32xbf16>
    %c0_6 = arith.constant 0 : index
    %c0_7 = arith.constant 0 : index
    %9 = vector.load %arg5[%c0_6, %c0_7] : memref<256x32xbf16, #tpu.memory_space<vmem>>, vector<256x32xbf16>
    tpu.vector_store %arg5[%c0_6, %c0_7], %8 {strides = array<i32>} : memref<256x32xbf16, #tpu.memory_space<vmem>>, vector<256x32xbf16>,
    return
  }
  func.func @transform_0(%arg0: i32, %arg1: i32) -> (i32, i32) {
    %c0_i32 = arith.constant 0 : i32
    %c0_i32_0 = arith.constant 0 : i32
    return %arg0, %c0_i32 : i32, i32
  }
  func.func @transform_1(%arg0: i32, %arg1: i32) -> (i32, i32) {
    %c0_i32 = arith.constant 0 : i32
    %c0_i32_0 = arith.constant 0 : i32
    return %c0_i32, %arg1 : i32, i32
  }
  func.func @transform_2(%arg0: i32, %arg1: i32) -> (i32, i32) {
    %c0_i32 = arith.constant 0 : i32
    %c0_i32_0 = arith.constant 0 : i32
    return %c0_i32, %arg1 : i32, i32
  }
  func.func @transform_3(%arg0: i32, %arg1: i32) -> (i32, i32) {
    %c0_i32 = arith.constant 0 : i32
    return %arg0, %arg1 : i32, i32
  }
}

module attributes {stable_mosaic.version = 11 : i64} {
  func.func @_mm_kernel_single(%arg0: i32, %arg1: i32, %arg2: memref<256x864xbf16, #tpu.memory_space<vmem>>, %arg3: memref<864x32xbf16, #tpu.memory_space<vmem>>, %arg4: memref<1x32xf32, #tpu.memory_space<vmem>>, %arg5: memref<256x32xbf16, #tpu.memory_space<vmem>>) attributes {dimension_semantics = [#tpu.dimension_semantics<parallel>, #tpu.dimension_semantics<parallel>], iteration_bounds = array<i64: 2, 1>, scalar_prefetch = 0 : i64, scratch_operands = 0 : i64, tpu.core_type = #tpu.core_type<tc>, window_params = [{transform_indices = @transform_0, window_bounds = array<i64: 256, 864>}, {transform_indices = @transform_1, window_bounds = array<i64: 864, 32>}, {transform_indices = @transform_2, window_bounds = array<i64: 1, 32>}, {transform_indices = @transform_3, window_bounds = array<i64: 256, 32>}]} {
    %c0 = arith.constant 0 : index
    %c0_0 = arith.constant 0 : index
    %0 = vector.load %arg2[%c0, %c0_0] : memref<256x864xbf16, #tpu.memory_space<vmem>>, vector<256x864xbf16>
    %c0_1 = arith.constant 0 : index
    %c0_2 = arith.constant 0 : index
    %1 = vector.load %arg3[%c0_1, %c0_2] : memref<864x32xbf16, #tpu.memory_space<vmem>>, vector<864x32xbf16>
    %cst = arith.constant dense<0.000000e+00> : vector<256x32xf32>
    %2 = tpu.matmul %0, %1, %cst {dimension_numbers = #tpu.dot_dimension_numbers<[1], [0], [0], [1], [0, 0, 1, 1], [], []>} : vector<256x864xbf16>, vector<864x32xbf16>, vector<256x32xf32> -> vector<256x32xf32>
    %c0_3 = arith.constant 0 : index
    %c0_4 = arith.constant 0 : index
    %3 = vector.load %arg4[%c0_3, %c0_4] : memref<1x32xf32, #tpu.memory_space<vmem>>, vector<1x32xf32>
    %4 = vector.broadcast %3 : vector<1x32xf32> to vector<256x32xf32>
    %5 = arith.addf %2, %4 : vector<256x32xf32>
    %cst_5 = arith.constant 0.000000e+00 : f32
    %6 = vector.broadcast %cst_5 : f32 to vector<256x32xf32>
    %7 = arith.maximumf %5, %6 : vector<256x32xf32>
    %8 = arith.truncf %7 : vector<256x32xf32> to vector<256x32xbf16>
    %c0_6 = arith.constant 0 : index
    %c0_7 = arith.constant 0 : index
    %9 = vector.load %arg5[%c0_6, %c0_7] : memref<256x32xbf16, #tpu.memory_space<vmem>>, vector<256x32xbf16>
    tpu.vector_store %arg5[%c0_6, %c0_7], %8 {strides = array<i32>} : memref<256x32xbf16, #tpu.memory_space<vmem>>, vector<256x32xbf16>,
    return
  }
  func.func @transform_0(%arg0: i32, %arg1: i32) -> (i32, i32) {
    %c0_i32 = arith.constant 0 : i32
    %c0_i32_0 = arith.constant 0 : i32
    return %arg0, %c0_i32 : i32, i32
  }
  func.func @transform_1(%arg0: i32, %arg1: i32) -> (i32, i32) {
    %c0_i32 = arith.constant 0 : i32
    %c0_i32_0 = arith.constant 0 : i32
    return %c0_i32, %arg1 : i32, i32
  }
  func.func @transform_2(%arg0: i32, %arg1: i32) -> (i32, i32) {
    %c0_i32 = arith.constant 0 : i32
    %c0_i32_0 = arith.constant 0 : i32
    return %c0_i32, %arg1 : i32, i32
  }
  func.func @transform_3(%arg0: i32, %arg1: i32) -> (i32, i32) {
    %c0_i32 = arith.constant 0 : i32
    return %arg0, %arg1 : i32, i32
  }
}

module attributes {stable_mosaic.version = 11 : i64} {
  func.func @_mm_kernel_single(%arg0: i32, %arg1: i32, %arg2: memref<32x864xbf16, #tpu.memory_space<vmem>>, %arg3: memref<864x64xbf16, #tpu.memory_space<vmem>>, %arg4: memref<1x64xf32, #tpu.memory_space<vmem>>, %arg5: memref<32x64xbf16, #tpu.memory_space<vmem>>) attributes {dimension_semantics = [#tpu.dimension_semantics<parallel>, #tpu.dimension_semantics<parallel>], iteration_bounds = array<i64: 2, 1>, scalar_prefetch = 0 : i64, scratch_operands = 0 : i64, tpu.core_type = #tpu.core_type<tc>, window_params = [{transform_indices = @transform_0, window_bounds = array<i64: 32, 864>}, {transform_indices = @transform_1, window_bounds = array<i64: 864, 64>}, {transform_indices = @transform_2, window_bounds = array<i64: 1, 64>}, {transform_indices = @transform_3, window_bounds = array<i64: 32, 64>}]} {
    %c0 = arith.constant 0 : index
    %c0_0 = arith.constant 0 : index
    %0 = vector.load %arg2[%c0, %c0_0] : memref<32x864xbf16, #tpu.memory_space<vmem>>, vector<32x864xbf16>
    %c0_1 = arith.constant 0 : index
    %c0_2 = arith.constant 0 : index
    %1 = vector.load %arg3[%c0_1, %c0_2] : memref<864x64xbf16, #tpu.memory_space<vmem>>, vector<864x64xbf16>
    %cst = arith.constant dense<0.000000e+00> : vector<32x64xf32>
    %2 = tpu.matmul %0, %1, %cst {dimension_numbers = #tpu.dot_dimension_numbers<[1], [0], [0], [1], [0, 0, 1, 1], [], []>} : vector<32x864xbf16>, vector<864x64xbf16>, vector<32x64xf32> -> vector<32x64xf32>
    %c0_3 = arith.constant 0 : index
    %c0_4 = arith.constant 0 : index
    %3 = vector.load %arg4[%c0_3, %c0_4] : memref<1x64xf32, #tpu.memory_space<vmem>>, vector<1x64xf32>
    %4 = vector.broadcast %3 : vector<1x64xf32> to vector<32x64xf32>
    %5 = arith.addf %2, %4 : vector<32x64xf32>
    %cst_5 = arith.constant 0.000000e+00 : f32
    %6 = vector.broadcast %cst_5 : f32 to vector<32x64xf32>
    %7 = arith.maximumf %5, %6 : vector<32x64xf32>
    %8 = arith.truncf %7 : vector<32x64xf32> to vector<32x64xbf16>
    %c0_6 = arith.constant 0 : index
    %c0_7 = arith.constant 0 : index
    %9 = vector.load %arg5[%c0_6, %c0_7] : memref<32x64xbf16, #tpu.memory_space<vmem>>, vector<32x64xbf16>
    tpu.vector_store %arg5[%c0_6, %c0_7], %8 {strides = array<i32>} : memref<32x64xbf16, #tpu.memory_space<vmem>>, vector<32x64xbf16>,
    return
  }
  func.func @transform_0(%arg0: i32, %arg1: i32) -> (i32, i32) {
    %c0_i32 = arith.constant 0 : i32
    %c0_i32_0 = arith.constant 0 : i32
    return %arg0, %c0_i32 : i32, i32
  }
  func.func @transform_1(%arg0: i32, %arg1: i32) -> (i32, i32) {
    %c0_i32 = arith.constant 0 : i32
    %c0_i32_0 = arith.constant 0 : i32
    return %c0_i32, %arg1 : i32, i32
  }
  func.func @transform_2(%arg0: i32, %arg1: i32) -> (i32, i32) {
    %c0_i32 = arith.constant 0 : i32
    %c0_i32_0 = arith.constant 0 : i32
    return %c0_i32, %arg1 : i32, i32
  }
  func.func @transform_3(%arg0: i32, %arg1: i32) -> (i32, i32) {
    %c0_i32 = arith.constant 0 : i32
    return %arg0, %arg1 : i32, i32
  }
}

module attributes {stable_mosaic.version = 11 : i64} {
  func.func @_mm_kernel_single(%arg0: i32, %arg1: i32, %arg2: memref<32x1728xbf16, #tpu.memory_space<vmem>>, %arg3: memref<1728x64xbf16, #tpu.memory_space<vmem>>, %arg4: memref<1x64xf32, #tpu.memory_space<vmem>>, %arg5: memref<32x64xbf16, #tpu.memory_space<vmem>>) attributes {dimension_semantics = [#tpu.dimension_semantics<parallel>, #tpu.dimension_semantics<parallel>], iteration_bounds = array<i64: 2, 1>, scalar_prefetch = 0 : i64, scratch_operands = 0 : i64, tpu.core_type = #tpu.core_type<tc>, window_params = [{transform_indices = @transform_0, window_bounds = array<i64: 32, 1728>}, {transform_indices = @transform_1, window_bounds = array<i64: 1728, 64>}, {transform_indices = @transform_2, window_bounds = array<i64: 1, 64>}, {transform_indices = @transform_3, window_bounds = array<i64: 32, 64>}]} {
    %c0 = arith.constant 0 : index
    %c0_0 = arith.constant 0 : index
    %0 = vector.load %arg2[%c0, %c0_0] : memref<32x1728xbf16, #tpu.memory_space<vmem>>, vector<32x1728xbf16>
    %c0_1 = arith.constant 0 : index
    %c0_2 = arith.constant 0 : index
    %1 = vector.load %arg3[%c0_1, %c0_2] : memref<1728x64xbf16, #tpu.memory_space<vmem>>, vector<1728x64xbf16>
    %cst = arith.constant dense<0.000000e+00> : vector<32x64xf32>
    %2 = tpu.matmul %0, %1, %cst {dimension_numbers = #tpu.dot_dimension_numbers<[1], [0], [0], [1], [0, 0, 1, 1], [], []>} : vector<32x1728xbf16>, vector<1728x64xbf16>, vector<32x64xf32> -> vector<32x64xf32>
    %c0_3 = arith.constant 0 : index
    %c0_4 = arith.constant 0 : index
    %3 = vector.load %arg4[%c0_3, %c0_4] : memref<1x64xf32, #tpu.memory_space<vmem>>, vector<1x64xf32>
    %4 = vector.broadcast %3 : vector<1x64xf32> to vector<32x64xf32>
    %5 = arith.addf %2, %4 : vector<32x64xf32>
    %cst_5 = arith.constant 0.000000e+00 : f32
    %6 = vector.broadcast %cst_5 : f32 to vector<32x64xf32>
    %7 = arith.maximumf %5, %6 : vector<32x64xf32>
    %8 = arith.truncf %7 : vector<32x64xf32> to vector<32x64xbf16>
    %c0_6 = arith.constant 0 : index
    %c0_7 = arith.constant 0 : index
    %9 = vector.load %arg5[%c0_6, %c0_7] : memref<32x64xbf16, #tpu.memory_space<vmem>>, vector<32x64xbf16>
    tpu.vector_store %arg5[%c0_6, %c0_7], %8 {strides = array<i32>} : memref<32x64xbf16, #tpu.memory_space<vmem>>, vector<32x64xbf16>,
    return
  }
  func.func @transform_0(%arg0: i32, %arg1: i32) -> (i32, i32) {
    %c0_i32 = arith.constant 0 : i32
    %c0_i32_0 = arith.constant 0 : i32
    return %arg0, %c0_i32 : i32, i32
  }
  func.func @transform_1(%arg0: i32, %arg1: i32) -> (i32, i32) {
    %c0_i32 = arith.constant 0 : i32
    %c0_i32_0 = arith.constant 0 : i32
    return %c0_i32, %arg1 : i32, i32
  }
  func.func @transform_2(%arg0: i32, %arg1: i32) -> (i32, i32) {
    %c0_i32 = arith.constant 0 : i32
    %c0_i32_0 = arith.constant 0 : i32
    return %c0_i32, %arg1 : i32, i32
  }
  func.func @transform_3(%arg0: i32, %arg1: i32) -> (i32, i32) {
    %c0_i32 = arith.constant 0 : i32
    return %arg0, %arg1 : i32, i32
  }
}

module attributes {stable_mosaic.version = 11 : i64} {
  func.func @_mm_kernel_single(%arg0: i32, %arg1: i32, %arg2: memref<32x512xbf16, #tpu.memory_space<vmem>>, %arg3: memref<512x256xbf16, #tpu.memory_space<vmem>>, %arg4: memref<32x256xbf16, #tpu.memory_space<vmem>>, %arg5: memref<256x256xbf16, #tpu.memory_space<vmem>>, %arg6: memref<1x256xf32, #tpu.memory_space<vmem>>, %arg7: memref<32x256xbf16, #tpu.memory_space<vmem>>) attributes {dimension_semantics = [#tpu.dimension_semantics<parallel>, #tpu.dimension_semantics<parallel>], iteration_bounds = array<i64: 2, 1>, scalar_prefetch = 0 : i64, scratch_operands = 0 : i64, tpu.core_type = #tpu.core_type<tc>, window_params = [{transform_indices = @transform_0, window_bounds = array<i64: 32, 512>}, {transform_indices = @transform_1, window_bounds = array<i64: 512, 256>}, {transform_indices = @transform_2, window_bounds = array<i64: 32, 256>}, {transform_indices = @transform_3, window_bounds = array<i64: 256, 256>}, {transform_indices = @transform_4, window_bounds = array<i64: 1, 256>}, {transform_indices = @transform_5, window_bounds = array<i64: 32, 256>}]} {
    %c0 = arith.constant 0 : index
    %c0_0 = arith.constant 0 : index
    %0 = vector.load %arg2[%c0, %c0_0] : memref<32x512xbf16, #tpu.memory_space<vmem>>, vector<32x512xbf16>
    %c0_1 = arith.constant 0 : index
    %c0_2 = arith.constant 0 : index
    %1 = vector.load %arg3[%c0_1, %c0_2] : memref<512x256xbf16, #tpu.memory_space<vmem>>, vector<512x256xbf16>
    %cst = arith.constant dense<0.000000e+00> : vector<32x256xf32>
    %2 = tpu.matmul %0, %1, %cst {dimension_numbers = #tpu.dot_dimension_numbers<[1], [0], [0], [1], [0, 0, 1, 1], [], []>} : vector<32x512xbf16>, vector<512x256xbf16>, vector<32x256xf32> -> vector<32x256xf32>
    %c0_3 = arith.constant 0 : index
    %c0_4 = arith.constant 0 : index
    %3 = vector.load %arg4[%c0_3, %c0_4] : memref<32x256xbf16, #tpu.memory_space<vmem>>, vector<32x256xbf16>
    %c0_5 = arith.constant 0 : index
    %c0_6 = arith.constant 0 : index
    %4 = vector.load %arg5[%c0_5, %c0_6] : memref<256x256xbf16, #tpu.memory_space<vmem>>, vector<256x256xbf16>
    %cst_7 = arith.constant dense<0.000000e+00> : vector<32x256xf32>
    %5 = tpu.matmul %3, %4, %cst_7 {dimension_numbers = #tpu.dot_dimension_numbers<[1], [0], [0], [1], [0, 0, 1, 1], [], []>} : vector<32x256xbf16>, vector<256x256xbf16>, vector<32x256xf32> -> vector<32x256xf32>
    %6 = arith.addf %2, %5 : vector<32x256xf32>
    %c0_8 = arith.constant 0 : index
    %c0_9 = arith.constant 0 : index
    %7 = vector.load %arg6[%c0_8, %c0_9] : memref<1x256xf32, #tpu.memory_space<vmem>>, vector<1x256xf32>
    %8 = vector.broadcast %7 : vector<1x256xf32> to vector<32x256xf32>
    %9 = arith.addf %6, %8 : vector<32x256xf32>
    %cst_10 = arith.constant 0.000000e+00 : f32
    %10 = vector.broadcast %cst_10 : f32 to vector<32x256xf32>
    %11 = arith.maximumf %9, %10 : vector<32x256xf32>
    %12 = arith.truncf %11 : vector<32x256xf32> to vector<32x256xbf16>
    %c0_11 = arith.constant 0 : index
    %c0_12 = arith.constant 0 : index
    %13 = vector.load %arg7[%c0_11, %c0_12] : memref<32x256xbf16, #tpu.memory_space<vmem>>, vector<32x256xbf16>
    tpu.vector_store %arg7[%c0_11, %c0_12], %12 {strides = array<i32>} : memref<32x256xbf16, #tpu.memory_space<vmem>>, vector<32x256xbf16>,
    return
  }
  func.func @transform_0(%arg0: i32, %arg1: i32) -> (i32, i32) {
    %c0_i32 = arith.constant 0 : i32
    %c0_i32_0 = arith.constant 0 : i32
    return %arg0, %c0_i32 : i32, i32
  }
  func.func @transform_1(%arg0: i32, %arg1: i32) -> (i32, i32) {
    %c0_i32 = arith.constant 0 : i32
    %c0_i32_0 = arith.constant 0 : i32
    return %c0_i32, %arg1 : i32, i32
  }
  func.func @transform_2(%arg0: i32, %arg1: i32) -> (i32, i32) {
    %c0_i32 = arith.constant 0 : i32
    %c0_i32_0 = arith.constant 0 : i32
    return %arg0, %c0_i32 : i32, i32
  }
  func.func @transform_3(%arg0: i32, %arg1: i32) -> (i32, i32) {
    %c0_i32 = arith.constant 0 : i32
    %c0_i32_0 = arith.constant 0 : i32
    return %c0_i32, %arg1 : i32, i32
  }
  func.func @transform_4(%arg0: i32, %arg1: i32) -> (i32, i32) {
    %c0_i32 = arith.constant 0 : i32
    %c0_i32_0 = arith.constant 0 : i32
    return %c0_i32, %arg1 : i32, i32
  }
  func.func @transform_5(%arg0: i32, %arg1: i32) -> (i32, i32) {
    %c0_i32 = arith.constant 0 : i32
    return %arg0, %arg1 : i32, i32
  }
}

module attributes {stable_mosaic.version = 11 : i64} {
  func.func @_mm_kernel_single(%arg0: i32, %arg1: i32, %arg2: memref<256x256xbf16, #tpu.memory_space<vmem>>, %arg3: memref<256x128xbf16, #tpu.memory_space<vmem>>, %arg4: memref<256x128xbf16, #tpu.memory_space<vmem>>, %arg5: memref<128x128xbf16, #tpu.memory_space<vmem>>, %arg6: memref<1x128xf32, #tpu.memory_space<vmem>>, %arg7: memref<256x128xbf16, #tpu.memory_space<vmem>>) attributes {dimension_semantics = [#tpu.dimension_semantics<parallel>, #tpu.dimension_semantics<parallel>], iteration_bounds = array<i64: 2, 1>, scalar_prefetch = 0 : i64, scratch_operands = 0 : i64, tpu.core_type = #tpu.core_type<tc>, window_params = [{transform_indices = @transform_0, window_bounds = array<i64: 256, 256>}, {transform_indices = @transform_1, window_bounds = array<i64: 256, 128>}, {transform_indices = @transform_2, window_bounds = array<i64: 256, 128>}, {transform_indices = @transform_3, window_bounds = array<i64: 128, 128>}, {transform_indices = @transform_4, window_bounds = array<i64: 1, 128>}, {transform_indices = @transform_5, window_bounds = array<i64: 256, 128>}]} {
    %c0 = arith.constant 0 : index
    %c0_0 = arith.constant 0 : index
    %0 = vector.load %arg2[%c0, %c0_0] : memref<256x256xbf16, #tpu.memory_space<vmem>>, vector<256x256xbf16>
    %c0_1 = arith.constant 0 : index
    %c0_2 = arith.constant 0 : index
    %1 = vector.load %arg3[%c0_1, %c0_2] : memref<256x128xbf16, #tpu.memory_space<vmem>>, vector<256x128xbf16>
    %cst = arith.constant dense<0.000000e+00> : vector<256x128xf32>
    %2 = tpu.matmul %0, %1, %cst {dimension_numbers = #tpu.dot_dimension_numbers<[1], [0], [0], [1], [0, 0, 1, 1], [], []>} : vector<256x256xbf16>, vector<256x128xbf16>, vector<256x128xf32> -> vector<256x128xf32>
    %c0_3 = arith.constant 0 : index
    %c0_4 = arith.constant 0 : index
    %3 = vector.load %arg4[%c0_3, %c0_4] : memref<256x128xbf16, #tpu.memory_space<vmem>>, vector<256x128xbf16>
    %c0_5 = arith.constant 0 : index
    %c0_6 = arith.constant 0 : index
    %4 = vector.load %arg5[%c0_5, %c0_6] : memref<128x128xbf16, #tpu.memory_space<vmem>>, vector<128x128xbf16>
    %cst_7 = arith.constant dense<0.000000e+00> : vector<256x128xf32>
    %5 = tpu.matmul %3, %4, %cst_7 {dimension_numbers = #tpu.dot_dimension_numbers<[1], [0], [0], [1], [0, 0, 1, 1], [], []>} : vector<256x128xbf16>, vector<128x128xbf16>, vector<256x128xf32> -> vector<256x128xf32>
    %6 = arith.addf %2, %5 : vector<256x128xf32>
    %c0_8 = arith.constant 0 : index
    %c0_9 = arith.constant 0 : index
    %7 = vector.load %arg6[%c0_8, %c0_9] : memref<1x128xf32, #tpu.memory_space<vmem>>, vector<1x128xf32>
    %8 = vector.broadcast %7 : vector<1x128xf32> to vector<256x128xf32>
    %9 = arith.addf %6, %8 : vector<256x128xf32>
    %cst_10 = arith.constant 0.000000e+00 : f32
    %10 = vector.broadcast %cst_10 : f32 to vector<256x128xf32>
    %11 = arith.maximumf %9, %10 : vector<256x128xf32>
    %12 = arith.truncf %11 : vector<256x128xf32> to vector<256x128xbf16>
    %c0_11 = arith.constant 0 : index
    %c0_12 = arith.constant 0 : index
    %13 = vector.load %arg7[%c0_11, %c0_12] : memref<256x128xbf16, #tpu.memory_space<vmem>>, vector<256x128xbf16>
    tpu.vector_store %arg7[%c0_11, %c0_12], %12 {strides = array<i32>} : memref<256x128xbf16, #tpu.memory_space<vmem>>, vector<256x128xbf16>,
    return
  }
  func.func @transform_0(%arg0: i32, %arg1: i32) -> (i32, i32) {
    %c0_i32 = arith.constant 0 : i32
    %c0_i32_0 = arith.constant 0 : i32
    return %arg0, %c0_i32 : i32, i32
  }
  func.func @transform_1(%arg0: i32, %arg1: i32) -> (i32, i32) {
    %c0_i32 = arith.constant 0 : i32
    %c0_i32_0 = arith.constant 0 : i32
    return %c0_i32, %arg1 : i32, i32
  }
  func.func @transform_2(%arg0: i32, %arg1: i32) -> (i32, i32) {
    %c0_i32 = arith.constant 0 : i32
    %c0_i32_0 = arith.constant 0 : i32
    return %arg0, %c0_i32 : i32, i32
  }
  func.func @transform_3(%arg0: i32, %arg1: i32) -> (i32, i32) {
    %c0_i32 = arith.constant 0 : i32
    %c0_i32_0 = arith.constant 0 : i32
    return %c0_i32, %arg1 : i32, i32
  }
  func.func @transform_4(%arg0: i32, %arg1: i32) -> (i32, i32) {
    %c0_i32 = arith.constant 0 : i32
    %c0_i32_0 = arith.constant 0 : i32
    return %c0_i32, %arg1 : i32, i32
  }
  func.func @transform_5(%arg0: i32, %arg1: i32) -> (i32, i32) {
    %c0_i32 = arith.constant 0 : i32
    return %arg0, %arg1 : i32, i32
  }
}

</mosaic_0001>

<bundles_post_ra>
// kernel: hourglass_forward.6
= control target key start
LH: loop header
LB: loop body
LE: loop exit
PB: predicated region body
PF: predicated region fallthrough
CT: control target
= control target key end

     0   :  { %s1978_s12 = smov 0   ;;  %s1980_s13 = smov 0   ;;  %s2295_s0 = inlined_call_operand.vmem [shape: bf16[512,432], index: 0, kind: input, shape index: {}]   ;;  %s2296_s1 = inlined_call_operand.vmem [shape: bf16[432,32], index: 1, kind: input, shape index: {}]   ;;  %s2297_s2 = inlined_call_operand.vmem [shape: f32[1,32], index: 2, kind: input, shape index: {}]   ;;  %s2298_s3 = inlined_call_operand.vmem [shape: bf16[512,32], index: 3, kind: output, shape index: {}]  }
   0x1   :  { %s1982_s14 = smov 0  }
   0x2 LB: > { %s25_s15 = sadd.s32 1, %s1951_s13  ;;  %p1492_p0 = scmp.ge.s32.totalorder %s1955_s14, 1  ;;  %s1955_s14 = sphi %s1982_s14, %s13_s14   ;;  %s1951_s13 = sphi %s1980_s13, %s2300_s13   ;;  %s1947_s12 = sphi %s1978_s12, %s2299_s12  }
   0x3   : > { %p27_p1 = scmp.ge.s32.totalorder %s25_s15, 2  ;;  %p170_p2 = scmp.lt.s32.totalorder %s1955_s14, 3 }
   0x5   : > { %s2302_s15 = smov (%p27_p1, %s25_s15), 0  ;;  %p171_p3 = pnand %p1492_p0, %p170_p2 }
   0x6   : > { %s1493_s7 = sshll.u32 (!%p171_p3), %s1947_s12, 5 }
   0x7   : > { %174 = sbr.rel (%p171_p3) target bundleno = 381 (0x17d), region = 32  ;;  %p206_p4 = scmp.lt.s32.totalorder (!%p171_p3), %s1493_s7, 63 }
   0xc   : > { %v1810_v0 = vld [vmem:[%s2296_s1 + $0x78] sm:$0xff]   ;;  %v1957_v1 = vmov 0   ;;  %v1813_v4 = vld [vmem:[%s2296_s1 + $0x70] sm:$0xff]   ;;  %v1816_v7 = vld [vmem:[%s2296_s1 + $0x68] sm:$0xff]   ;;  %s2304_s7 = smov (!%p206_p4, %s1493_s7), 63  ;;  %vm820_vm0 = vcmask 392192  }
   0xd   : > { %1030 = vmatprep.subr.bf16.mxu1 %v1957_v1  ;;  %v1811_v2 = vld [vmem:[%s2296_s1 + $0xb8] sm:$0xff]   ;;  %1673 = vmatprep.subr.bf16.mxu0 %v1810_v0  ;;  %v1814_v5 = vld [vmem:[%s2296_s1 + $0xb0] sm:$0xff]   ;;  %v1817_v8 = vld [vmem:[%s2296_s1 + $0xa8] sm:$0xff]   ;;  %s1640_s27 = sshll.u32 %s2304_s7, 4  ;;  %s1497_s30 = sshll.u32 %s2304_s7, 2  ;;  %vm1351_vm1 = vcmask 257024  }
   0xe   : > { %v1812_v3 = vld [vmem:[%s2296_s1 + $0x38] sm:$0xff]   ;;  %1031 = vmatpush1.bf16.msra.mxu1 %v1811_v2  ;;  %v1815_v6 = vld [vmem:[%s2296_s1 + $0x30] sm:$0xff]   ;;  %v1818_v9 = vld [vmem:[%s2296_s1 + $0x28] sm:$0xff]   ;;  %s2071_s10 = scalar_lea.vmem %s2295_s0, %s1640_s27  ;;  %s2190_s6 = scalar_lea.vmem %s2298_s3, %s1497_s30 }
   0xf   : > { %1674 = vmatpush3.bf16.msra.mxu0 %v1812_v3  ;;  %1032 = vmatprep.subr.bf16.mxu1 %v1957_v1  ;;  %v1819_v10 = vld [vmem:[%s2296_s1 + $0x60] sm:$0xff]   ;;  %v1822_v13 = vld [vmem:[%s2296_s1 + $0x58] sm:$0xff]   ;;  %v1825_v16 = vld [vmem:[%s2296_s1 + $0x50] sm:$0xff]  }
  0x10   : > { %1675 = vmatprep.subr.bf16.mxu0 %v1813_v4  ;;  %v1820_v11 = vld [vmem:[%s2296_s1 + $0xa0] sm:$0xff]   ;;  %v1823_v14 = vld [vmem:[%s2296_s1 + $0x98] sm:$0xff]   ;;  %v1826_v17 = vld [vmem:[%s2296_s1 + $0x90] sm:$0xff]  }
  0x11   : > { %v1821_v12 = vld [vmem:[%s2296_s1 + $0x20] sm:$0xff]   ;;  %v1824_v15 = vld [vmem:[%s2296_s1 + $0x18] sm:$0xff]   ;;  %v1827_v18 = vld [vmem:[%s2296_s1 + $0x10] sm:$0xff]  }
  0x12   : > { %1033 = vmatpush1.bf16.msra.mxu1 %v1814_v5  ;;  %v1828_v19 = vld [vmem:[%s2296_s1 + $0x48] sm:$0xff]   ;;  %v1831_v22 = vld [vmem:[%s2296_s1 + $0x40] sm:$0xff]   ;;  %v1837_v28 = vld [vmem:[%s2296_s1 + $0xd0] sm:$0xff]  }
  0x13   : > { %1676 = vmatpush3.bf16.msra.mxu0 %v1815_v6  ;;  %1034 = vmatprep.subr.bf16.mxu1 %v1957_v1  ;;  %v1829_v20 = vld [vmem:[%s2296_s1 + $0x88] sm:$0xff]   ;;  %v1836_v23 = vld [vmem:[%s2071_s10 + $0x4] ss:$16 sps:$4 sm:$0xff]   ;;  %v1834_v26 = vld [vmem:[%s2071_s10] ss:$16 sps:$4 sm:$0xff]  }
  0x14   : > { %1677 = vmatprep.subr.bf16.mxu0 %v1816_v7  ;;  %v1830_v21 = vld [vmem:[%s2296_s1 + $0x8] sm:$0xff]   ;;  %v1832_v24 = vld [vmem:[%s2296_s1 + $0x80] sm:$0xff]   ;;  %901 = vmatprep.mubr.bf16.mxu0 %v1836_v23 }
  0x15   : > { %v1833_v25 = vld [vmem:[%s2296_s1] sm:$0xff]   ;;  %v1845_v27 = vld [vmem:[%s2071_s10 + $0xc] ss:$16 sps:$4 sm:$0xff]   ;;  %v1843_v34 = vld [vmem:[%s2071_s10 + $0x8] ss:$16 sps:$4 sm:$0xff]  }
  0x16   : > { %1035 = vmatpush1.bf16.msra.mxu1 %v1817_v8  ;;  %v1839_v29 = vld [vmem:[%s2071_s10 + $0x24] ss:$16 sps:$4 sm:$0xff]   ;;  %1590 = vmatprep.mubr.msk.bf16.mxu1 %vm820_vm0, %v1845_v27  ;;  %v1838_v30 = vld [vmem:[%s2296_s1 + $0xc8] sm:$0xff]   ;;  %v1841_v31 = vld [vmem:[%s2071_s10 + $0x20] ss:$16 sps:$4 sm:$0xff]  }
  0x17   : > { %1678 = vmatpush3.bf16.msra.mxu0 %v1818_v9  ;;  %1036 = vmatprep.subr.bf16.mxu1 %v1957_v1  ;;  %v1842_v32 = vld [vmem:[%s2296_s1 + $0xc0] sm:$0xff]   ;;  %v1849_v35 = vld [vmem:[%s2071_s10 + $0x2c] ss:$16 sps:$4 sm:$0xff]   ;;  %v1851_v38 = vld [vmem:[%s2071_s10 + $0x28] ss:$16 sps:$4 sm:$0xff]  }
  0x18   : > { %1679 = vmatprep.subr.bf16.mxu0 %v1819_v10  ;;  %v1846_v33 = vld [vmem:[%s2071_s10 + $0x44] ss:$16 sps:$4 sm:$0xff]   ;;  %v1848_v36 = vld [vmem:[%s2071_s10 + $0x40] ss:$16 sps:$4 sm:$0xff]   ;;  %v1855_v39 = vld [vmem:[%s2071_s10 + $0x4c] ss:$16 sps:$4 sm:$0xff]  }
  0x19   : > { %v1852_v37 = vld [vmem:[%s2071_s10 + $0x64] ss:$16 sps:$4 sm:$0xff]   ;;  %v1854_v40 = vld [vmem:[%s2071_s10 + $0x60] ss:$16 sps:$4 sm:$0xff]   ;;  %v1857_v42 = vld [vmem:[%s2071_s10 + $0x48] ss:$16 sps:$4 sm:$0xff]  }
  0x1a   : > { %1037 = vmatpush1.bf16.msra.mxu1 %v1820_v11  ;;  %v1858_v41 = vld [vmem:[%s2071_s10 + $0x84] ss:$16 sps:$4 sm:$0xff]   ;;  %v1861_v43 = vld [vmem:[%s2071_s10 + $0x6c] ss:$16 sps:$4 sm:$0xff]   ;;  %v1860_v44 = vld [vmem:[%s2071_s10 + $0x80] ss:$16 sps:$4 sm:$0xff]  }
  0x1b   : > { %1680 = vmatpush3.bf16.msra.mxu0 %v1821_v12  ;;  %1038 = vmatprep.subr.bf16.mxu1 %v1957_v1  ;;  %v1864_v45 = vld [vmem:[%s2071_s10 + $0xa4] ss:$16 sps:$4 sm:$0xff]   ;;  %v1863_v46 = vld [vmem:[%s2071_s10 + $0x68] ss:$16 sps:$4 sm:$0xff]   ;;  %v1867_v47 = vld [vmem:[%s2071_s10 + $0x8c] ss:$16 sps:$4 sm:$0xff]  }
  0x1c   : > { %1681 = vmatprep.subr.bf16.mxu0 %v1822_v13  ;;  %v1866_v48 = vld [vmem:[%s2071_s10 + $0xa0] ss:$16 sps:$4 sm:$0xff]   ;;  %v1870_v49 = vld [vmem:[%s2071_s10 + $0xc4] ss:$16 sps:$4 sm:$0xff]   ;;  %v1869_v50 = vld [vmem:[%s2071_s10 + $0x88] ss:$16 sps:$4 sm:$0xff]  }
  0x1d   : > { %v1873_v51 = vld [vmem:[%s2071_s10 + $0xac] ss:$16 sps:$4 sm:$0xff]   ;;  %v1872_v52 = vld [vmem:[%s2071_s10 + $0xc0] ss:$16 sps:$4 sm:$0xff]   ;;  %v1876_v53 = vld [vmem:[%s2071_s10 + $0xe4] ss:$16 sps:$4 sm:$0xff]  }
  0x1e   : > { %1039 = vmatpush1.bf16.msra.mxu1 %v1823_v14  ;;  %v1875_v54 = vld [vmem:[%s2071_s10 + $0xa8] ss:$16 sps:$4 sm:$0xff]   ;;  %v1879_v55 = vld [vmem:[%s2071_s10 + $0xcc] ss:$16 sps:$4 sm:$0xff]   ;;  %v1878_v56 = vld [vmem:[%s2071_s10 + $0xe0] ss:$16 sps:$4 sm:$0xff]  }
  0x1f   : > { %1682 = vmatpush3.bf16.msra.mxu0 %v1824_v15  ;;  %1040 = vmatprep.subr.bf16.mxu1 %v1957_v1  ;;  %v1882_v57 = vld [vmem:[%s2071_s10 + $0x104] ss:$16 sps:$4 sm:$0xff]   ;;  %v1881_v58 = vld [vmem:[%s2071_s10 + $0xc8] ss:$16 sps:$4 sm:$0xff]   ;;  %v1885_v59 = vld [vmem:[%s2071_s10 + $0xec] ss:$16 sps:$4 sm:$0xff]  }
  0x20   : > { %1683 = vmatprep.subr.bf16.mxu0 %v1825_v16  ;;  %v1884_v60 = vld [vmem:[%s2071_s10 + $0x100] ss:$16 sps:$4 sm:$0xff]   ;;  %v1888_v61 = vld [vmem:[%s2071_s10 + $0x124] ss:$16 sps:$4 sm:$0xff]   ;;  %v1887_v62 = vld [vmem:[%s2071_s10 + $0xe8] ss:$16 sps:$4 sm:$0xff]  }
  0x21   : > { %v1891_v63 = vld [vmem:[%s2071_s10 + $0x10c] ss:$16 sps:$4 sm:$0xff]   ;;  %v1890_v0 = vld [vmem:[%s2071_s10 + $0x120] ss:$16 sps:$4 sm:$0xff]   ;;  %v1893_v2 = vld [vmem:[%s2071_s10 + $0x108] ss:$16 sps:$4 sm:$0xff]  }
  0x22   : > { %1041 = vmatpush1.bf16.msra.mxu1 %v1826_v17  ;;  %v1897_v3 = vld [vmem:[%s2071_s10 + $0x12c] ss:$16 sps:$4 sm:$0xff]   ;;  %v1896_v4 = vld [vmem:[%s2071_s10 + $0x140] ss:$16 sps:$4 sm:$0xff]   ;;  %v1900_v5 = vld [vmem:[%s2071_s10 + $0x164] ss:$16 sps:$4 sm:$0xff]  }
  0x23   : > { %1684 = vmatpush3.bf16.msra.mxu0 %v1827_v18  ;;  %1042 = vmatprep.subr.bf16.mxu1 %v1957_v1  ;;  %v1899_v6 = vld [vmem:[%s2071_s10 + $0x128] ss:$16 sps:$4 sm:$0xff]   ;;  %v1903_v7 = vld [vmem:[%s2071_s10 + $0x14c] ss:$16 sps:$4 sm:$0xff]   ;;  %v1902_v8 = vld [vmem:[%s2071_s10 + $0x160] ss:$16 sps:$4 sm:$0xff]  }
  0x24   : > { %1685 = vmatprep.subr.bf16.mxu0 %v1828_v19  ;;  %v1906_v9 = vld [vmem:[%s2071_s10 + $0x184] ss:$16 sps:$4 sm:$0xff]   ;;  %v1905_v10 = vld [vmem:[%s2071_s10 + $0x148] ss:$16 sps:$4 sm:$0xff]   ;;  %v1909_v11 = vld [vmem:[%s2071_s10 + $0x16c] ss:$16 sps:$4 sm:$0xff]  }
  0x25   : > { %v1908_v12 = vld [vmem:[%s2071_s10 + $0x180] ss:$16 sps:$4 sm:$0xff]   ;;  %v1912_v13 = vld [vmem:[%s2071_s10 + $0x1a4] ss:$16 sps:$4 sm:$0xff]   ;;  %v1911_v14 = vld [vmem:[%s2071_s10 + $0x168] ss:$16 sps:$4 sm:$0xff]  }
  0x26   : > { %1043 = vmatpush1.bf16.msra.mxu1 %v1829_v20  ;;  %v1915_v15 = vld [vmem:[%s2071_s10 + $0x18c] ss:$16 sps:$4 sm:$0xff]   ;;  %v1914_v16 = vld [vmem:[%s2071_s10 + $0x1a0] ss:$16 sps:$4 sm:$0xff]   ;;  %v1918_v17 = vld [vmem:[%s2071_s10 + $0x1c4] ss:$16 sps:$4 sm:$0xff]  }
  0x27   : > { %1686 = vmatpush3.bf16.msra.mxu0 %v1830_v21  ;;  %1044 = vmatprep.subr.bf16.mxu1 %v1957_v1  ;;  %v1917_v18 = vld [vmem:[%s2071_s10 + $0x188] ss:$16 sps:$4 sm:$0xff]   ;;  %v1921_v19 = vld [vmem:[%s2071_s10 + $0x1ac] ss:$16 sps:$4 sm:$0xff]   ;;  %v1920_v20 = vld [vmem:[%s2071_s10 + $0x1c0] ss:$16 sps:$4 sm:$0xff]  }
  0x28   : > { %1687 = vmatprep.subr.bf16.mxu0 %v1831_v22  ;;  %v1924_v21 = vld [vmem:[%s2071_s10 + $0x1e4] ss:$16 sps:$4 sm:$0xff]   ;;  %v1923_v22 = vld [vmem:[%s2071_s10 + $0x1a8] ss:$16 sps:$4 sm:$0xff]   ;;  %v1927_v23 = vld [vmem:[%s2071_s10 + $0x1cc] ss:$16 sps:$4 sm:$0xff]  }
  0x29   : > { %v1932_v27 = vld [vmem:[%s2071_s10 + $0x1e8] ss:$16 sps:$4 sm:$0xff]  }
  0x2a   : > { %1045 = vmatpush1.bf16.msra.mxu1 %v1832_v24  ;;  %v1926_v24 = vld [vmem:[%s2071_s10 + $0x1e0] ss:$16 sps:$4 sm:$0xff]  }
  0x2b   : > { %1688 = vmatpush3.bf16.msra.mxu0 %v1833_v25  ;;  %1056 = vmatprep.subr.bf16.mxu1 %v1957_v1  ;;  %v1929_v25 = vld [vmem:[%s2071_s10 + $0x1c8] ss:$16 sps:$4 sm:$0xff]  }
  0x2e   : > { %902 = vmatmul.mubr.bf16.vlgmr.msra.gmra.mxu0 %v1834_v26  ;;  %1057 = vmatpush2.bf16.msra.mxu1 %v1837_v28  ;;  %v1930_v26 = vld [vmem:[%s2071_s10 + $0x1ec] ss:$16 sps:$4 sm:$0xff]  }
  0x2f   : > { %1058 = vmatprep.subr.bf16.mxu1 %v1957_v1  ;;  %909 = vmatprep.mubr.bf16.mxu0 %v1839_v29 }
  0x32   : > { %1059 = vmatpush2.bf16.msra.mxu1 %v1838_v30 }
  0x33   : > { %1060 = vmatprep.subr.bf16.mxu1 %v1957_v1  ;;  %v1894_v1 = vld [vmem:[%s2071_s10 + $0x144] ss:$16 sps:$4 sm:$0xff]  }
  0x36   : > { %910 = vmatmul.mubr.bf16.gmra.mxu0 %v1841_v31  ;;  %1061 = vmatpush2.bf16.msra.mxu1 %v1842_v32 }
  0x37   : > { %917 = vmatprep.mubr.bf16.mxu0 %v1846_v33  ;;  %v2182_v33 = vld [vmem:[%s2297_s2] ss:$0 sm:$0xff] }
  0x39   : > { %1063 = vmatmul.mubr.bf16.vlgmr.msra.gmra.mxu1 %v1843_v34 }
  0x3a   : > { %1591 = vmatprep.mubr.msk.bf16.mxu1 %vm820_vm0, %v1849_v35 }
  0x3e   : > { %918 = vmatmul.mubr.bf16.gmra.mxu0 %v1848_v36 }
  0x3f   : > { %925 = vmatprep.mubr.bf16.mxu0 %v1852_v37 }
  0x41   : > { %1071 = vmatmul.mubr.bf16.gmra.mxu1 %v1851_v38 }
  0x42   : > { %1592 = vmatprep.mubr.msk.bf16.mxu1 %vm820_vm0, %v1855_v39 }
  0x46   : > { %926 = vmatmul.mubr.bf16.gmra.mxu0 %v1854_v40 }
  0x47   : > { %933 = vmatprep.mubr.bf16.mxu0 %v1858_v41 }
  0x49   : > { %1079 = vmatmul.mubr.bf16.gmra.mxu1 %v1857_v42 }
  0x4a   : > { %1593 = vmatprep.mubr.msk.bf16.mxu1 %vm820_vm0, %v1861_v43 }
  0x4e   : > { %934 = vmatmul.mubr.bf16.gmra.mxu0 %v1860_v44 }
  0x4f   : > { %941 = vmatprep.mubr.bf16.mxu0 %v1864_v45 }
  0x51   : > { %1087 = vmatmul.mubr.bf16.gmra.mxu1 %v1863_v46 }
  0x52   : > { %1594 = vmatprep.mubr.msk.bf16.mxu1 %vm820_vm0, %v1867_v47 }
  0x56   : > { %942 = vmatmul.mubr.bf16.gmra.mxu0 %v1866_v48 }
  0x57   : > { %949 = vmatprep.mubr.bf16.mxu0 %v1870_v49 }
  0x59   : > { %1095 = vmatmul.mubr.bf16.gmra.mxu1 %v1869_v50 }
  0x5a   : > { %1595 = vmatprep.mubr.msk.bf16.mxu1 %vm820_vm0, %v1873_v51 }
  0x5e   : > { %950 = vmatmul.mubr.bf16.gmra.mxu0 %v1872_v52 }
  0x5f   : > { %957 = vmatprep.mubr.bf16.mxu0 %v1876_v53 }
  0x61   : > { %1103 = vmatmul.mubr.bf16.gmra.mxu1 %v1875_v54 }
  0x62   : > { %1596 = vmatprep.mubr.msk.bf16.mxu1 %vm820_vm0, %v1879_v55 }
  0x66   : > { %958 = vmatmul.mubr.bf16.gmra.mxu0 %v1878_v56 }
  0x67   : > { %965 = vmatprep.mubr.bf16.mxu0 %v1882_v57 }
  0x69   : > { %1111 = vmatmul.mubr.bf16.gmra.mxu1 %v1881_v58 }
  0x6a   : > { %1597 = vmatprep.mubr.msk.bf16.mxu1 %vm820_vm0, %v1885_v59 }
  0x6e   : > { %966 = vmatmul.mubr.bf16.gmra.mxu0 %v1884_v60 }
  0x6f   : > { %973 = vmatprep.mubr.bf16.mxu0 %v1888_v61 }
  0x71   : > { %1119 = vmatmul.mubr.bf16.gmra.mxu1 %v1887_v62 }
  0x72   : > { %1598 = vmatprep.mubr.msk.bf16.mxu1 %vm820_vm0, %v1891_v63 }
  0x76   : > { %974 = vmatmul.mubr.bf16.gmra.mxu0 %v1890_v0 }
  0x77   : > { %981 = vmatprep.mubr.bf16.mxu0 %v1894_v1 }
  0x79   : > { %1127 = vmatmul.mubr.bf16.gmra.mxu1 %v1893_v2 }
  0x7a   : > { %1599 = vmatprep.mubr.msk.bf16.mxu1 %vm820_vm0, %v1897_v3 }
  0x7e   : > { %982 = vmatmul.mubr.bf16.gmra.mxu0 %v1896_v4 }
  0x7f   : > { %989 = vmatprep.mubr.bf16.mxu0 %v1900_v5 }
  0x81   : > { %1135 = vmatmul.mubr.bf16.gmra.mxu1 %v1899_v6 }
  0x82   : > { %1600 = vmatprep.mubr.msk.bf16.mxu1 %vm820_vm0, %v1903_v7 }
  0x86   : > { %990 = vmatmul.mubr.bf16.gmra.mxu0 %v1902_v8 }
  0x87   : > { %997 = vmatprep.mubr.bf16.mxu0 %v1906_v9 }
  0x89   : > { %1143 = vmatmul.mubr.bf16.gmra.mxu1 %v1905_v10 }
  0x8a   : > { %1601 = vmatprep.mubr.msk.bf16.mxu1 %vm820_vm0, %v1909_v11 }
  0x8e   : > { %998 = vmatmul.mubr.bf16.gmra.mxu0 %v1908_v12 }
  0x8f   : > { %1005 = vmatprep.mubr.bf16.mxu0 %v1912_v13 }
  0x91   : > { %1151 = vmatmul.mubr.bf16.gmra.mxu1 %v1911_v14 }
  0x92   : > { %1602 = vmatprep.mubr.msk.bf16.mxu1 %vm820_vm0, %v1915_v15 }
  0x96   : > { %1006 = vmatmul.mubr.bf16.gmra.mxu0 %v1914_v16 }
  0x97   : > { %1013 = vmatprep.mubr.bf16.mxu0 %v1918_v17 }
  0x99   : > { %1159 = vmatmul.mubr.bf16.gmra.mxu1 %v1917_v18 }
  0x9a   : > { %1603 = vmatprep.mubr.msk.bf16.mxu1 %vm820_vm0, %v1921_v19 }
  0x9e   : > { %1014 = vmatmul.mubr.bf16.gmra.mxu0 %v1920_v20 }
  0x9f   : > { %1021 = vmatprep.mubr.bf16.mxu0 %v1924_v21 }
  0xa1   : > { %1167 = vmatmul.mubr.bf16.gmra.mxu1 %v1923_v22 }
  0xa2   : > { %1604 = vmatprep.mubr.msk.bf16.mxu1 %vm820_vm0, %v1927_v23 }
  0xa6   : > { %1022 = vmatmul.mubr.bf16.gmra.mxu0 %v1926_v24 }
  0xa9   : > { %1175 = vmatmul.mubr.bf16.gmra.mxu1 %v1929_v25 }
  0xaa   : > { %1605 = vmatprep.mubr.msk.bf16.mxu1 %vm820_vm0, %v1930_v26 }
  0xb1   : > { %1183 = vmatmul.mubr.bf16.gmra.mxu1 %v1932_v27 }
  0xee   : > { %v1689_v28 = vpop.f32.mrf.mxu0 }
  0xf0   : > { %v1690_v29 = vpop.f32.mrf.mxu0 }
  0xf1   : > { %v1691_v31 = vadd.f32 %v1690_v29, %v1689_v28 }
  0xf2   : > { %v1692_v30 = vpop.f32.mrf.mxu0 }
  0xf3   : > { %v904_v37 = vadd.f32 %v1691_v31, %v2182_v33 }
  0xf4   : > { %v1693_v32 = vpop.f32.mrf.mxu0 }
  0xf5   : > { %v1694_v35 = vadd.f32 %v1693_v32, %v1692_v30 }
  0xf6   : > { %v1695_v34 = vpop.f32.mrf.mxu0 }
  0xf7   : > { %v907_v45 = vadd.f32 %v1694_v35, %v2182_v33 }
  0xf8   : > { %v1696_v36 = vpop.f32.mrf.mxu0 }
  0xf9   : > { %v1064_v38 = vpop.f32.mrf.mxu1  ;;  %v1697_v42 = vadd.f32 %v1696_v36, %v1695_v34 }
  0xfa   : > { %v1065_v39 = vadd.f32 %v1064_v38, %v904_v37  ;;  %v1698_v40 = vpop.f32.mrf.mxu0 }
  0xfb   : > { %v1066_v41 = vpop.f32.mrf.mxu1  ;;  %v912_v54 = vadd.f32 %v1697_v42, %v2182_v33 }
  0xfc   : > { %v1191_v43 = vmax.f32 %v1065_v39, 0.0  ;;  %v1699_v44 = vpop.f32.mrf.mxu0 }
  0xfd   : > { %v1067_v46 = vpop.f32.mrf.mxu1  ;;  %v1700_v51 = vadd.f32 %v1699_v44, %v1698_v40 }
  0xfe   : > { %v1641_v47 = vpack.c.bf16 %v1191_v43, %v1191_v43  ;;  %v1068_v48 = vadd.f32 %v1067_v46, %v907_v45  ;;  %v1701_v49 = vpop.f32.mrf.mxu0 }
  0xff   : > { %v1069_v50 = vpop.f32.mrf.mxu1  ;;  %v915_v63 = vadd.f32 %v1700_v51, %v2182_v33 }
 0x100   : > { %1352 = vst.msk [vmem:[%s2190_s6] sm:$0xf] %vm1351_vm1, %v1641_v47  ;;  %v1192_v52 = vmax.f32 %v1068_v48, 0.0  ;;  %v1702_v53 = vpop.f32.mrf.mxu0 }
 0x101   : > { %v1072_v55 = vpop.f32.mrf.mxu1  ;;  %v1703_v60 = vadd.f32 %v1702_v53, %v1701_v49 }
 0x102   : > { %v1642_v56 = vpack.c.bf16 %v1192_v52, %v1192_v52  ;;  %v1073_v57 = vadd.f32 %v1072_v55, %v912_v54  ;;  %v1704_v58 = vpop.f32.mrf.mxu0 }
 0x103   : > { %v1074_v59 = vpop.f32.mrf.mxu1  ;;  %v920_v8 = vadd.f32 %v1703_v60, %v2182_v33 }
 0x104   : > { %1353 = vst.msk [vmem:[%s2190_s6 + $0x4] sm:$0xf] %vm1351_vm1, %v1642_v56  ;;  %v1193_v61 = vmax.f32 %v1073_v57, 0.0  ;;  %v1705_v62 = vpop.f32.mrf.mxu0 }
 0x105   : > { %v1075_v0 = vpop.f32.mrf.mxu1  ;;  %v1706_v5 = vadd.f32 %v1705_v62, %v1704_v58 }
 0x106   : > { %v1643_v1 = vpack.c.bf16 %v1193_v61, %v1193_v61  ;;  %v1076_v2 = vadd.f32 %v1075_v0, %v915_v63  ;;  %v1707_v3 = vpop.f32.mrf.mxu0 }
 0x107   : > { %v1077_v4 = vpop.f32.mrf.mxu1  ;;  %v923_v17 = vadd.f32 %v1706_v5, %v2182_v33 }
 0x108   : > { %1354 = vst.msk [vmem:[%s2190_s6 + $0x8] sm:$0xf] %vm1351_vm1, %v1643_v1  ;;  %v1194_v6 = vmax.f32 %v1076_v2, 0.0  ;;  %v1708_v7 = vpop.f32.mrf.mxu0 }
 0x109   : > { %v1080_v9 = vpop.f32.mrf.mxu1  ;;  %v1709_v14 = vadd.f32 %v1708_v7, %v1707_v3 }
 0x10a   : > { %v1644_v10 = vpack.c.bf16 %v1194_v6, %v1194_v6  ;;  %v1081_v11 = vadd.f32 %v1080_v9, %v920_v8  ;;  %v1710_v12 = vpop.f32.mrf.mxu0 }
 0x10b   : > { %v1082_v13 = vpop.f32.mrf.mxu1  ;;  %v928_v26 = vadd.f32 %v1709_v14, %v2182_v33 }
 0x10c   : > { %1355 = vst.msk [vmem:[%s2190_s6 + $0xc] sm:$0xf] %vm1351_vm1, %v1644_v10  ;;  %v1195_v15 = vmax.f32 %v1081_v11, 0.0  ;;  %v1711_v16 = vpop.f32.mrf.mxu0 }
 0x10d   : > { %v1083_v18 = vpop.f32.mrf.mxu1  ;;  %v1712_v23 = vadd.f32 %v1711_v16, %v1710_v12 }
 0x10e   : > { %v1645_v19 = vpack.c.bf16 %v1195_v15, %v1195_v15  ;;  %v1084_v20 = vadd.f32 %v1083_v18, %v923_v17  ;;  %v1713_v21 = vpop.f32.mrf.mxu0 }
 0x10f   : > { %v1085_v22 = vpop.f32.mrf.mxu1  ;;  %v931_v36 = vadd.f32 %v1712_v23, %v2182_v33 }
 0x110   : > { %1356 = vst.msk [vmem:[%s2190_s6 + $0x10] sm:$0xf] %vm1351_vm1, %v1645_v19  ;;  %v1196_v24 = vmax.f32 %v1084_v20, 0.0  ;;  %v1714_v25 = vpop.f32.mrf.mxu0 }
 0x111   : > { %v1088_v27 = vpop.f32.mrf.mxu1  ;;  %v1715_v32 = vadd.f32 %v1714_v25, %v1713_v21 }
 0x112   : > { %v1646_v28 = vpack.c.bf16 %v1196_v24, %v1196_v24  ;;  %v1089_v29 = vadd.f32 %v1088_v27, %v928_v26  ;;  %v1716_v30 = vpop.f32.mrf.mxu0 }
 0x113   : > { %v1090_v31 = vpop.f32.mrf.mxu1  ;;  %v936_v45 = vadd.f32 %v1715_v32, %v2182_v33 }
 0x114   : > { %1357 = vst.msk [vmem:[%s2190_s6 + $0x14] sm:$0xf] %vm1351_vm1, %v1646_v28  ;;  %v1197_v34 = vmax.f32 %v1089_v29, 0.0  ;;  %v1717_v35 = vpop.f32.mrf.mxu0 }
 0x115   : > { %v1091_v37 = vpop.f32.mrf.mxu1  ;;  %v1718_v42 = vadd.f32 %v1717_v35, %v1716_v30 }
 0x116   : > { %v1647_v38 = vpack.c.bf16 %v1197_v34, %v1197_v34  ;;  %v1092_v39 = vadd.f32 %v1091_v37, %v931_v36  ;;  %v1719_v40 = vpop.f32.mrf.mxu0 }
 0x117   : > { %v1093_v41 = vpop.f32.mrf.mxu1  ;;  %v939_v54 = vadd.f32 %v1718_v42, %v2182_v33 }
 0x118   : > { %1358 = vst.msk [vmem:[%s2190_s6 + $0x18] sm:$0xf] %vm1351_vm1, %v1647_v38  ;;  %v1198_v43 = vmax.f32 %v1092_v39, 0.0  ;;  %v1720_v44 = vpop.f32.mrf.mxu0 }
 0x119   : > { %v1096_v46 = vpop.f32.mrf.mxu1  ;;  %v1721_v51 = vadd.f32 %v1720_v44, %v1719_v40 }
 0x11a   : > { %v1648_v47 = vpack.c.bf16 %v1198_v43, %v1198_v43  ;;  %v1097_v48 = vadd.f32 %v1096_v46, %v936_v45  ;;  %v1722_v49 = vpop.f32.mrf.mxu0 }
 0x11b   : > { %v1098_v50 = vpop.f32.mrf.mxu1  ;;  %v944_v63 = vadd.f32 %v1721_v51, %v2182_v33 }
 0x11c   : > { %1359 = vst.msk [vmem:[%s2190_s6 + $0x1c] sm:$0xf] %vm1351_vm1, %v1648_v47  ;;  %v1199_v52 = vmax.f32 %v1097_v48, 0.0  ;;  %v1723_v53 = vpop.f32.mrf.mxu0 }
 0x11d   : > { %v1099_v55 = vpop.f32.mrf.mxu1  ;;  %v1724_v60 = vadd.f32 %v1723_v53, %v1722_v49 }
 0x11e   : > { %v1649_v56 = vpack.c.bf16 %v1199_v52, %v1199_v52  ;;  %v1100_v57 = vadd.f32 %v1099_v55, %v939_v54  ;;  %v1725_v58 = vpop.f32.mrf.mxu0 }
 0x11f   : > { %v1101_v59 = vpop.f32.mrf.mxu1  ;;  %v947_v8 = vadd.f32 %v1724_v60, %v2182_v33 }
 0x120   : > { %1360 = vst.msk [vmem:[%s2190_s6 + $0x20] sm:$0xf] %vm1351_vm1, %v1649_v56  ;;  %v1200_v61 = vmax.f32 %v1100_v57, 0.0  ;;  %v1726_v62 = vpop.f32.mrf.mxu0 }
 0x121   : > { %v1104_v0 = vpop.f32.mrf.mxu1  ;;  %v1727_v5 = vadd.f32 %v1726_v62, %v1725_v58 }
 0x122   : > { %v1650_v1 = vpack.c.bf16 %v1200_v61, %v1200_v61  ;;  %v1105_v2 = vadd.f32 %v1104_v0, %v944_v63  ;;  %v1728_v3 = vpop.f32.mrf.mxu0 }
 0x123   : > { %v1106_v4 = vpop.f32.mrf.mxu1  ;;  %v952_v17 = vadd.f32 %v1727_v5, %v2182_v33 }
 0x124   : > { %1361 = vst.msk [vmem:[%s2190_s6 + $0x24] sm:$0xf] %vm1351_vm1, %v1650_v1  ;;  %v1201_v6 = vmax.f32 %v1105_v2, 0.0  ;;  %v1729_v7 = vpop.f32.mrf.mxu0 }
 0x125   : > { %v1107_v9 = vpop.f32.mrf.mxu1  ;;  %v1730_v14 = vadd.f32 %v1729_v7, %v1728_v3 }
 0x126   : > { %v1651_v10 = vpack.c.bf16 %v1201_v6, %v1201_v6  ;;  %v1108_v11 = vadd.f32 %v1107_v9, %v947_v8  ;;  %v1731_v12 = vpop.f32.mrf.mxu0 }
 0x127   : > { %v1109_v13 = vpop.f32.mrf.mxu1  ;;  %v955_v26 = vadd.f32 %v1730_v14, %v2182_v33 }
 0x128   : > { %1362 = vst.msk [vmem:[%s2190_s6 + $0x28] sm:$0xf] %vm1351_vm1, %v1651_v10  ;;  %v1202_v15 = vmax.f32 %v1108_v11, 0.0  ;;  %v1732_v16 = vpop.f32.mrf.mxu0 }
 0x129   : > { %v1112_v18 = vpop.f32.mrf.mxu1  ;;  %v1733_v23 = vadd.f32 %v1732_v16, %v1731_v12 }
 0x12a   : > { %v1652_v19 = vpack.c.bf16 %v1202_v15, %v1202_v15  ;;  %v1113_v20 = vadd.f32 %v1112_v18, %v952_v17  ;;  %v1734_v21 = vpop.f32.mrf.mxu0 }
 0x12b   : > { %v1114_v22 = vpop.f32.mrf.mxu1  ;;  %v960_v36 = vadd.f32 %v1733_v23, %v2182_v33 }
 0x12c   : > { %1363 = vst.msk [vmem:[%s2190_s6 + $0x2c] sm:$0xf] %vm1351_vm1, %v1652_v19  ;;  %v1203_v24 = vmax.f32 %v1113_v20, 0.0  ;;  %v1735_v25 = vpop.f32.mrf.mxu0 }
 0x12d   : > { %v1115_v27 = vpop.f32.mrf.mxu1  ;;  %v1736_v32 = vadd.f32 %v1735_v25, %v1734_v21 }
 0x12e   : > { %v1653_v28 = vpack.c.bf16 %v1203_v24, %v1203_v24  ;;  %v1116_v29 = vadd.f32 %v1115_v27, %v955_v26  ;;  %v1737_v30 = vpop.f32.mrf.mxu0 }
 0x12f   : > { %v1117_v31 = vpop.f32.mrf.mxu1  ;;  %v963_v45 = vadd.f32 %v1736_v32, %v2182_v33 }
 0x130   : > { %1364 = vst.msk [vmem:[%s2190_s6 + $0x30] sm:$0xf] %vm1351_vm1, %v1653_v28  ;;  %v1204_v34 = vmax.f32 %v1116_v29, 0.0  ;;  %v1738_v35 = vpop.f32.mrf.mxu0 }
 0x131   : > { %v1120_v37 = vpop.f32.mrf.mxu1  ;;  %v1739_v42 = vadd.f32 %v1738_v35, %v1737_v30 }
 0x132   : > { %v1654_v38 = vpack.c.bf16 %v1204_v34, %v1204_v34  ;;  %v1121_v39 = vadd.f32 %v1120_v37, %v960_v36  ;;  %v1740_v40 = vpop.f32.mrf.mxu0 }
 0x133   : > { %v1122_v41 = vpop.f32.mrf.mxu1  ;;  %v968_v54 = vadd.f32 %v1739_v42, %v2182_v33 }
 0x134   : > { %1365 = vst.msk [vmem:[%s2190_s6 + $0x34] sm:$0xf] %vm1351_vm1, %v1654_v38  ;;  %v1205_v43 = vmax.f32 %v1121_v39, 0.0  ;;  %v1741_v44 = vpop.f32.mrf.mxu0 }
 0x135   : > { %v1123_v46 = vpop.f32.mrf.mxu1  ;;  %v1742_v51 = vadd.f32 %v1741_v44, %v1740_v40 }
 0x136   : > { %v1655_v47 = vpack.c.bf16 %v1205_v43, %v1205_v43  ;;  %v1124_v48 = vadd.f32 %v1123_v46, %v963_v45  ;;  %v1743_v49 = vpop.f32.mrf.mxu0 }
 0x137   : > { %v1125_v50 = vpop.f32.mrf.mxu1  ;;  %v971_v63 = vadd.f32 %v1742_v51, %v2182_v33 }
 0x138   : > { %1366 = vst.msk [vmem:[%s2190_s6 + $0x38] sm:$0xf] %vm1351_vm1, %v1655_v47  ;;  %v1206_v52 = vmax.f32 %v1124_v48, 0.0  ;;  %v1744_v53 = vpop.f32.mrf.mxu0 }
 0x139   : > { %v1128_v55 = vpop.f32.mrf.mxu1  ;;  %v1745_v60 = vadd.f32 %v1744_v53, %v1743_v49 }
 0x13a   : > { %v1656_v56 = vpack.c.bf16 %v1206_v52, %v1206_v52  ;;  %v1129_v57 = vadd.f32 %v1128_v55, %v968_v54  ;;  %v1746_v58 = vpop.f32.mrf.mxu0 }
 0x13b   : > { %v1130_v59 = vpop.f32.mrf.mxu1  ;;  %v976_v8 = vadd.f32 %v1745_v60, %v2182_v33 }
 0x13c   : > { %1367 = vst.msk [vmem:[%s2190_s6 + $0x3c] sm:$0xf] %vm1351_vm1, %v1656_v56  ;;  %v1207_v61 = vmax.f32 %v1129_v57, 0.0  ;;  %v1747_v62 = vpop.f32.mrf.mxu0 }
 0x13d   : > { %v1131_v0 = vpop.f32.mrf.mxu1  ;;  %v1748_v5 = vadd.f32 %v1747_v62, %v1746_v58 }
 0x13e   : > { %v1657_v1 = vpack.c.bf16 %v1207_v61, %v1207_v61  ;;  %v1132_v2 = vadd.f32 %v1131_v0, %v971_v63  ;;  %v1749_v3 = vpop.f32.mrf.mxu0 }
 0x13f   : > { %v1133_v4 = vpop.f32.mrf.mxu1  ;;  %v979_v17 = vadd.f32 %v1748_v5, %v2182_v33 }
 0x140   : > { %1368 = vst.msk [vmem:[%s2190_s6 + $0x40] sm:$0xf] %vm1351_vm1, %v1657_v1  ;;  %v1208_v6 = vmax.f32 %v1132_v2, 0.0  ;;  %v1750_v7 = vpop.f32.mrf.mxu0 }
 0x141   : > { %v1136_v9 = vpop.f32.mrf.mxu1  ;;  %v1751_v14 = vadd.f32 %v1750_v7, %v1749_v3 }
 0x142   : > { %v1658_v10 = vpack.c.bf16 %v1208_v6, %v1208_v6  ;;  %v1137_v11 = vadd.f32 %v1136_v9, %v976_v8  ;;  %v1752_v12 = vpop.f32.mrf.mxu0 }
 0x143   : > { %v1138_v13 = vpop.f32.mrf.mxu1  ;;  %v984_v26 = vadd.f32 %v1751_v14, %v2182_v33 }
 0x144   : > { %1369 = vst.msk [vmem:[%s2190_s6 + $0x44] sm:$0xf] %vm1351_vm1, %v1658_v10  ;;  %v1209_v15 = vmax.f32 %v1137_v11, 0.0  ;;  %v1753_v16 = vpop.f32.mrf.mxu0 }
 0x145   : > { %v1139_v18 = vpop.f32.mrf.mxu1  ;;  %v1754_v23 = vadd.f32 %v1753_v16, %v1752_v12 }
 0x146   : > { %v1659_v19 = vpack.c.bf16 %v1209_v15, %v1209_v15  ;;  %v1140_v20 = vadd.f32 %v1139_v18, %v979_v17  ;;  %v1755_v21 = vpop.f32.mrf.mxu0 }
 0x147   : > { %v1141_v22 = vpop.f32.mrf.mxu1  ;;  %v987_v36 = vadd.f32 %v1754_v23, %v2182_v33 }
 0x148   : > { %1370 = vst.msk [vmem:[%s2190_s6 + $0x48] sm:$0xf] %vm1351_vm1, %v1659_v19  ;;  %v1210_v24 = vmax.f32 %v1140_v20, 0.0  ;;  %v1756_v25 = vpop.f32.mrf.mxu0 }
 0x149   : > { %v1144_v27 = vpop.f32.mrf.mxu1  ;;  %v1757_v32 = vadd.f32 %v1756_v25, %v1755_v21 }
 0x14a   : > { %v1660_v28 = vpack.c.bf16 %v1210_v24, %v1210_v24  ;;  %v1145_v29 = vadd.f32 %v1144_v27, %v984_v26  ;;  %v1758_v30 = vpop.f32.mrf.mxu0 }
 0x14b   : > { %v1146_v31 = vpop.f32.mrf.mxu1  ;;  %v992_v45 = vadd.f32 %v1757_v32, %v2182_v33 }
 0x14c   : > { %1371 = vst.msk [vmem:[%s2190_s6 + $0x4c] sm:$0xf] %vm1351_vm1, %v1660_v28  ;;  %v1211_v34 = vmax.f32 %v1145_v29, 0.0  ;;  %v1759_v35 = vpop.f32.mrf.mxu0 }
 0x14d   : > { %v1147_v37 = vpop.f32.mrf.mxu1  ;;  %v1760_v42 = vadd.f32 %v1759_v35, %v1758_v30 }
 0x14e   : > { %v1661_v38 = vpack.c.bf16 %v1211_v34, %v1211_v34  ;;  %v1148_v39 = vadd.f32 %v1147_v37, %v987_v36  ;;  %v1761_v40 = vpop.f32.mrf.mxu0 }
 0x14f   : > { %v1149_v41 = vpop.f32.mrf.mxu1  ;;  %v995_v54 = vadd.f32 %v1760_v42, %v2182_v33 }
 0x150   : > { %1372 = vst.msk [vmem:[%s2190_s6 + $0x50] sm:$0xf] %vm1351_vm1, %v1661_v38  ;;  %v1212_v43 = vmax.f32 %v1148_v39, 0.0  ;;  %v1762_v44 = vpop.f32.mrf.mxu0 }
 0x151   : > { %v1152_v46 = vpop.f32.mrf.mxu1  ;;  %v1763_v51 = vadd.f32 %v1762_v44, %v1761_v40 }
 0x152   : > { %v1662_v47 = vpack.c.bf16 %v1212_v43, %v1212_v43  ;;  %v1153_v48 = vadd.f32 %v1152_v46, %v992_v45  ;;  %v1764_v49 = vpop.f32.mrf.mxu0 }
 0x153   : > { %v1154_v50 = vpop.f32.mrf.mxu1  ;;  %v1000_v63 = vadd.f32 %v1763_v51, %v2182_v33 }
 0x154   : > { %1373 = vst.msk [vmem:[%s2190_s6 + $0x54] sm:$0xf] %vm1351_vm1, %v1662_v47  ;;  %v1213_v52 = vmax.f32 %v1153_v48, 0.0  ;;  %v1765_v53 = vpop.f32.mrf.mxu0 }
 0x155   : > { %v1155_v55 = vpop.f32.mrf.mxu1  ;;  %v1766_v60 = vadd.f32 %v1765_v53, %v1764_v49 }
 0x156   : > { %v1663_v56 = vpack.c.bf16 %v1213_v52, %v1213_v52  ;;  %v1156_v57 = vadd.f32 %v1155_v55, %v995_v54  ;;  %v1767_v58 = vpop.f32.mrf.mxu0 }
 0x157   : > { %v1157_v59 = vpop.f32.mrf.mxu1  ;;  %v1003_v8 = vadd.f32 %v1766_v60, %v2182_v33 }
 0x158   : > { %1374 = vst.msk [vmem:[%s2190_s6 + $0x58] sm:$0xf] %vm1351_vm1, %v1663_v56  ;;  %v1214_v61 = vmax.f32 %v1156_v57, 0.0  ;;  %v1768_v62 = vpop.f32.mrf.mxu0 }
 0x159   : > { %v1160_v0 = vpop.f32.mrf.mxu1  ;;  %v1769_v5 = vadd.f32 %v1768_v62, %v1767_v58 }
 0x15a   : > { %v1664_v1 = vpack.c.bf16 %v1214_v61, %v1214_v61  ;;  %v1161_v2 = vadd.f32 %v1160_v0, %v1000_v63  ;;  %v1770_v3 = vpop.f32.mrf.mxu0 }
 0x15b   : > { %v1162_v4 = vpop.f32.mrf.mxu1  ;;  %v1008_v17 = vadd.f32 %v1769_v5, %v2182_v33 }
 0x15c   : > { %1375 = vst.msk [vmem:[%s2190_s6 + $0x5c] sm:$0xf] %vm1351_vm1, %v1664_v1  ;;  %v1215_v6 = vmax.f32 %v1161_v2, 0.0  ;;  %v1771_v7 = vpop.f32.mrf.mxu0 }
 0x15d   : > { %v1163_v9 = vpop.f32.mrf.mxu1  ;;  %v1772_v14 = vadd.f32 %v1771_v7, %v1770_v3 }
 0x15e   : > { %v1665_v10 = vpack.c.bf16 %v1215_v6, %v1215_v6  ;;  %v1164_v11 = vadd.f32 %v1163_v9, %v1003_v8  ;;  %v1773_v12 = vpop.f32.mrf.mxu0 }
 0x15f   : > { %v1165_v13 = vpop.f32.mrf.mxu1  ;;  %v1011_v26 = vadd.f32 %v1772_v14, %v2182_v33 }
 0x160   : > { %1376 = vst.msk [vmem:[%s2190_s6 + $0x60] sm:$0xf] %vm1351_vm1, %v1665_v10  ;;  %v1216_v15 = vmax.f32 %v1164_v11, 0.0  ;;  %v1774_v16 = vpop.f32.mrf.mxu0 }
 0x161   : > { %v1168_v18 = vpop.f32.mrf.mxu1  ;;  %v1775_v23 = vadd.f32 %v1774_v16, %v1773_v12 }
 0x162   : > { %v1666_v19 = vpack.c.bf16 %v1216_v15, %v1216_v15  ;;  %v1169_v20 = vadd.f32 %v1168_v18, %v1008_v17  ;;  %v1776_v21 = vpop.f32.mrf.mxu0 }
 0x163   : > { %v1170_v22 = vpop.f32.mrf.mxu1  ;;  %v1016_v36 = vadd.f32 %v1775_v23, %v2182_v33 }
 0x164   : > { %1377 = vst.msk [vmem:[%s2190_s6 + $0x64] sm:$0xf] %vm1351_vm1, %v1666_v19  ;;  %v1217_v24 = vmax.f32 %v1169_v20, 0.0  ;;  %v1777_v25 = vpop.f32.mrf.mxu0 }
 0x165   : > { %v1171_v27 = vpop.f32.mrf.mxu1  ;;  %v1778_v32 = vadd.f32 %v1777_v25, %v1776_v21 }
 0x166   : > { %v1667_v28 = vpack.c.bf16 %v1217_v24, %v1217_v24  ;;  %v1172_v29 = vadd.f32 %v1171_v27, %v1011_v26  ;;  %v1779_v30 = vpop.f32.mrf.mxu0 }
 0x167   : > { %v1173_v31 = vpop.f32.mrf.mxu1  ;;  %v1019_v44 = vadd.f32 %v1778_v32, %v2182_v33 }
 0x168   : > { %1378 = vst.msk [vmem:[%s2190_s6 + $0x68] sm:$0xf] %vm1351_vm1, %v1667_v28  ;;  %v1218_v34 = vmax.f32 %v1172_v29, 0.0  ;;  %v1780_v35 = vpop.f32.mrf.mxu0 }
 0x169   : > { %v1176_v37 = vpop.f32.mrf.mxu1  ;;  %v1781_v42 = vadd.f32 %v1780_v35, %v1779_v30 }
 0x16a   : > { %v1668_v38 = vpack.c.bf16 %v1218_v34, %v1218_v34  ;;  %v1177_v39 = vadd.f32 %v1176_v37, %v1016_v36  ;;  %v1782_v40 = vpop.f32.mrf.mxu0 }
 0x16b   : > { %v1178_v41 = vpop.f32.mrf.mxu1  ;;  %v1024_v52 = vadd.f32 %v1781_v42, %v2182_v33 }
 0x16c   : > { %1379 = vst.msk [vmem:[%s2190_s6 + $0x6c] sm:$0xf] %vm1351_vm1, %v1668_v38  ;;  %v1219_v43 = vmax.f32 %v1177_v39, 0.0  ;;  %v1783_v45 = vpop.f32.mrf.mxu0 }
 0x16d   : > { %v1179_v46 = vpop.f32.mrf.mxu1  ;;  %v1784_v50 = vadd.f32 %v1783_v45, %v1782_v40 }
 0x16e   : > { %v1669_v47 = vpack.c.bf16 %v1219_v43, %v1219_v43  ;;  %v1180_v48 = vadd.f32 %v1179_v46, %v1019_v44 }
 0x16f   : > { %v1181_v49 = vpop.f32.mrf.mxu1  ;;  %v1027_v58 = vadd.f32 %v1784_v50, %v2182_v33 }
 0x170   : > { %1380 = vst.msk [vmem:[%s2190_s6 + $0x70] sm:$0xf] %vm1351_vm1, %v1669_v47  ;;  %v1220_v51 = vmax.f32 %v1180_v48, 0.0 }
 0x171   : > { %v1184_v53 = vpop.f32.mrf.mxu1 }
 0x172   : > { %v1670_v54 = vpack.c.bf16 %v1220_v51, %v1220_v51  ;;  %v1185_v55 = vadd.f32 %v1184_v53, %v1024_v52 }
 0x173   : > { %v1186_v56 = vpop.f32.mrf.mxu1 }
 0x174   : > { %1381 = vst.msk [vmem:[%s2190_s6 + $0x74] sm:$0xf] %vm1351_vm1, %v1670_v54  ;;  %v1221_v57 = vmax.f32 %v1185_v55, 0.0 }
 0x175   : > { %v1187_v59 = vpop.f32.mrf.mxu1 }
 0x176   : > { %v1671_v60 = vpack.c.bf16 %v1221_v57, %v1221_v57  ;;  %v1188_v61 = vadd.f32 %v1187_v59, %v1027_v58 }
 0x177   : > { %v1189_v62 = vpop.f32.mrf.mxu1 }
 0x178   : > { %1382 = vst.msk [vmem:[%s2190_s6 + $0x78] sm:$0xf] %vm1351_vm1, %v1671_v60  ;;  %v1222_v63 = vmax.f32 %v1188_v61, 0.0 }
 0x17a   : > { %v1672_v0 = vpack.c.bf16 %v1222_v63, %v1222_v63 }
 0x17c   : > { %1383 = vst.msk [vmem:[%s2190_s6 + $0x7c] sm:$0xf] %vm1351_vm1, %v1672_v0 }
 0x17d PF: > { %s13_s14 = sadd.s32 1, %s1955_s14   ;;  %s2299_s12 = smov %s1951_s13 }
 0x17e   : > { %p10_p5 = scmp.ge.s32.totalorder %s13_s14, 4   ;;  %s2300_s13 = smov %s2302_s15 }
 0x180   :  { %12 = sbr.rel (!%p10_p5) target bundleno = 2 (0x2), region = 68 }

// kernel: hourglass_forward.7
= control target key start
LH: loop header
LB: loop body
LE: loop exit
PB: predicated region body
PF: predicated region fallthrough
CT: control target
= control target key end

     0   :  { %s3305_s12 = smov 0   ;;  %s3307_s13 = smov 0   ;;  %s4031_s0 = inlined_call_operand.vmem [shape: bf16[512,864], index: 0, kind: input, shape index: {}]   ;;  %s4032_s1 = inlined_call_operand.vmem [shape: bf16[864,32], index: 1, kind: input, shape index: {}]   ;;  %s4033_s2 = inlined_call_operand.vmem [shape: f32[1,32], index: 2, kind: input, shape index: {}]   ;;  %s4034_s3 = inlined_call_operand.vmem [shape: bf16[512,32], index: 3, kind: output, shape index: {}]  }
   0x1   :  { %s3309_s14 = smov 0  }
   0x2 LB: > { %s25_s15 = sadd.s32 1, %s3279_s13  ;;  %p2350_p0 = scmp.ge.s32.totalorder %s3283_s14, 1  ;;  %s3283_s14 = sphi %s3309_s14, %s13_s14   ;;  %s3279_s13 = sphi %s3307_s13, %s4060_s13   ;;  %s3275_s12 = sphi %s3305_s12, %s4059_s12  }
   0x3   : > { %p27_p1 = scmp.ge.s32.totalorder %s25_s15, 2  ;;  %p170_p2 = scmp.lt.s32.totalorder %s3283_s14, 3 }
   0x5   : > { %s4062_s15 = smov (%p27_p1, %s25_s15), 0  ;;  %p171_p3 = pnand %p2350_p0, %p170_p2 }
   0x7   : > { %174 = sbr.rel (%p171_p3) target bundleno = 471 (0x1d7), region = 32 }
   0xc   : > { %v3047_v0 = vld [vmem:[%s4032_s1 + $0x78] sm:$0xff]   ;;  %s2351_s18 = sshll.u32 %s3275_s12, 5  ;;  %v3049_v2 = vld [vmem:[%s4032_s1 + $0x70] sm:$0xff]   ;;  %v3051_v4 = vld [vmem:[%s4032_s1 + $0x68] sm:$0xff]   ;;  %vm1356_vm0 = vcmask 785408   ;;  %vm2209_vm1 = vcmask 257024  }
   0xd   : > { %v3048_v1 = vld [vmem:[%s4032_s1 + $0x38] sm:$0xff]   ;;  %2604 = vmatprep.subr.bf16.mxu0 %v3047_v0  ;;  %3006 = vmatprep.subr.bf16.mxu1 %v3047_v0  ;;  %p206_p4 = scmp.lt.s32.totalorder %s2351_s18, 63  ;;  %v3050_v3 = vld [vmem:[%s4032_s1 + $0x30] sm:$0xff]   ;;  %v3052_v5 = vld [vmem:[%s4032_s1 + $0x28] sm:$0xff]  }
   0xe   : > { %2605 = vmatpush3.bf16.msra.mxu0 %v3048_v1  ;;  %3014 = vmatpush3.bf16.msra.mxu1 %v3048_v1  ;;  %v3053_v6 = vld [vmem:[%s4032_s1 + $0x60] sm:$0xff]   ;;  %v3055_v8 = vld [vmem:[%s4032_s1 + $0x58] sm:$0xff]   ;;  %v3057_v10 = vld [vmem:[%s4032_s1 + $0x50] sm:$0xff]  }
   0xf   : > { %2606 = vmatprep.subr.bf16.mxu0 %v3049_v2  ;;  %3007 = vmatprep.subr.bf16.mxu1 %v3049_v2  ;;  %s4064_s18 = smov (!%p206_p4, %s2351_s18), 63  ;;  %v3054_v7 = vld [vmem:[%s4032_s1 + $0x20] sm:$0xff]   ;;  %v3056_v9 = vld [vmem:[%s4032_s1 + $0x18] sm:$0xff]   ;;  %v3058_v13 = vld [vmem:[%s4032_s1 + $0x10] sm:$0xff]  }
  0x10   : > { %s3022_s4 = smul.u32 28, %s4064_s18  ;;  %v3059_v14 = vld [vmem:[%s4032_s1 + $0x48] sm:$0xff]   ;;  %v3061_v16 = vld [vmem:[%s4032_s1 + $0x40] sm:$0xff]   ;;  %v3069_v18 = vld [vmem:[%s4032_s1 + $0xf8] sm:$0xff]   ;;  %s2354_s19 = sshll.u32 %s4064_s18, 2 }
  0x11   : > { %v3060_v15 = vld [vmem:[%s4032_s1 + $0x8] sm:$0xff]   ;;  %v3062_v17 = vld [vmem:[%s4032_s1] sm:$0xff]   ;;  %v3070_v21 = vld [vmem:[%s4032_s1 + $0x178] sm:$0xff]   ;;  %s3873_s22 = scalar_lea.vmem %s4034_s3, %s2354_s19 }
  0x12   : > { %2607 = vmatpush3.bf16.msra.mxu0 %v3050_v3  ;;  %3015 = vmatpush3.bf16.msra.mxu1 %v3050_v3  ;;  %s3356_s11 = scalar_lea.vmem %s4031_s0, %s3022_s4  ;;  %v3071_v22 = vld [vmem:[%s4032_s1 + $0xb8] sm:$0xff]   ;;  %v3073_v24 = vld [vmem:[%s4032_s1 + $0xf0] sm:$0xff]   ;;  %v3081_v32 = vld [vmem:[%s4032_s1 + $0xe8] sm:$0xff]  }
  0x13   : > { %2608 = vmatprep.subr.bf16.mxu0 %v3051_v4  ;;  %3008 = vmatprep.subr.bf16.mxu1 %v3051_v4  ;;  %v3065_v11 = vld [vmem:[%s3356_s11 + $0x4] ss:$28 sps:$4 sm:$0xff]   ;;  %v3072_v23 = vld [vmem:[%s4032_s1 + $0x138] sm:$0xff]   ;;  %v3084_v27 = vld [vmem:[%s4032_s1 + $0x170] sm:$0xff]  }
  0x14   : > { %v3068_v12 = vld [vmem:[%s3356_s11 + $0x2a4] ss:$28 sps:$4 sm:$0xff]   ;;  %1437 = vmatprep.mubr.bf16.mxu0 %v3065_v11  ;;  %v3075_v25 = vld [vmem:[%s3356_s11 + $0x3c] ss:$28 sps:$4 sm:$0xff]   ;;  %v3074_v28 = vld [vmem:[%s4032_s1 + $0xb0] sm:$0xff]  }
  0x15   : > { %1533 = vmatprep.mubr.bf16.mxu1 %v3068_v12  ;;  %v3063_v19 = vld [vmem:[%s3356_s11] ss:$28 sps:$4 sm:$0xff]   ;;  %v3086_v29 = vld [vmem:[%s4032_s1 + $0x130] sm:$0xff]   ;;  %v3082_v33 = vld [vmem:[%s4032_s1 + $0xa8] sm:$0xff]  }
  0x16   : > { %2609 = vmatpush3.bf16.msra.mxu0 %v3052_v5  ;;  %3016 = vmatpush3.bf16.msra.mxu1 %v3052_v5  ;;  %v3066_v20 = vld [vmem:[%s3356_s11 + $0x2a0] ss:$28 sps:$4 sm:$0xff]   ;;  %v3079_v30 = vld [vmem:[%s3356_s11 + $0x38] ss:$28 sps:$4 sm:$0xff]   ;;  %v3091_v39 = vld [vmem:[%s3356_s11 + $0x70] ss:$28 sps:$4 sm:$0xff]  }
  0x17   : > { %2610 = vmatprep.subr.bf16.mxu0 %v3053_v6  ;;  %3009 = vmatprep.subr.bf16.mxu1 %v3053_v6  ;;  %v3077_v26 = vld [vmem:[%s3356_s11 + $0x2dc] ss:$28 sps:$4 sm:$0xff]   ;;  %v3083_v34 = vld [vmem:[%s4032_s1 + $0xe0] sm:$0xff]   ;;  %v3087_v35 = vld [vmem:[%s3356_s11 + $0x74] ss:$28 sps:$4 sm:$0xff]  }
  0x18   : > { %v3080_v31 = vld [vmem:[%s3356_s11 + $0x2d8] ss:$28 sps:$4 sm:$0xff]   ;;  %v3085_v37 = vld [vmem:[%s4032_s1 + $0xa0] sm:$0xff]   ;;  %v3092_v40 = vld [vmem:[%s3356_s11 + $0x310] ss:$28 sps:$4 sm:$0xff]  }
  0x19   : > { %v3089_v36 = vld [vmem:[%s3356_s11 + $0x314] ss:$28 sps:$4 sm:$0xff]   ;;  %v3093_v38 = vld [vmem:[%s4032_s1 + $0xd8] sm:$0xff]   ;;  %v3104_v41 = vld [vmem:[%s4032_s1 + $0x168] sm:$0xff]  }
  0x1a   : > { %2611 = vmatpush3.bf16.msra.mxu0 %v3054_v7  ;;  %3017 = vmatpush3.bf16.msra.mxu1 %v3054_v7  ;;  %v3094_v42 = vld [vmem:[%s4032_s1 + $0x98] sm:$0xff]   ;;  %v3095_v43 = vld [vmem:[%s4032_s1 + $0xd0] sm:$0xff]   ;;  %v3106_v44 = vld [vmem:[%s4032_s1 + $0x128] sm:$0xff]  }
  0x1b   : > { %2612 = vmatprep.subr.bf16.mxu0 %v3055_v8  ;;  %3010 = vmatprep.subr.bf16.mxu1 %v3055_v8  ;;  %v3097_v45 = vld [vmem:[%s3356_s11 + $0xac] ss:$28 sps:$4 sm:$0xff]   ;;  %v3096_v47 = vld [vmem:[%s4032_s1 + $0x90] sm:$0xff]   ;;  %v3115_v51 = vld [vmem:[%s4032_s1 + $0x160] sm:$0xff]  }
  0x1c   : > { %v3099_v46 = vld [vmem:[%s3356_s11 + $0x34c] ss:$28 sps:$4 sm:$0xff]   ;;  %v3117_v53 = vld [vmem:[%s4032_s1 + $0x120] sm:$0xff]   ;;  %v3130_v60 = vld [vmem:[%s4032_s1 + $0x158] sm:$0xff]  }
  0x1d   : > { %v3103_v48 = vld [vmem:[%s4032_s1 + $0xc8] sm:$0xff]   ;;  %v3109_v54 = vld [vmem:[%s3356_s11 + $0xe4] ss:$28 sps:$4 sm:$0xff]   ;;  %v3131_v61 = vld [vmem:[%s4032_s1 + $0x118] sm:$0xff]  }
  0x1e   : > { %2613 = vmatpush3.bf16.msra.mxu0 %v3056_v9  ;;  %3018 = vmatpush3.bf16.msra.mxu1 %v3056_v9  ;;  %v3101_v49 = vld [vmem:[%s3356_s11 + $0xa8] ss:$28 sps:$4 sm:$0xff]   ;;  %v3114_v62 = vld [vmem:[%s3356_s11 + $0xe0] ss:$28 sps:$4 sm:$0xff]   ;;  %v3139_v2 = vld [vmem:[%s4032_s1 + $0x150] sm:$0xff]  }
  0x1f   : > { %2614 = vmatprep.subr.bf16.mxu0 %v3057_v10  ;;  %3011 = vmatprep.subr.bf16.mxu1 %v3057_v10  ;;  %v3102_v50 = vld [vmem:[%s3356_s11 + $0x348] ss:$28 sps:$4 sm:$0xff]   ;;  %v3118_v63 = vld [vmem:[%s3356_s11 + $0x11c] ss:$28 sps:$4 sm:$0xff]   ;;  %v3140_v3 = vld [vmem:[%s4032_s1 + $0x110] sm:$0xff]  }
  0x20   : > { %v3105_v52 = vld [vmem:[%s4032_s1 + $0x88] sm:$0xff]   ;;  %v3107_v55 = vld [vmem:[%s4032_s1 + $0xc0] sm:$0xff]   ;;  %v3122_v4 = vld [vmem:[%s3356_s11 + $0x118] ss:$28 sps:$4 sm:$0xff]  }
  0x21   : > { %v3113_v56 = vld [vmem:[%s3356_s11 + $0xc] ss:$28 sps:$4 sm:$0xff]   ;;  %v3108_v57 = vld [vmem:[%s4032_s1 + $0x80] sm:$0xff]   ;;  %v3124_v6 = vld [vmem:[%s3356_s11 + $0x154] ss:$28 sps:$4 sm:$0xff]  }
  0x22   : > { %2615 = vmatpush3.bf16.msra.mxu0 %v3058_v13  ;;  %3019 = vmatpush3.bf16.msra.mxu1 %v3058_v13  ;;  %v3116_v58 = vld [vmem:[%s4032_s1 + $0x1a8] sm:$0xff]   ;;  %v3120_v0 = vld [vmem:[%s3356_s11 + $0x44] ss:$28 sps:$4 sm:$0xff]   ;;  %v3126_v7 = vld [vmem:[%s3356_s11 + $0x7c] ss:$28 sps:$4 sm:$0xff]  }
  0x23   : > { %2616 = vmatprep.subr.bf16.mxu0 %v3059_v14  ;;  %3012 = vmatprep.subr.bf16.mxu1 %v3059_v14  ;;  %v3111_v59 = vld [vmem:[%s3356_s11 + $0x8] ss:$28 sps:$4 sm:$0xff]   ;;  %v3123_v5 = vld [vmem:[%s3356_s11 + $0x40] ss:$28 sps:$4 sm:$0xff]   ;;  %v3128_v10 = vld [vmem:[%s3356_s11 + $0x150] ss:$28 sps:$4 sm:$0xff]  }
  0x24   : > { %v3138_v1 = vld [vmem:[%s4032_s1 + $0x1a0] sm:$0xff]   ;;  %v3153_v8 = vld [vmem:[%s4032_s1 + $0x148] sm:$0xff]   ;;  %v3129_v11 = vld [vmem:[%s3356_s11 + $0x78] ss:$28 sps:$4 sm:$0xff]  }
  0x25   : > { %v3154_v9 = vld [vmem:[%s4032_s1 + $0x108] sm:$0xff]   ;;  %v3159_v13 = vld [vmem:[%s4032_s1 + $0x198] sm:$0xff]   ;;  %v3134_v14 = vld [vmem:[%s3356_s11 + $0xb4] ss:$28 sps:$4 sm:$0xff]  }
  0x26   : > { %2617 = vmatpush3.bf16.msra.mxu0 %v3060_v15  ;;  %3020 = vmatpush3.bf16.msra.mxu1 %v3060_v15  ;;  %v3132_v12 = vld [vmem:[%s3356_s11 + $0x18c] ss:$28 sps:$4 sm:$0xff]   ;;  %v3162_v15 = vld [vmem:[%s4032_s1 + $0x140] sm:$0xff]  }
  0x27   : > { %2618 = vmatprep.subr.bf16.mxu0 %v3061_v16  ;;  %3013 = vmatprep.subr.bf16.mxu1 %v3061_v16  ;;  %v3163_v16 = vld [vmem:[%s4032_s1 + $0x100] sm:$0xff]  }
  0x2a   : > { %2619 = vmatpush3.bf16.msra.mxu0 %v3062_v17  ;;  %3021 = vmatpush3.bf16.msra.mxu1 %v3062_v17  ;;  %v3136_v17 = vld [vmem:[%s3356_s11 + $0x188] ss:$28 sps:$4 sm:$0xff]  }
  0x2b   : > { %2716 = vmatprep.subr.bf16.mxu1 %v3069_v18  ;;  %2828 = vmatprep.subr.bf16.mxu0 %v3070_v21  ;;  %v3137_v18 = vld [vmem:[%s3356_s11 + $0xb0] ss:$28 sps:$4 sm:$0xff]  }
  0x2c   : > { %v3143_v21 = vld [vmem:[%s3356_s11 + $0xec] ss:$28 sps:$4 sm:$0xff]  }
  0x2d   : > { %1438 = vmatmul.mubr.bf16.vlgmr.msra.gmra.mxu0 %v3063_v19  ;;  %1534 = vmatmul.mubr.bf16.vlgmr.msra.gmra.mxu1 %v3066_v20  ;;  %v3141_v19 = vld [vmem:[%s3356_s11 + $0x1c4] ss:$28 sps:$4 sm:$0xff]   ;;  %v3176_v20 = vld [vmem:[%s4032_s1 + $0x190] sm:$0xff]  }
  0x2e   : > { %2717 = vmatpush3.bf16.msra.mxu1 %v3071_v22  ;;  %2829 = vmatpush3.bf16.msra.mxu0 %v3072_v23  ;;  %v3145_v22 = vld [vmem:[%s3356_s11 + $0x1c0] ss:$28 sps:$4 sm:$0xff]   ;;  %v3146_v23 = vld [vmem:[%s3356_s11 + $0xe8] ss:$28 sps:$4 sm:$0xff]  }
  0x2f   : > { %2718 = vmatprep.subr.bf16.mxu1 %v3073_v24  ;;  %1445 = vmatprep.mubr.bf16.mxu0 %v3075_v25  ;;  %v3147_v24 = vld [vmem:[%s3356_s11 + $0x1fc] ss:$28 sps:$4 sm:$0xff]   ;;  %v3149_v25 = vld [vmem:[%s3356_s11 + $0x124] ss:$28 sps:$4 sm:$0xff]  }
  0x30   : > { %1541 = vmatprep.mubr.bf16.mxu1 %v3077_v26  ;;  %2830 = vmatprep.subr.bf16.mxu0 %v3084_v27  ;;  %v3195_v26 = vld [vmem:[%s4032_s1 + $0x188] sm:$0xff]   ;;  %v3151_v27 = vld [vmem:[%s3356_s11 + $0x1f8] ss:$28 sps:$4 sm:$0xff]  }
  0x32   : > { %2719 = vmatpush3.bf16.msra.mxu1 %v3074_v28  ;;  %2831 = vmatpush3.bf16.msra.mxu0 %v3086_v29  ;;  %v3152_v28 = vld [vmem:[%s3356_s11 + $0x120] ss:$28 sps:$4 sm:$0xff]   ;;  %v3155_v29 = vld [vmem:[%s3356_s11 + $0x234] ss:$28 sps:$4 sm:$0xff]  }
  0x33   : > { %2720 = vmatprep.subr.bf16.mxu1 %v3081_v32  ;;  %2832 = vmatprep.subr.bf16.mxu0 %v3104_v41  ;;  %v3160_v32 = vld [vmem:[%s3356_s11 + $0x230] ss:$28 sps:$4 sm:$0xff]   ;;  %v3175_v41 = vld [vmem:[%s3356_s11 + $0x1c8] ss:$28 sps:$4 sm:$0xff]  }
  0x35   : > { %1446 = vmatmul.mubr.bf16.gmra.mxu0 %v3079_v30  ;;  %1542 = vmatmul.mubr.bf16.gmra.mxu1 %v3080_v31  ;;  %v3157_v30 = vld [vmem:[%s3356_s11 + $0x15c] ss:$28 sps:$4 sm:$0xff]   ;;  %v3212_v31 = vld [vmem:[%s4032_s1 + $0x180] sm:$0xff]  }
  0x36   : > { %2721 = vmatpush3.bf16.msra.mxu1 %v3082_v33  ;;  %1453 = vmatprep.mubr.bf16.mxu0 %v3087_v35  ;;  %v3161_v33 = vld [vmem:[%s3356_s11 + $0x158] ss:$28 sps:$4 sm:$0xff]  }
  0x37   : > { %2722 = vmatprep.subr.bf16.mxu1 %v3083_v34  ;;  %1549 = vmatprep.mubr.bf16.mxu1 %v3089_v36  ;;  %v3164_v34 = vld [vmem:[%s3356_s11 + $0x26c] ss:$28 sps:$4 sm:$0xff]   ;;  %v3166_v35 = vld [vmem:[%s3356_s11 + $0x194] ss:$28 sps:$4 sm:$0xff]  }
  0x38   : > { %2833 = vmatpush3.bf16.msra.mxu0 %v3106_v44  ;;  %v3168_v36 = vld [vmem:[%s3356_s11 + $0x268] ss:$28 sps:$4 sm:$0xff]   ;;  %v3181_v44 = vld [vmem:[%s3356_s11 + $0x200] ss:$28 sps:$4 sm:$0xff]  }
  0x39   : > { %2834 = vmatprep.subr.bf16.mxu0 %v3115_v51  ;;  %v3191_v51 = vld [vmem:[%s3356_s11 + $0xbc] ss:$28 sps:$4 sm:$0xff]  }
  0x3a   : > { %2723 = vmatpush3.bf16.msra.mxu1 %v3085_v37  ;;  %v3169_v37 = vld [vmem:[%s3356_s11 + $0x190] ss:$28 sps:$4 sm:$0xff]  }
  0x3b   : > { %2724 = vmatprep.subr.bf16.mxu1 %v3093_v38  ;;  %v3170_v38 = vld [vmem:[%s3356_s11 + $0x1cc] ss:$28 sps:$4 sm:$0xff]  }
  0x3c   : > { %2835 = vmatpush3.bf16.msra.mxu0 %v3117_v53  ;;  %v3194_v53 = vld [vmem:[%s3356_s11 + $0xb8] ss:$28 sps:$4 sm:$0xff]  }
  0x3d   : > { %1454 = vmatmul.mubr.bf16.gmra.mxu0 %v3091_v39  ;;  %1550 = vmatmul.mubr.bf16.gmra.mxu1 %v3092_v40  ;;  %v3174_v39 = vld [vmem:[%s3356_s11 + $0x14] ss:$28 sps:$4 sm:$0xff]  }
  0x3e   : > { %2725 = vmatpush3.bf16.msra.mxu1 %v3094_v42  ;;  %1461 = vmatprep.mubr.bf16.mxu0 %v3097_v45  ;;  %v3172_v40 = vld [vmem:[%s3356_s11 + $0x10] ss:$28 sps:$4 sm:$0xff]   ;;  %v3177_v42 = vld [vmem:[%s3356_s11 + $0x204] ss:$28 sps:$4 sm:$0xff]  }
  0x3f   : > { %2726 = vmatprep.subr.bf16.mxu1 %v3095_v43  ;;  %1557 = vmatprep.mubr.bf16.mxu1 %v3099_v46  ;;  %v3179_v43 = vld [vmem:[%s3356_s11 + $0x4c] ss:$28 sps:$4 sm:$0xff]   ;;  %v3183_v46 = vld [vmem:[%s3356_s11 + $0x23c] ss:$28 sps:$4 sm:$0xff]  }
  0x40   : > { %2836 = vmatprep.subr.bf16.mxu0 %v3130_v60  ;;  %v3182_v45 = vld [vmem:[%s3356_s11 + $0x48] ss:$28 sps:$4 sm:$0xff]   ;;  %v3206_v60 = vld [vmem:[%s3356_s11 + $0x2e0] ss:$28 sps:$4 sm:$0xff]  }
  0x41   : > { %2837 = vmatpush3.bf16.msra.mxu0 %v3131_v61  ;;  %v3207_v61 = vld [vmem:[%s3356_s11 + $0x128] ss:$28 sps:$4 sm:$0xff]  }
  0x42   : > { %2727 = vmatpush3.bf16.msra.mxu1 %v3096_v47  ;;  %2838 = vmatprep.subr.bf16.mxu0 %v3139_v2  ;;  %v3185_v47 = vld [vmem:[%s3356_s11 + $0x84] ss:$28 sps:$4 sm:$0xff]   ;;  %v3215_v2 = vld [vmem:[%s3356_s11 + $0x354] ss:$28 sps:$4 sm:$0xff]  }
  0x43   : > { %2728 = vmatprep.subr.bf16.mxu1 %v3103_v48  ;;  %v3187_v48 = vld [vmem:[%s3356_s11 + $0x238] ss:$28 sps:$4 sm:$0xff]  }
  0x45   : > { %1462 = vmatmul.mubr.bf16.gmra.mxu0 %v3101_v49  ;;  %1558 = vmatmul.mubr.bf16.gmra.mxu1 %v3102_v50  ;;  %v3188_v49 = vld [vmem:[%s3356_s11 + $0x80] ss:$28 sps:$4 sm:$0xff]   ;;  %v3189_v50 = vld [vmem:[%s3356_s11 + $0x274] ss:$28 sps:$4 sm:$0xff]  }
  0x46   : > { %2729 = vmatpush3.bf16.msra.mxu1 %v3105_v52  ;;  %1469 = vmatprep.mubr.bf16.mxu0 %v3109_v54  ;;  %v3193_v52 = vld [vmem:[%s3356_s11 + $0x270] ss:$28 sps:$4 sm:$0xff]  }
  0x47   : > { %2730 = vmatprep.subr.bf16.mxu1 %v3107_v55  ;;  %1598 = vmatprep.mubr.bf16.mxu1 %v3113_v56  ;;  %v3196_v54 = vld [vmem:[%s3356_s11 + $0x2ac] ss:$28 sps:$4 sm:$0xff]   ;;  %v3198_v55 = vld [vmem:[%s3356_s11 + $0xf4] ss:$28 sps:$4 sm:$0xff]  }
  0x48   : > { %2839 = vmatpush3.bf16.msra.mxu0 %v3140_v3  ;;  %v3200_v56 = vld [vmem:[%s3356_s11 + $0x2a8] ss:$28 sps:$4 sm:$0xff]   ;;  %v3217_v3 = vld [vmem:[%s3356_s11 + $0x19c] ss:$28 sps:$4 sm:$0xff]  }
  0x49   : > { %2840 = vmatprep.subr.bf16.mxu0 %v3153_v8  ;;  %v3224_v8 = vld [vmem:[%s3356_s11 + $0x1d0] ss:$28 sps:$4 sm:$0xff]  }
  0x4a   : > { %2731 = vmatpush3.bf16.msra.mxu1 %v3108_v57  ;;  %v3201_v57 = vld [vmem:[%s3356_s11 + $0xf0] ss:$28 sps:$4 sm:$0xff]  }
  0x4b   : > { %2962 = vmatprep.subr.bf16.mxu1 %v3116_v58 }
  0x4c   : > { %2841 = vmatpush3.bf16.msra.mxu0 %v3154_v9  ;;  %v3225_v9 = vld [vmem:[%s3356_s11 + $0x50] ss:$28 sps:$4 sm:$0xff]  }
  0x4d   : > { %1470 = vmatmul.mubr.bf16.gmra.mxu0 %v3114_v62  ;;  %1599 = vmatmul.mubr.bf16.vlgmr.msra.gmra.mxu1 %v3111_v59  ;;  %v3204_v59 = vld [vmem:[%s3356_s11 + $0x12c] ss:$28 sps:$4 sm:$0xff]   ;;  %v3208_v62 = vld [vmem:[%s3356_s11 + $0x31c] ss:$28 sps:$4 sm:$0xff]  }
  0x4e   : > { %2963 = vmatpush3.bf16.msra.mxu1 %v3116_v58  ;;  %1477 = vmatprep.mubr.bf16.mxu0 %v3118_v63  ;;  %v3202_v58 = vld [vmem:[%s3356_s11 + $0x2e4] ss:$28 sps:$4 sm:$0xff]  }
  0x4f   : > { %1606 = vmatprep.mubr.bf16.mxu1 %v3120_v0  ;;  %2964 = vmatprep.subr.bf16.mxu1 %v3138_v1  ;;  %v3210_v63 = vld [vmem:[%s3356_s11 + $0x164] ss:$28 sps:$4 sm:$0xff]   ;;  %v3213_v0 = vld [vmem:[%s3356_s11 + $0x318] ss:$28 sps:$4 sm:$0xff]  }
  0x50   : > { %2842 = vmatprep.subr.bf16.mxu0 %v3162_v15  ;;  %v3233_v15 = vld [vmem:[%s3356_s11 + $0xf8] ss:$28 sps:$4 sm:$0xff]  }
  0x51   : > { %2843 = vmatpush3.bf16.msra.mxu0 %v3163_v16  ;;  %v3234_v16 = vld [vmem:[%s3356_s11 + $0x240] ss:$28 sps:$4 sm:$0xff]  }
  0x52   : > { %2965 = vmatpush3.bf16.msra.mxu1 %v3138_v1  ;;  %v3214_v1 = vld [vmem:[%s3356_s11 + $0x160] ss:$28 sps:$4 sm:$0xff]  }
  0x53   : > { %2966 = vmatprep.subr.bf16.mxu1 %v3159_v13 }
  0x55   : > { %1478 = vmatmul.mubr.bf16.gmra.mxu0 %v3122_v4  ;;  %1607 = vmatmul.mubr.bf16.gmra.mxu1 %v3123_v5  ;;  %v3219_v4 = vld [vmem:[%s3356_s11 + $0x350] ss:$28 sps:$4 sm:$0xff]   ;;  %v3220_v5 = vld [vmem:[%s3356_s11 + $0x198] ss:$28 sps:$4 sm:$0xff]  }
  0x56   : > { %1485 = vmatprep.mubr.bf16.mxu0 %v3124_v6  ;;  %1614 = vmatprep.mubr.bf16.mxu1 %v3126_v7  ;;  %v3221_v6 = vld [vmem:[%s3356_s11 + $0x1d4] ss:$28 sps:$4 sm:$0xff]  }
  0x57   : > { %2967 = vmatpush3.bf16.msra.mxu1 %v3159_v13  ;;  %v3223_v7 = vld [vmem:[%s3356_s11 + $0x18] ss:$28 sps:$4 sm:$0xff]   ;;  %v3230_v13 = vld [vmem:[%s3356_s11 + $0xc0] ss:$28 sps:$4 sm:$0xff]  }
  0x58   : > { %2968 = vmatprep.subr.bf16.mxu1 %v3176_v20 }
  0x5b   : > { %2969 = vmatpush3.bf16.msra.mxu1 %v3176_v20  ;;  %v3239_v20 = vld [vmem:[%s3356_s11 + $0x278] ss:$28 sps:$4 sm:$0xff]  }
  0x5c   : > { %2970 = vmatprep.subr.bf16.mxu1 %v3195_v26 }
  0x5d   : > { %1486 = vmatmul.mubr.bf16.gmra.mxu0 %v3128_v10  ;;  %1615 = vmatmul.mubr.bf16.gmra.mxu1 %v3129_v11  ;;  %v3226_v10 = vld [vmem:[%s3356_s11 + $0x20c] ss:$28 sps:$4 sm:$0xff]  }
  0x5e   : > { %1493 = vmatprep.mubr.bf16.mxu0 %v3132_v12  ;;  %1622 = vmatprep.mubr.bf16.mxu1 %v3134_v14  ;;  %v3228_v11 = vld [vmem:[%s3356_s11 + $0x88] ss:$28 sps:$4 sm:$0xff]  }
  0x5f   : > { %2971 = vmatpush3.bf16.msra.mxu1 %v3195_v26  ;;  %v3229_v12 = vld [vmem:[%s3356_s11 + $0x208] ss:$28 sps:$4 sm:$0xff]  }
  0x60   : > { %2972 = vmatprep.subr.bf16.mxu1 %v3212_v31  ;;  %v3231_v14 = vld [vmem:[%s3356_s11 + $0x244] ss:$28 sps:$4 sm:$0xff]   ;;  %v3246_v26 = vld [vmem:[%s3356_s11 + $0x2ec] ss:$28 sps:$4 sm:$0xff]  }
  0x63   : > { %2973 = vmatpush3.bf16.msra.mxu1 %v3212_v31 }
  0x65   : > { %1494 = vmatmul.mubr.bf16.gmra.mxu0 %v3136_v17  ;;  %1623 = vmatmul.mubr.bf16.gmra.mxu1 %v3137_v18  ;;  %v3235_v17 = vld [vmem:[%s3356_s11 + $0x130] ss:$28 sps:$4 sm:$0xff]   ;;  %v3236_v18 = vld [vmem:[%s3356_s11 + $0x27c] ss:$28 sps:$4 sm:$0xff]  }
  0x66   : > { %1501 = vmatprep.mubr.bf16.mxu0 %v3141_v19  ;;  %1630 = vmatprep.mubr.bf16.mxu1 %v3143_v21  ;;  %v3238_v19 = vld [vmem:[%s3356_s11 + $0x168] ss:$28 sps:$4 sm:$0xff]   ;;  %v3240_v21 = vld [vmem:[%s3356_s11 + $0x1a0] ss:$28 sps:$4 sm:$0xff]  }
  0x6d   : > { %1502 = vmatmul.mubr.bf16.gmra.mxu0 %v3145_v22  ;;  %1631 = vmatmul.mubr.bf16.gmra.mxu1 %v3146_v23  ;;  %v3241_v22 = vld [vmem:[%s3356_s11 + $0x2b4] ss:$28 sps:$4 sm:$0xff]  }
  0x6e   : > { %1509 = vmatprep.mubr.bf16.mxu0 %v3147_v24  ;;  %1638 = vmatprep.mubr.bf16.mxu1 %v3149_v25  ;;  %v3243_v23 = vld [vmem:[%s3356_s11 + $0x1d8] ss:$28 sps:$4 sm:$0xff]   ;;  %v3244_v24 = vld [vmem:[%s3356_s11 + $0x2b0] ss:$28 sps:$4 sm:$0xff]  }
  0x6f   : > { %v3245_v25 = vld [vmem:[%s3356_s11 + $0x210] ss:$28 sps:$4 sm:$0xff]  }
  0x75   : > { %1510 = vmatmul.mubr.bf16.gmra.mxu0 %v3151_v27  ;;  %1639 = vmatmul.mubr.bf16.gmra.mxu1 %v3152_v28  ;;  %v3248_v27 = vld [vmem:[%s3356_s11 + $0x248] ss:$28 sps:$4 sm:$0xff]  }
  0x76   : > { %1517 = vmatprep.mubr.bf16.mxu0 %v3155_v29  ;;  %1646 = vmatprep.mubr.bf16.mxu1 %v3157_v30 }
  0x7d   : > { %1518 = vmatmul.mubr.bf16.gmra.mxu0 %v3160_v32  ;;  %1647 = vmatmul.mubr.bf16.gmra.mxu1 %v3161_v33 }
  0x7e   : > { %1525 = vmatprep.mubr.bf16.mxu0 %v3164_v34  ;;  %1654 = vmatprep.mubr.bf16.mxu1 %v3166_v35 }
  0x85   : > { %1526 = vmatmul.mubr.bf16.gmra.mxu0 %v3168_v36  ;;  %1655 = vmatmul.mubr.bf16.gmra.mxu1 %v3169_v37  ;;  %v3249_v36 = vld [vmem:[%s3356_s11 + $0x2e8] ss:$28 sps:$4 sm:$0xff]   ;;  %v3250_v37 = vld [vmem:[%s3356_s11 + $0x280] ss:$28 sps:$4 sm:$0xff]  }
  0x86   : > { %1662 = vmatprep.mubr.bf16.mxu1 %v3170_v38  ;;  %1759 = vmatprep.mubr.bf16.mxu0 %v3174_v39  ;;  %v3251_v38 = vld [vmem:[%s3356_s11 + $0x324] ss:$28 sps:$4 sm:$0xff]   ;;  %v3253_v39 = vld [vmem:[%s3356_s11 + $0x2b8] ss:$28 sps:$4 sm:$0xff]  }
  0x8d   : > { %1663 = vmatmul.mubr.bf16.gmra.mxu1 %v3175_v41  ;;  %1760 = vmatmul.mubr.bf16.vlgmr.msra.gmra.mxu0 %v3172_v40 }
  0x8e   : > { %1670 = vmatprep.mubr.bf16.mxu1 %v3177_v42  ;;  %1767 = vmatprep.mubr.bf16.mxu0 %v3179_v43 }
  0x95   : > { %1671 = vmatmul.mubr.bf16.gmra.mxu1 %v3181_v44  ;;  %1768 = vmatmul.mubr.bf16.gmra.mxu0 %v3182_v45 }
  0x96   : > { %1678 = vmatprep.mubr.bf16.mxu1 %v3183_v46  ;;  %1775 = vmatprep.mubr.bf16.mxu0 %v3185_v47 }
  0x9d   : > { %1679 = vmatmul.mubr.bf16.gmra.mxu1 %v3187_v48  ;;  %1776 = vmatmul.mubr.bf16.gmra.mxu0 %v3188_v49 }
  0x9e   : > { %1686 = vmatprep.mubr.bf16.mxu1 %v3189_v50  ;;  %1783 = vmatprep.mubr.bf16.mxu0 %v3191_v51 }
  0xa5   : > { %1687 = vmatmul.mubr.bf16.gmra.mxu1 %v3193_v52  ;;  %1784 = vmatmul.mubr.bf16.gmra.mxu0 %v3194_v53  ;;  %v3254_v52 = vld [vmem:[%s3356_s11 + $0x320] ss:$28 sps:$4 sm:$0xff]   ;;  %v3255_v53 = vld [vmem:[%s3356_s11 + $0x2f0] ss:$28 sps:$4 sm:$0xff]  }
  0xa6   : > { %1694 = vmatprep.mubr.bf16.mxu1 %v3196_v54  ;;  %1791 = vmatprep.mubr.bf16.mxu0 %v3198_v55  ;;  %v3256_v54 = vld [vmem:[%s3356_s11 + $0x35c] ss:$28 sps:$4 sm:$0xff]   ;;  %v3258_v55 = vld [vmem:[%s3356_s11 + $0x328] ss:$28 sps:$4 sm:$0xff]  }
  0xad   : > { %1695 = vmatmul.mubr.bf16.gmra.mxu1 %v3200_v56  ;;  %1792 = vmatmul.mubr.bf16.gmra.mxu0 %v3201_v57 }
  0xae   : > { %1702 = vmatprep.mubr.bf16.mxu1 %v3202_v58  ;;  %1799 = vmatprep.mubr.bf16.mxu0 %v3204_v59 }
  0xb5   : > { %1703 = vmatmul.mubr.bf16.gmra.mxu1 %v3206_v60  ;;  %1800 = vmatmul.mubr.bf16.gmra.mxu0 %v3207_v61 }
  0xb6   : > { %1710 = vmatprep.mubr.bf16.mxu1 %v3208_v62  ;;  %1807 = vmatprep.mubr.bf16.mxu0 %v3210_v63 }
  0xbd   : > { %1711 = vmatmul.mubr.bf16.gmra.mxu1 %v3213_v0  ;;  %1808 = vmatmul.mubr.bf16.gmra.mxu0 %v3214_v1 }
  0xbe   : > { %1718 = vmatprep.mubr.bf16.mxu1 %v3215_v2  ;;  %1815 = vmatprep.mubr.bf16.mxu0 %v3217_v3 }
  0xc5   : > { %1719 = vmatmul.mubr.bf16.gmra.mxu1 %v3219_v4  ;;  %1816 = vmatmul.mubr.bf16.gmra.mxu0 %v3220_v5  ;;  %v3259_v4 = vld [vmem:[%s3356_s11 + $0x358] ss:$28 sps:$4 sm:$0xff]   ;;  %v3260_v5 = vld [vmem:[%s3356_s11 + $0x360] ss:$28 sps:$4 sm:$0xff]  }
  0xc6   : > { %1823 = vmatprep.mubr.bf16.mxu0 %v3221_v6  ;;  %2974 = vmatprep.mubr.msk.bf16.mxu1 %vm1356_vm0, %v3223_v7 }
  0xcd   : > { %1824 = vmatmul.mubr.bf16.gmra.mxu0 %v3224_v8  ;;  %2975 = vmatmul.mubr.msk.bf16.vlgmr.msra.gmra.mxu1 %vm1356_vm0, %v3225_v9 }
  0xce   : > { %1831 = vmatprep.mubr.bf16.mxu0 %v3226_v10  ;;  %2978 = vmatprep.mubr.msk.bf16.mxu1 %vm1356_vm0, %v3228_v11 }
  0xd5   : > { %1832 = vmatmul.mubr.bf16.gmra.mxu0 %v3229_v12  ;;  %2979 = vmatmul.mubr.msk.bf16.gmra.mxu1 %vm1356_vm0, %v3230_v13 }
  0xd6   : > { %1839 = vmatprep.mubr.bf16.mxu0 %v3231_v14  ;;  %2982 = vmatprep.mubr.msk.bf16.mxu1 %vm1356_vm0, %v3233_v15 }
  0xdd   : > { %1840 = vmatmul.mubr.bf16.gmra.mxu0 %v3234_v16  ;;  %2983 = vmatmul.mubr.msk.bf16.gmra.mxu1 %vm1356_vm0, %v3235_v17 }
  0xde   : > { %1847 = vmatprep.mubr.bf16.mxu0 %v3236_v18  ;;  %2986 = vmatprep.mubr.msk.bf16.mxu1 %vm1356_vm0, %v3238_v19 }
  0xe5   : > { %1848 = vmatmul.mubr.bf16.gmra.mxu0 %v3239_v20  ;;  %2987 = vmatmul.mubr.msk.bf16.gmra.mxu1 %vm1356_vm0, %v3240_v21 }
  0xe6   : > { %1855 = vmatprep.mubr.bf16.mxu0 %v3241_v22  ;;  %2990 = vmatprep.mubr.msk.bf16.mxu1 %vm1356_vm0, %v3243_v23  ;;  %v3650_v22 = vld [vmem:[%s4033_s2] ss:$0 sm:$0xff] }
  0xed   : > { %v2620_v28 = vpop.f32.mrf.mxu0  ;;  %v2692_v29 = vpop.f32.mrf.mxu1  ;;  %1856 = vmatmul.mubr.bf16.gmra.mxu0 %v3244_v24  ;;  %2991 = vmatmul.mubr.msk.bf16.gmra.mxu1 %vm1356_vm0, %v3245_v25 }
  0xee   : > { %1863 = vmatprep.mubr.bf16.mxu0 %v3246_v26  ;;  %2994 = vmatprep.mubr.msk.bf16.mxu1 %vm1356_vm0, %v3248_v27 }
  0xef   : > { %v2621_v30 = vpop.f32.mrf.mxu0  ;;  %v2693_v31 = vpop.f32.mrf.mxu1 }
  0xf0   : > { %v3606_v32 = vadd.f32 %v2621_v30, %v2620_v28  ;;  %v3608_v33 = vadd.f32 %v2693_v31, %v2692_v29 }
  0xf1   : > { %v2623_v34 = vpop.f32.mrf.mxu0  ;;  %v2695_v35 = vpop.f32.mrf.mxu1 }
  0xf2   : > { %v1440_v27 = vadd.f32 %v3606_v32, %v3650_v22 }
  0xf3   : > { %v2624_v40 = vpop.f32.mrf.mxu0  ;;  %v2696_v41 = vpop.f32.mrf.mxu1 }
  0xf4   : > { %v3614_v42 = vadd.f32 %v2624_v40, %v2623_v34  ;;  %v3616_v43 = vadd.f32 %v2696_v41, %v2695_v35 }
  0xf5   : > { %v2626_v44 = vpop.f32.mrf.mxu0  ;;  %v2698_v45 = vpop.f32.mrf.mxu1  ;;  %1864 = vmatmul.mubr.bf16.gmra.mxu0 %v3249_v36  ;;  %2995 = vmatmul.mubr.msk.bf16.gmra.mxu1 %vm1356_vm0, %v3250_v37 }
  0xf6   : > { %1871 = vmatprep.mubr.bf16.mxu0 %v3251_v38  ;;  %2998 = vmatprep.mubr.msk.bf16.mxu1 %vm1356_vm0, %v3253_v39  ;;  %v1443_v37 = vadd.f32 %v3614_v42, %v3650_v22 }
  0xf7   : > { %v2627_v46 = vpop.f32.mrf.mxu0  ;;  %v2699_v47 = vpop.f32.mrf.mxu1 }
  0xf8   : > { %v3620_v48 = vadd.f32 %v2627_v46, %v2626_v44  ;;  %v3622_v49 = vadd.f32 %v2699_v47, %v2698_v45 }
  0xf9   : > { %v2629_v50 = vpop.f32.mrf.mxu0  ;;  %v2701_v51 = vpop.f32.mrf.mxu1 }
  0xfa   : > { %v1448_v46 = vadd.f32 %v3620_v48, %v3650_v22 }
  0xfb   : > { %v2630_v56 = vpop.f32.mrf.mxu0  ;;  %v2702_v57 = vpop.f32.mrf.mxu1 }
  0xfc   : > { %v3628_v58 = vadd.f32 %v2630_v56, %v2629_v50  ;;  %v3630_v59 = vadd.f32 %v2702_v57, %v2701_v51 }
  0xfd   : > { %v2632_v60 = vpop.f32.mrf.mxu0  ;;  %v2704_v61 = vpop.f32.mrf.mxu1  ;;  %1872 = vmatmul.mubr.bf16.gmra.mxu0 %v3254_v52  ;;  %2999 = vmatmul.mubr.msk.bf16.gmra.mxu1 %vm1356_vm0, %v3255_v53 }
  0xfe   : > { %1879 = vmatprep.mubr.bf16.mxu0 %v3256_v54  ;;  %3002 = vmatprep.mubr.msk.bf16.mxu1 %vm1356_vm0, %v3258_v55  ;;  %v1451_v55 = vadd.f32 %v3628_v58, %v3650_v22 }
  0xff   : > { %v2633_v62 = vpop.f32.mrf.mxu0  ;;  %v2705_v63 = vpop.f32.mrf.mxu1 }
 0x100   : > { %v2634_v0 = vadd.f32 %v2633_v62, %v2632_v60  ;;  %v3634_v1 = vadd.f32 %v2705_v63, %v2704_v61 }
 0x101   : > { %v2635_v2 = vpop.f32.mrf.mxu0  ;;  %v2707_v3 = vpop.f32.mrf.mxu1 }
 0x103   : > { %v2636_v6 = vpop.f32.mrf.mxu0  ;;  %v2708_v7 = vpop.f32.mrf.mxu1 }
 0x104   : > { %v2637_v8 = vadd.f32 %v2636_v6, %v2635_v2  ;;  %v3638_v9 = vadd.f32 %v2708_v7, %v2707_v3  ;;  %v1456_v2 = vadd.f32 %v2634_v0, %v3650_v22 }
 0x105   : > { %v2638_v10 = vpop.f32.mrf.mxu0  ;;  %v2710_v11 = vpop.f32.mrf.mxu1  ;;  %1880 = vmatmul.mubr.bf16.gmra.mxu0 %v3259_v4  ;;  %3003 = vmatmul.mubr.msk.bf16.gmra.mxu1 %vm1356_vm0, %v3260_v5 }
 0x107   : > { %v2639_v12 = vpop.f32.mrf.mxu0  ;;  %v2711_v13 = vpop.f32.mrf.mxu1 }
 0x108   : > { %v2640_v14 = vadd.f32 %v2639_v12, %v2638_v10  ;;  %v3641_v15 = vadd.f32 %v2711_v13, %v2710_v11  ;;  %v1459_v11 = vadd.f32 %v2637_v8, %v3650_v22 }
 0x109   : > { %v2641_v16 = vpop.f32.mrf.mxu0  ;;  %v2713_v17 = vpop.f32.mrf.mxu1 }
 0x10b   : > { %v2642_v18 = vpop.f32.mrf.mxu0  ;;  %v2714_v19 = vpop.f32.mrf.mxu1 }
 0x10c   : > { %v3643_v20 = vadd.f32 %v2642_v18, %v2641_v16  ;;  %v3645_v21 = vadd.f32 %v2714_v19, %v2713_v17 }
 0x10d   : > { %v2644_v23 = vpop.f32.mrf.mxu0  ;;  %v2732_v24 = vpop.f32.mrf.mxu1 }
 0x10f   : > { %v2645_v25 = vpop.f32.mrf.mxu0  ;;  %v2733_v26 = vpop.f32.mrf.mxu1 }
 0x110   : > { %v3654_v28 = vadd.f32 %v2645_v25, %v2644_v23  ;;  %v2734_v29 = vadd.f32 %v2733_v26, %v2732_v24  ;;  %v1464_v23 = vadd.f32 %v2640_v14, %v3650_v22 }
 0x111   : > { %v2647_v30 = vpop.f32.mrf.mxu0  ;;  %v2735_v31 = vpop.f32.mrf.mxu1 }
 0x112   : > { %v3656_v34 = vadd.f32 %v2734_v29, %v1440_v27 }
 0x113   : > { %v2648_v35 = vpop.f32.mrf.mxu0  ;;  %v2736_v36 = vpop.f32.mrf.mxu1 }
 0x114   : > { %v3660_v38 = vadd.f32 %v2648_v35, %v2647_v30  ;;  %v2737_v39 = vadd.f32 %v2736_v36, %v2735_v31  ;;  %v1467_v31 = vadd.f32 %v3643_v20, %v3650_v22 }
 0x115   : > { %v2650_v40 = vpop.f32.mrf.mxu0  ;;  %v2738_v41 = vpop.f32.mrf.mxu1 }
 0x116   : > { %v3662_v44 = vadd.f32 %v2737_v39, %v1443_v37 }
 0x117   : > { %v2651_v32 = vpop.f32.mrf.mxu0  ;;  %v2739_v45 = vpop.f32.mrf.mxu1 }
 0x118   : > { %v3666_v47 = vadd.f32 %v2651_v32, %v2650_v40  ;;  %v2740_v50 = vadd.f32 %v2739_v45, %v2738_v41  ;;  %v1472_v32 = vadd.f32 %v3654_v28, %v3650_v22 }
 0x119   : > { %v2653_v51 = vpop.f32.mrf.mxu0  ;;  %v2741_v52 = vpop.f32.mrf.mxu1 }
 0x11a   : > { %v3668_v53 = vadd.f32 %v2740_v50, %v1448_v46 }
 0x11b   : > { %v2654_v42 = vpop.f32.mrf.mxu0  ;;  %v2742_v54 = vpop.f32.mrf.mxu1 }
 0x11c   : > { %v3672_v56 = vadd.f32 %v2654_v42, %v2653_v51  ;;  %v2743_v57 = vadd.f32 %v2742_v54, %v2741_v52  ;;  %v1475_v54 = vadd.f32 %v3660_v38, %v3650_v22 }
 0x11d   : > { %v2656_v60 = vpop.f32.mrf.mxu0  ;;  %v2744_v61 = vpop.f32.mrf.mxu1 }
 0x11e   : > { %v3674_v62 = vadd.f32 %v2743_v57, %v1451_v55  ;;  %v1483_v38 = vadd.f32 %v3672_v56, %v3650_v22 }
 0x11f   : > { %v2657_v48 = vpop.f32.mrf.mxu0  ;;  %v2745_v63 = vpop.f32.mrf.mxu1 }
 0x120   : > { %v3677_v3 = vadd.f32 %v2657_v48, %v2656_v60  ;;  %v2746_v4 = vadd.f32 %v2745_v63, %v2744_v61 }
 0x121   : > { %v2659_v5 = vpop.f32.mrf.mxu0  ;;  %v2747_v6 = vpop.f32.mrf.mxu1 }
 0x122   : > { %v3679_v7 = vadd.f32 %v2746_v4, %v1456_v2  ;;  %v1480_v2 = vadd.f32 %v3666_v47, %v3650_v22  ;;  %v1488_v47 = vadd.f32 %v3677_v3, %v3650_v22 }
 0x123   : > { %v2660_v10 = vpop.f32.mrf.mxu0  ;;  %v2748_v58 = vpop.f32.mrf.mxu1 }
 0x124   : > { %v3682_v12 = vadd.f32 %v2660_v10, %v2659_v5  ;;  %v2749_v13 = vadd.f32 %v2748_v58, %v2747_v6 }
 0x125   : > { %v2662_v16 = vpop.f32.mrf.mxu0  ;;  %v2750_v17 = vpop.f32.mrf.mxu1 }
 0x126   : > { %v3684_v18 = vadd.f32 %v2749_v13, %v1459_v11  ;;  %v1491_v56 = vadd.f32 %v3682_v12, %v3650_v22 }
 0x127   : > { %v2663_v19 = vpop.f32.mrf.mxu0  ;;  %v2751_v0 = vpop.f32.mrf.mxu1 }
 0x128   : > { %v3687_v24 = vadd.f32 %v2663_v19, %v2662_v16  ;;  %v2752_v25 = vadd.f32 %v2751_v0, %v2750_v17 }
 0x129   : > { %v2665_v26 = vpop.f32.mrf.mxu0  ;;  %v2753_v27 = vpop.f32.mrf.mxu1 }
 0x12a   : > { %v3689_v29 = vadd.f32 %v2752_v25, %v1464_v23  ;;  %v1496_v3 = vadd.f32 %v3687_v24, %v3650_v22 }
 0x12b   : > { %v2666_v30 = vpop.f32.mrf.mxu0  ;;  %v2754_v8 = vpop.f32.mrf.mxu1 }
 0x12c   : > { %v3693_v35 = vadd.f32 %v2666_v30, %v2665_v26  ;;  %v2755_v36 = vadd.f32 %v2754_v8, %v2753_v27 }
 0x12d   : > { %v2668_v37 = vpop.f32.mrf.mxu0  ;;  %v2756_v39 = vpop.f32.mrf.mxu1 }
 0x12e   : > { %v3695_v40 = vadd.f32 %v2755_v36, %v1467_v31  ;;  %v1499_v12 = vadd.f32 %v3693_v35, %v3650_v22 }
 0x12f   : > { %v2669_v14 = vpop.f32.mrf.mxu0  ;;  %v2757_v41 = vpop.f32.mrf.mxu1 }
 0x130   : > { %v3699_v45 = vadd.f32 %v2669_v14, %v2668_v37  ;;  %v2758_v46 = vadd.f32 %v2757_v41, %v2756_v39 }
 0x131   : > { %v2671_v50 = vpop.f32.mrf.mxu0  ;;  %v2759_v51 = vpop.f32.mrf.mxu1 }
 0x132   : > { %v3701_v52 = vadd.f32 %v2758_v46, %v1472_v32 }
 0x133   : > { %v2672_v20 = vpop.f32.mrf.mxu0  ;;  %v2760_v42 = vpop.f32.mrf.mxu1 }
 0x134   : > { %v2673_v55 = vadd.f32 %v2672_v20, %v2671_v50  ;;  %v2761_v57 = vadd.f32 %v2760_v42, %v2759_v51 }
 0x135   : > { %v2674_v60 = vpop.f32.mrf.mxu0  ;;  %v2762_v61 = vpop.f32.mrf.mxu1 }
 0x136   : > { %v3705_v48 = vadd.f32 %v2761_v57, %v1475_v54 }
 0x137   : > { %v2675_v63 = vpop.f32.mrf.mxu0  ;;  %v2763_v28 = vpop.f32.mrf.mxu1 }
 0x138   : > { %v2676_v4 = vadd.f32 %v2675_v63, %v2674_v60  ;;  %v2764_v5 = vadd.f32 %v2763_v28, %v2762_v61 }
 0x139   : > { %v2677_v6 = vpop.f32.mrf.mxu0  ;;  %v2765_v10 = vpop.f32.mrf.mxu1 }
 0x13a   : > { %v3709_v58 = vadd.f32 %v2764_v5, %v1480_v2 }
 0x13b   : > { %v2678_v11 = vpop.f32.mrf.mxu0  ;;  %v2766_v13 = vpop.f32.mrf.mxu1 }
 0x13c   : > { %v2679_v16 = vadd.f32 %v2678_v11, %v2677_v6  ;;  %v2767_v17 = vadd.f32 %v2766_v13, %v2765_v10 }
 0x13d   : > { %v2680_v19 = vpop.f32.mrf.mxu0  ;;  %v2768_v0 = vpop.f32.mrf.mxu1 }
 0x13e   : > { %v3713_v23 = vadd.f32 %v2767_v17, %v1483_v38  ;;  %v1504_v38 = vadd.f32 %v3699_v45, %v3650_v22  ;;  %v1512_v45 = vadd.f32 %v2676_v4, %v3650_v22 }
 0x13f   : > { %v2681_v25 = vpop.f32.mrf.mxu0  ;;  %v2769_v26 = vpop.f32.mrf.mxu1 }
 0x140   : > { %v2682_v27 = vadd.f32 %v2681_v25, %v2680_v19  ;;  %v2770_v30 = vadd.f32 %v2769_v26, %v2768_v0 }
 0x141   : > { %v2683_v8 = vpop.f32.mrf.mxu0  ;;  %v2771_v31 = vpop.f32.mrf.mxu1 }
 0x142   : > { %v3717_v36 = vadd.f32 %v2770_v30, %v1488_v47  ;;  %v1507_v47 = vadd.f32 %v2673_v55, %v3650_v22  ;;  %v1515_v55 = vadd.f32 %v2679_v16, %v3650_v22  ;;  %v1520_v4 = vadd.f32 %v2682_v27, %v3650_v22 }
 0x143   : > { %v2684_v37 = vpop.f32.mrf.mxu0  ;;  %v2772_v39 = vpop.f32.mrf.mxu1 }
 0x144   : > { %v2685_v14 = vadd.f32 %v2684_v37, %v2683_v8  ;;  %v2773_v41 = vadd.f32 %v2772_v39, %v2771_v31 }
 0x145   : > { %v2686_v32 = vpop.f32.mrf.mxu0  ;;  %v2774_v46 = vpop.f32.mrf.mxu1 }
 0x146   : > { %v3721_v50 = vadd.f32 %v2773_v41, %v1491_v56  ;;  %v1523_v16 = vadd.f32 %v2685_v14, %v3650_v22 }
 0x147   : > { %v2687_v51 = vpop.f32.mrf.mxu0  ;;  %v2775_v20 = vpop.f32.mrf.mxu1 }
 0x148   : > { %v2688_v42 = vadd.f32 %v2687_v51, %v2686_v32  ;;  %v2776_v54 = vadd.f32 %v2775_v20, %v2774_v46 }
 0x149   : > { %v2689_v57 = vpop.f32.mrf.mxu0  ;;  %v2777_v60 = vpop.f32.mrf.mxu1 }
 0x14a   : > { %v3725_v61 = vadd.f32 %v2776_v54, %v1496_v3  ;;  %v1528_v27 = vadd.f32 %v2688_v42, %v3650_v22  ;;  %v1536_v42 = vadd.f32 %v3608_v33, %v3650_v22 }
 0x14b   : > { %v2690_v63 = vpop.f32.mrf.mxu0  ;;  %v2778_v28 = vpop.f32.mrf.mxu1 }
 0x14c   : > { %v2691_v2 = vadd.f32 %v2690_v63, %v2689_v57  ;;  %v2779_v5 = vadd.f32 %v2778_v28, %v2777_v60 }
 0x14d   : > { %v2780_v6 = vpop.f32.mrf.mxu1  ;;  %v3729_v10 = vpop.f32.mrf.mxu0 }
 0x14e   : > { %v3731_v11 = vadd.f32 %v2779_v5, %v1499_v12  ;;  %v1531_v14 = vadd.f32 %v2691_v2, %v3650_v22 }
 0x14f   : > { %v2781_v13 = vpop.f32.mrf.mxu1  ;;  %v3733_v24 = vpop.f32.mrf.mxu0 }
 0x150   : > { %v2782_v17 = vadd.f32 %v2781_v13, %v2780_v6 }
 0x151   : > { %v2783_v19 = vpop.f32.mrf.mxu1  ;;  %v3737_v0 = vpop.f32.mrf.mxu0 }
 0x152   : > { %v3739_v25 = vadd.f32 %v2782_v17, %v1504_v38 }
 0x153   : > { %v2784_v35 = vpop.f32.mrf.mxu1  ;;  %v3741_v26 = vpop.f32.mrf.mxu0 }
 0x154   : > { %v2785_v30 = vadd.f32 %v2784_v35, %v2783_v19 }
 0x155   : > { %v2786_v8 = vpop.f32.mrf.mxu1  ;;  %v3744_v31 = vpop.f32.mrf.mxu0 }
 0x156   : > { %v3746_v37 = vadd.f32 %v2785_v30, %v1507_v47 }
 0x157   : > { %v2787_v39 = vpop.f32.mrf.mxu1  ;;  %v3748_v56 = vpop.f32.mrf.mxu0 }
 0x158   : > { %4035 = vst [vmem:[#allocation2_spill] sm:$0xff] %v3746_v37  ;;  %v2788_v41 = vadd.f32 %v2787_v39, %v2786_v8 }
 0x159   : > { %v2789_v32 = vpop.f32.mrf.mxu1  ;;  %v3751_v46 = vpop.f32.mrf.mxu0 }
 0x15a   : > { %v3753_v51 = vadd.f32 %v2788_v41, %v1512_v45 }
 0x15b   : > { %v2790_v20 = vpop.f32.mrf.mxu1  ;;  %v3755_v3 = vpop.f32.mrf.mxu0 }
 0x15c   : > { %v2791_v54 = vadd.f32 %v2790_v20, %v2789_v32 }
 0x15d   : > { %v2792_v57 = vpop.f32.mrf.mxu1  ;;  %v3758_v60 = vpop.f32.mrf.mxu0 }
 0x15e   : > { %v3760_v63 = vadd.f32 %v2791_v54, %v1515_v55 }
 0x15f   : > { %v2793_v28 = vpop.f32.mrf.mxu1  ;;  %v3762_v12 = vpop.f32.mrf.mxu0 }
 0x160   : > { %4036 = vst [vmem:[#allocation3_spill] sm:$0xff] %v3760_v63  ;;  %v2794_v5 = vadd.f32 %v2793_v28, %v2792_v57 }
 0x161   : > { %v2795_v6 = vpop.f32.mrf.mxu1  ;;  %v3765_v13 = vpop.f32.mrf.mxu0 }
 0x162   : > { %v3767_v38 = vadd.f32 %v2794_v5, %v1520_v4 }
 0x163   : > { %v2796_v17 = vpop.f32.mrf.mxu1  ;;  %v3769_v19 = vpop.f32.mrf.mxu0 }
 0x164   : > { %4037 = vst [vmem:[#allocation4_spill] sm:$0xff] %v3767_v38  ;;  %v2797_v35 = vadd.f32 %v2796_v17, %v2795_v6 }
 0x165   : > { %v2798_v47 = vpop.f32.mrf.mxu1  ;;  %v3772_v30 = vpop.f32.mrf.mxu0 }
 0x166   : > { %v3774_v8 = vadd.f32 %v2797_v35, %v1523_v16 }
 0x167   : > { %v2799_v39 = vpop.f32.mrf.mxu1  ;;  %v3776_v45 = vpop.f32.mrf.mxu0 }
 0x168   : > { %4038 = vst [vmem:[#allocation5_spill] sm:$0xff] %v3774_v8  ;;  %v2800_v41 = vadd.f32 %v2799_v39, %v2798_v47 }
 0x169   : > { %v2801_v32 = vpop.f32.mrf.mxu1  ;;  %v3779_v20 = vpop.f32.mrf.mxu0 }
 0x16a   : > { %v3781_v55 = vadd.f32 %v2800_v41, %v1528_v27 }
 0x16b   : > { %v2802_v54 = vpop.f32.mrf.mxu1  ;;  %v3783_v57 = vpop.f32.mrf.mxu0 }
 0x16c   : > { %4039 = vst [vmem:[#allocation6_spill] sm:$0xff] %v3781_v55  ;;  %v2803_v28 = vadd.f32 %v2802_v54, %v2801_v32  ;;  %v1539_v32 = vadd.f32 %v3616_v43, %v3650_v22 }
 0x16d   : > { %v2804_v4 = vpop.f32.mrf.mxu1  ;;  %v3786_v5 = vpop.f32.mrf.mxu0 }
 0x16e   : > { %v3788_v6 = vadd.f32 %v2803_v28, %v1531_v14 }
 0x16f   : > { %v2805_v17 = vpop.f32.mrf.mxu1  ;;  %v3790_v16 = vpop.f32.mrf.mxu0 }
 0x170   : > { %4040 = vst [vmem:[#allocation7_spill] sm:$0xff] %v3788_v6  ;;  %v2806_v35 = vadd.f32 %v2805_v17, %v2804_v4  ;;  %v1544_v4 = vadd.f32 %v3622_v49, %v3650_v22 }
 0x171   : > { %v2807_v47 = vpop.f32.mrf.mxu1  ;;  %v3794_v39 = vpop.f32.mrf.mxu0 }
 0x172   : > { %v3796_v27 = vadd.f32 %v2806_v35, %v1536_v42 }
 0x173   : > { %v2808_v41 = vpop.f32.mrf.mxu1  ;;  %v3798_v2 = vpop.f32.mrf.mxu0 }
 0x174   : > { %4041 = vst [vmem:[#allocation8_spill] sm:$0xff] %v3796_v27  ;;  %v2809_v54 = vadd.f32 %v2808_v41, %v2807_v47  ;;  %v1547_v47 = vadd.f32 %v3630_v59, %v3650_v22 }
 0x175   : > { %v2810_v14 = vpop.f32.mrf.mxu1  ;;  %v3802_v28 = vpop.f32.mrf.mxu0 }
 0x176   : > { %v3804_v8 = vadd.f32 %v2809_v54, %v1539_v32 }
 0x177   : > { %v2811_v6 = vpop.f32.mrf.mxu1  ;;  %v3806_v33 = vpop.f32.mrf.mxu0 }
 0x178   : > { %4042 = vst [vmem:[#allocation9_spill] sm:$0xff] %v3804_v8  ;;  %v2812_v17 = vadd.f32 %v2811_v6, %v2810_v14  ;;  %v1552_v6 = vadd.f32 %v3634_v1, %v3650_v22 }
 0x179   : > { %v2813_v42 = vpop.f32.mrf.mxu1  ;;  %v3810_v35 = vpop.f32.mrf.mxu0 }
 0x17a   : > { %v3812_v27 = vadd.f32 %v2812_v17, %v1544_v4 }
 0x17b   : > { %v2814_v38 = vpop.f32.mrf.mxu1  ;;  %v3814_v43 = vpop.f32.mrf.mxu0 }
 0x17c   : > { %4043 = vst [vmem:[#allocation10_spill] sm:$0xff] %v3812_v27  ;;  %v2815_v41 = vadd.f32 %v2814_v38, %v2813_v42  ;;  %v1555_v38 = vadd.f32 %v3638_v9, %v3650_v22  ;;  %v2846_v9 = vadd.f32 %v3733_v24, %v3729_v10 }
 0x17d   : > { %v2816_v32 = vpop.f32.mrf.mxu1  ;;  %v3818_v54 = vpop.f32.mrf.mxu0 }
 0x17e   : > { %v3820_v8 = vadd.f32 %v2815_v41, %v1547_v47 }
 0x17f   : > { %v2817_v55 = vpop.f32.mrf.mxu1  ;;  %v3822_v49 = vpop.f32.mrf.mxu0 }
 0x180   : > { %4044 = vst [vmem:[#allocation11_spill] sm:$0xff] %v3820_v8  ;;  %v2818_v14 = vadd.f32 %v2817_v55, %v2816_v32  ;;  %v1560_v55 = vadd.f32 %v3641_v15, %v3650_v22  ;;  %v2852_v32 = vadd.f32 %v3748_v56, %v3744_v31  ;;  %v2855_v15 = vadd.f32 %v3755_v3, %v3751_v46 }
 0x181   : > { %v2819_v4 = vpop.f32.mrf.mxu1  ;;  %v3826_v17 = vpop.f32.mrf.mxu0 }
 0x182   : > { %v3828_v27 = vadd.f32 %v2818_v14, %v1552_v6  ;;  %v1770_v56 = vadd.f32 %v2852_v32, %v3668_v53  ;;  %v1773_v3 = vadd.f32 %v2855_v15, %v3674_v62  ;;  %v2867_v62 = vadd.f32 %v3783_v57, %v3779_v20 }
 0x183   : > { %v2820_v37 = vpop.f32.mrf.mxu1  ;;  %v3830_v59 = vpop.f32.mrf.mxu0 }
 0x184   : > { %4045 = vst [vmem:[#allocation12_spill] sm:$0xff] %v3828_v27  ;;  %v2821_v42 = vadd.f32 %v2820_v37, %v2819_v4 }
 0x185   : > { %v2822_v47 = vpop.f32.mrf.mxu1  ;;  %v3834_v41 = vpop.f32.mrf.mxu0 }
 0x186   : > { %v3836_v8 = vadd.f32 %v2821_v42, %v1555_v38  ;;  %v1563_v42 = vadd.f32 %v3645_v21, %v3650_v22  ;;  %v2864_v22 = vadd.f32 %v3776_v45, %v3772_v30  ;;  %v2858_v30 = vadd.f32 %v3762_v12, %v3758_v60 }
 0x187   : > { %v2823_v63 = vpop.f32.mrf.mxu1  ;;  %v3838_v1 = vpop.f32.mrf.mxu0  ;;  %v2861_v60 = vadd.f32 %v3769_v19, %v3765_v13 }
 0x188   : > { %4046 = vst [vmem:[#allocation13_spill] sm:$0xff] %v3836_v8  ;;  %v2824_v6 = vadd.f32 %v2823_v63, %v2822_v47  ;;  %v2849_v63 = vadd.f32 %v3741_v26, %v3737_v0 }
 0x189   : > { %v2825_v14 = vpop.f32.mrf.mxu1  ;;  %v3844_v27 = vpop.f32.mrf.mxu0 }
 0x18a   : > { %v3848_v37 = vadd.f32 %v2824_v6, %v1560_v55  ;;  %v1762_v6 = vadd.f32 %v2846_v9, %v3656_v34  ;;  %v1765_v26 = vadd.f32 %v2849_v63, %v3662_v44  ;;  %v1786_v44 = vadd.f32 %v2864_v22, %v3689_v29 }
 0x18b   : > { %v2826_v4 = vpop.f32.mrf.mxu1  ;;  %v3850_v38 = vpop.f32.mrf.mxu0  ;;  %v2876_v29 = vadd.f32 %v3806_v33, %v3802_v28  ;;  %v2879_v33 = vadd.f32 %v3814_v43, %v3810_v35 }
 0x18c   : > { %v2827_v31 = vadd.f32 %v2826_v4, %v2825_v14 }
 0x18d   : > { %v3859_v47 = vpop.f32.mrf.mxu0  ;;  %v2976_v10 = vpop.f32.mrf.mxu1 }
 0x18e   : > { %v3861_v24 = vadd.f32 %v2827_v31, %v1563_v42  ;;  %v1931_v55 = vadd.f32 %v2976_v10, %v1770_v56  ;;  %v1778_v10 = vadd.f32 %v2858_v30, %v3679_v7  ;;  %v2870_v7 = vadd.f32 %v3790_v16, %v3786_v5 }
 0x18f   : > { %v3865_v8 = vpop.f32.mrf.mxu0  ;;  %v1922_v21 = vpop.f32.mrf.mxu1  ;;  %v1802_v5 = vadd.f32 %v2876_v29, %v3709_v58  ;;  %v2873_v16 = vadd.f32 %v3798_v2, %v3794_v39  ;;  %v2888_v58 = vadd.f32 %v3838_v1, %v3834_v41  ;;  %v2891_v1 = vadd.f32 %v3850_v38, %v3844_v27 }
 0x190   : > { %v2051_v46 = vmax.f32 %v1931_v55, 0.0  ;;  %v1923_v53 = vadd.f32 %v1922_v21, %v1762_v6  ;;  %v1789_v21 = vadd.f32 %v2867_v62, %v3695_v40 }
 0x191   : > { %v3875_v0 = vpop.f32.mrf.mxu0  ;;  %v2977_v34 = vpop.f32.mrf.mxu1 }
 0x192   : > { %v2574_v45 = vpack.c.bf16 %v2051_v46, %v2051_v46  ;;  %v2049_v32 = vmax.f32 %v1923_v53, 0.0  ;;  %v1934_v14 = vadd.f32 %v2977_v34, %v1773_v3  ;;  %v1781_v3 = vadd.f32 %v2861_v60, %v3684_v18 }
 0x193   : > { %v3882_v9 = vpop.f32.mrf.mxu0  ;;  %v1925_v4 = vpop.f32.mrf.mxu1 }
 0x194   : > { %2212 = vst.msk [vmem:[%s3873_s22 + $0x8] sm:$0xf] %vm2209_vm1, %v2574_v45  ;;  %v2572_v42 = vpack.c.bf16 %v2049_v32, %v2049_v32  ;;  %v2052_v15 = vmax.f32 %v1934_v14, 0.0  ;;  %v1926_v31 = vadd.f32 %v1925_v4, %v1765_v26 }
 0x195   : > { %v3889_v12 = vpop.f32.mrf.mxu0  ;;  %v2980_v56 = vpop.f32.mrf.mxu1 }
 0x196   : > { %2210 = vst.msk [vmem:[%s3873_s22] sm:$0xf] %vm2209_vm1, %v2572_v42  ;;  %v2575_v20 = vpack.c.bf16 %v2052_v15, %v2052_v15  ;;  %v2050_v57 = vmax.f32 %v1926_v31, 0.0  ;;  %v1947_v63 = vadd.f32 %v2980_v56, %v1786_v44  ;;  %v1794_v42 = vadd.f32 %v2870_v7, %v3701_v52 }
 0x197   : > { %v3894_v55 = vpop.f32.mrf.mxu0  ;;  %v1938_v6 = vpop.f32.mrf.mxu1  ;;  %v1805_v44 = vadd.f32 %v2879_v33, %v3713_v23  ;;  %v2882_v52 = vadd.f32 %v3822_v49, %v3818_v54  ;;  %v1818_v54 = vadd.f32 %v2888_v58, %v3725_v61  ;;  %v2885_v49 = vadd.f32 %v3830_v59, %v3826_v17 }
 0x198   : > { %2213 = vst.msk [vmem:[%s3873_s22 + $0xc] sm:$0xf] %vm2209_vm1, %v2575_v20  ;;  %v2573_v13 = vpack.c.bf16 %v2050_v57, %v2050_v57  ;;  %v2055_v19 = vmax.f32 %v1947_v63, 0.0  ;;  %v1939_v22 = vadd.f32 %v1938_v6, %v1778_v10  ;;  %v1797_v57 = vadd.f32 %v2873_v16, %v3705_v48 }
 0x199   : > { %v3901_v46 = vpop.f32.mrf.mxu0  ;;  %v2981_v53 = vpop.f32.mrf.mxu1  ;;  %v2900_v61 = vadd.f32 %v3894_v55, %v3889_v12 }
 0x19a   : > { %2211 = vst.msk [vmem:[%s3873_s22 + $0x4] sm:$0xf] %vm2209_vm1, %v2573_v13  ;;  %v2578_v40 = vpack.c.bf16 %v2055_v19, %v2055_v19  ;;  %v2053_v34 = vmax.f32 %v1939_v22, 0.0  ;;  %v1950_v28 = vadd.f32 %v2981_v53, %v1789_v21  ;;  %v1810_v53 = vadd.f32 %v2882_v52, %v3717_v36 }
 0x19b   : > { %v3910_v26 = vpop.f32.mrf.mxu0  ;;  %v1941_v30 = vpop.f32.mrf.mxu1  ;;  %v2894_v36 = vadd.f32 %v3865_v8, %v3859_v47  ;;  %v2897_v8 = vadd.f32 %v3882_v9, %v3875_v0 }
 0x19c   : > { %2216 = vst.msk [vmem:[%s3873_s22 + $0x18] sm:$0xf] %vm2209_vm1, %v2578_v40  ;;  %v2576_v45 = vpack.c.bf16 %v2053_v34, %v2053_v34  ;;  %v2056_v18 = vmax.f32 %v1950_v28, 0.0  ;;  %v1942_v32 = vadd.f32 %v1941_v30, %v1781_v3  ;;  %v1821_v40 = vadd.f32 %v2891_v1, %v3731_v11 }
 0x19d   : > { %v3917_v14 = vpop.f32.mrf.mxu0  ;;  %v2984_v62 = vpop.f32.mrf.mxu1  ;;  %v1813_v30 = vadd.f32 %v2885_v49, %v3721_v50  ;;  %v2903_v12 = vadd.f32 %v3910_v26, %v3901_v46 }
 0x19e   : > { %2214 = vst.msk [vmem:[%s3873_s22 + $0x10] sm:$0xf] %vm2209_vm1, %v2576_v45  ;;  %v2579_v35 = vpack.c.bf16 %v2056_v18, %v2056_v18  ;;  %v2054_v43 = vmax.f32 %v1942_v32, 0.0  ;;  %v1963_v4 = vadd.f32 %v2984_v62, %v1802_v5  ;;  %v1834_v62 = vadd.f32 %v2900_v61, %v3753_v51 }
 0x19f   : > { %v3922_v15 = vpop.f32.mrf.mxu0  ;;  %v1954_v31 = vpop.f32.mrf.mxu1 }
 0x1a0   : > { %2217 = vst.msk [vmem:[%s3873_s22 + $0x1c] sm:$0xf] %vm2209_vm1, %v2579_v35  ;;  %v2577_v39 = vpack.c.bf16 %v2054_v43, %v2054_v43  ;;  %v2059_v2 = vmax.f32 %v1963_v4, 0.0  ;;  %v1955_v60 = vadd.f32 %v1954_v31, %v1794_v42  ;;  %v1826_v4 = vadd.f32 %v2894_v36, %v3739_v25 }
 0x1a1   : > { %v3929_v56 = vpop.f32.mrf.mxu0  ;;  %v2985_v20 = vpop.f32.mrf.mxu1  ;;  %v2906_v52 = vadd.f32 %v3922_v15, %v3917_v14 }
 0x1a2   : > { %2215 = vst.msk [vmem:[%s3873_s22 + $0x14] sm:$0xf] %vm2209_vm1, %v2577_v39  ;;  %v2582_v23 = vpack.c.bf16 %v2059_v2, %v2059_v2  ;;  %v2057_v63 = vmax.f32 %v1955_v60, 0.0  ;;  %v1966_v41 = vadd.f32 %v2985_v20, %v1805_v44  ;;  %v4047_v44 = vld [vmem:[#allocation3_spill] sm:$0xff]  ;;  %v4048_v20 = vld [vmem:[#allocation2_spill] sm:$0xff] }
 0x1a3   : > { %v3938_v10 = vpop.f32.mrf.mxu0  ;;  %v1957_v6 = vpop.f32.mrf.mxu1  ;;  %v1837_v58 = vadd.f32 %v2903_v12, %v4047_v44 }
 0x1a4   : > { %2220 = vst.msk [vmem:[%s3873_s22 + $0x28] sm:$0xf] %vm2209_vm1, %v2582_v23  ;;  %v2580_v21 = vpack.c.bf16 %v2057_v63, %v2057_v63  ;;  %v2060_v48 = vmax.f32 %v1966_v41, 0.0  ;;  %v1958_v29 = vadd.f32 %v1957_v6, %v1797_v57  ;;  %v1829_v57 = vadd.f32 %v2897_v8, %v4048_v20 }
 0x1a5   : > { %v2910_v13 = vpop.f32.mrf.mxu0  ;;  %v2988_v19 = vpop.f32.mrf.mxu1  ;;  %v2909_v14 = vadd.f32 %v3938_v10, %v3929_v56 }
 0x1a6   : > { %2218 = vst.msk [vmem:[%s3873_s22 + $0x20] sm:$0xf] %vm2209_vm1, %v2580_v21  ;;  %v2583_v22 = vpack.c.bf16 %v2060_v48, %v2060_v48  ;;  %v2058_v27 = vmax.f32 %v1958_v29, 0.0  ;;  %v1979_v38 = vadd.f32 %v2988_v19, %v1818_v54  ;;  %v4049_v54 = vld [vmem:[#allocation6_spill] sm:$0xff] }
 0x1a7   : > { %v2911_v3 = vpop.f32.mrf.mxu0  ;;  %v1970_v7 = vpop.f32.mrf.mxu1 }
 0x1a8   : > { %2221 = vst.msk [vmem:[%s3873_s22 + $0x2c] sm:$0xf] %vm2209_vm1, %v2583_v22  ;;  %v2581_v17 = vpack.c.bf16 %v2058_v27, %v2058_v27  ;;  %v2063_v59 = vmax.f32 %v1979_v38, 0.0  ;;  %v1971_v34 = vadd.f32 %v1970_v7, %v1810_v53  ;;  %v2912_v39 = vadd.f32 %v2911_v3, %v2910_v13  ;;  %v4050_v38 = vld [vmem:[#allocation4_spill] sm:$0xff] }
 0x1a9   : > { %v2913_v28 = vpop.f32.mrf.mxu0  ;;  %v2989_v33 = vpop.f32.mrf.mxu1  ;;  %v1842_v53 = vadd.f32 %v2906_v52, %v4050_v38 }
 0x1aa   : > { %2219 = vst.msk [vmem:[%s3873_s22 + $0x24] sm:$0xf] %vm2209_vm1, %v2581_v17  ;;  %v2586_v11 = vpack.c.bf16 %v2063_v59, %v2063_v59  ;;  %v2061_v45 = vmax.f32 %v1971_v34, 0.0  ;;  %v1982_v18 = vadd.f32 %v2989_v33, %v1821_v40  ;;  %v1850_v49 = vadd.f32 %v2912_v39, %v4049_v54  ;;  %v4051_v40 = vld [vmem:[#allocation7_spill] sm:$0xff]  ;;  %v4052_v33 = vld [vmem:[#allocation5_spill] sm:$0xff] }
 0x1ab   : > { %v2914_v55 = vpop.f32.mrf.mxu0  ;;  %v1973_v32 = vpop.f32.mrf.mxu1 }
 0x1ac   : > { %2224 = vst.msk [vmem:[%s3873_s22 + $0x38] sm:$0xf] %vm2209_vm1, %v2586_v11  ;;  %v2584_v5 = vpack.c.bf16 %v2061_v45, %v2061_v45  ;;  %v2064_v16 = vmax.f32 %v1982_v18, 0.0  ;;  %v1974_v50 = vadd.f32 %v1973_v32, %v1813_v30  ;;  %v2915_v41 = vadd.f32 %v2914_v55, %v2913_v28  ;;  %v4053_v32 = vld [vmem:[#allocation10_spill] sm:$0xff] }
 0x1ad   : > { %v2916_v47 = vpop.f32.mrf.mxu0  ;;  %v2992_v35 = vpop.f32.mrf.mxu1  ;;  %v1845_v30 = vadd.f32 %v2909_v14, %v4052_v33 }
 0x1ae   : > { %2222 = vst.msk [vmem:[%s3873_s22 + $0x30] sm:$0xf] %vm2209_vm1, %v2584_v5  ;;  %v2587_v43 = vpack.c.bf16 %v2064_v16, %v2064_v16  ;;  %v2062_v46 = vmax.f32 %v1974_v50, 0.0  ;;  %v1995_v26 = vadd.f32 %v2992_v35, %v1834_v62  ;;  %v1853_v61 = vadd.f32 %v2915_v41, %v4051_v40 }
 0x1af   : > { %v2917_v42 = vpop.f32.mrf.mxu0  ;;  %v1986_v31 = vpop.f32.mrf.mxu1 }
 0x1b0   : > { %2225 = vst.msk [vmem:[%s3873_s22 + $0x3c] sm:$0xf] %vm2209_vm1, %v2587_v43  ;;  %v2585_v51 = vpack.c.bf16 %v2062_v46, %v2062_v46  ;;  %v2067_v0 = vmax.f32 %v1995_v26, 0.0  ;;  %v1987_v9 = vadd.f32 %v1986_v31, %v1826_v4  ;;  %v2918_v36 = vadd.f32 %v2917_v42, %v2916_v47  ;;  %v4054_v42 = vld [vmem:[#allocation8_spill] sm:$0xff] }
 0x1b1   : > { %v2919_v2 = vpop.f32.mrf.mxu0  ;;  %v2993_v60 = vpop.f32.mrf.mxu1 }
 0x1b2   : > { %2223 = vst.msk [vmem:[%s3873_s22 + $0x34] sm:$0xf] %vm2209_vm1, %v2585_v51  ;;  %v2590_v25 = vpack.c.bf16 %v2067_v0, %v2067_v0  ;;  %v2065_v23 = vmax.f32 %v1987_v9, 0.0  ;;  %v1998_v63 = vadd.f32 %v2993_v60, %v1837_v58  ;;  %v1858_v31 = vadd.f32 %v2918_v36, %v4054_v42  ;;  %v4055_v9 = vld [vmem:[#allocation11_spill] sm:$0xff] }
 0x1b3   : > { %v2920_v1 = vpop.f32.mrf.mxu0  ;;  %v1989_v6 = vpop.f32.mrf.mxu1 }
 0x1b4   : > { %2228 = vst.msk [vmem:[%s3873_s22 + $0x48] sm:$0xf] %vm2209_vm1, %v2590_v25  ;;  %v2588_v21 = vpack.c.bf16 %v2065_v23, %v2065_v23  ;;  %v2068_v48 = vmax.f32 %v1998_v63, 0.0  ;;  %v1990_v29 = vadd.f32 %v1989_v6, %v1829_v57  ;;  %v2921_v35 = vadd.f32 %v2920_v1, %v2919_v2  ;;  %v4056_v57 = vld [vmem:[#allocation9_spill] sm:$0xff] }
 0x1b5   : > { %v2922_v15 = vpop.f32.mrf.mxu0  ;;  %v2996_v13 = vpop.f32.mrf.mxu1 }
 0x1b6   : > { %2226 = vst.msk [vmem:[%s3873_s22 + $0x40] sm:$0xf] %vm2209_vm1, %v2588_v21  ;;  %v2591_v19 = vpack.c.bf16 %v2068_v48, %v2068_v48  ;;  %v2066_v22 = vmax.f32 %v1990_v29, 0.0  ;;  %v2011_v27 = vadd.f32 %v2996_v13, %v1850_v49  ;;  %v1861_v52 = vadd.f32 %v2921_v35, %v4056_v57 }
 0x1b7   : > { %v2923_v3 = vpop.f32.mrf.mxu0  ;;  %v2002_v7 = vpop.f32.mrf.mxu1 }
 0x1b8   : > { %2229 = vst.msk [vmem:[%s3873_s22 + $0x4c] sm:$0xf] %vm2209_vm1, %v2591_v19  ;;  %v2589_v17 = vpack.c.bf16 %v2066_v22, %v2066_v22  ;;  %v2071_v59 = vmax.f32 %v2011_v27, 0.0  ;;  %v2924_v56 = vadd.f32 %v2923_v3, %v2922_v15  ;;  %v2003_v10 = vadd.f32 %v2002_v7, %v1842_v53  ;;  %v4057_v19 = vld [vmem:[#allocation12_spill] sm:$0xff] }
 0x1b9   : > { %v2925_v34 = vpop.f32.mrf.mxu0  ;;  %v2997_v28 = vpop.f32.mrf.mxu1 }
 0x1ba   : > { %2227 = vst.msk [vmem:[%s3873_s22 + $0x44] sm:$0xf] %vm2209_vm1, %v2589_v17  ;;  %v2594_v11 = vpack.c.bf16 %v2071_v59, %v2071_v59  ;;  %v2069_v45 = vmax.f32 %v2003_v10, 0.0  ;;  %v2014_v18 = vadd.f32 %v2997_v28, %v1853_v61  ;;  %v1866_v5 = vadd.f32 %v2924_v56, %v4053_v32  ;;  %v4058_v56 = vld [vmem:[#allocation13_spill] sm:$0xff] }
 0x1bb   : > { %v2926_v12 = vpop.f32.mrf.mxu0  ;;  %v2005_v55 = vpop.f32.mrf.mxu1 }
 0x1bc   : > { %2232 = vst.msk [vmem:[%s3873_s22 + $0x58] sm:$0xf] %vm2209_vm1, %v2594_v11  ;;  %v2592_v16 = vpack.c.bf16 %v2069_v45, %v2069_v45  ;;  %v2072_v50 = vmax.f32 %v2014_v18, 0.0  ;;  %v2927_v62 = vadd.f32 %v2926_v12, %v2925_v34  ;;  %v2006_v8 = vadd.f32 %v2005_v55, %v1845_v30 }
 0x1bd   : > { %v2928_v43 = vpop.f32.mrf.mxu0  ;;  %v3000_v47 = vpop.f32.mrf.mxu1 }
 0x1be   : > { %2230 = vst.msk [vmem:[%s3873_s22 + $0x50] sm:$0xf] %vm2209_vm1, %v2592_v16  ;;  %v2595_v46 = vpack.c.bf16 %v2072_v50, %v2072_v50  ;;  %v2070_v26 = vmax.f32 %v2006_v8, 0.0  ;;  %v2027_v4 = vadd.f32 %v3000_v47, %v1866_v5  ;;  %v1869_v2 = vadd.f32 %v2927_v62, %v4055_v9 }
 0x1bf   : > { %v2929_v44 = vpop.f32.mrf.mxu0  ;;  %v2018_v58 = vpop.f32.mrf.mxu1 }
 0x1c0   : > { %2233 = vst.msk [vmem:[%s3873_s22 + $0x5c] sm:$0xf] %vm2209_vm1, %v2595_v46  ;;  %v2593_v39 = vpack.c.bf16 %v2070_v26, %v2070_v26  ;;  %v2075_v51 = vmax.f32 %v2027_v4, 0.0  ;;  %v2019_v0 = vadd.f32 %v2018_v58, %v1858_v31  ;;  %v2930_v23 = vadd.f32 %v2929_v44, %v2928_v43 }
 0x1c1   : > { %v2931_v60 = vpop.f32.mrf.mxu0  ;;  %v3001_v20 = vpop.f32.mrf.mxu1 }
 0x1c2   : > { %2231 = vst.msk [vmem:[%s3873_s22 + $0x54] sm:$0xf] %vm2209_vm1, %v2593_v39  ;;  %v2598_v25 = vpack.c.bf16 %v2075_v51, %v2075_v51  ;;  %v2073_v63 = vmax.f32 %v2019_v0, 0.0  ;;  %v2030_v41 = vadd.f32 %v3001_v20, %v1869_v2  ;;  %v1874_v22 = vadd.f32 %v2930_v23, %v4057_v19 }
 0x1c3   : > { %v2932_v1 = vpop.f32.mrf.mxu0  ;;  %v2021_v6 = vpop.f32.mrf.mxu1 }
 0x1c4   : > { %2236 = vst.msk [vmem:[%s3873_s22 + $0x68] sm:$0xf] %vm2209_vm1, %v2598_v25  ;;  %v2596_v21 = vpack.c.bf16 %v2073_v63, %v2073_v63  ;;  %v2076_v48 = vmax.f32 %v2030_v41, 0.0  ;;  %v2022_v29 = vadd.f32 %v2021_v6, %v1861_v52  ;;  %v2933_v15 = vadd.f32 %v2932_v1, %v2931_v60 }
 0x1c5   : > { %v2934_v54 = vpop.f32.mrf.mxu0  ;;  %v3004_v49 = vpop.f32.mrf.mxu1 }
 0x1c6   : > { %2234 = vst.msk [vmem:[%s3873_s22 + $0x60] sm:$0xf] %vm2209_vm1, %v2596_v21  ;;  %v2599_v14 = vpack.c.bf16 %v2076_v48, %v2076_v48  ;;  %v2074_v13 = vmax.f32 %v2022_v29, 0.0  ;;  %v1877_v10 = vadd.f32 %v2933_v15, %v4058_v56 }
 0x1c7   : > { %v2935_v27 = vpop.f32.mrf.mxu0  ;;  %v2034_v38 = vpop.f32.mrf.mxu1 }
 0x1c8   : > { %2237 = vst.msk [vmem:[%s3873_s22 + $0x6c] sm:$0xf] %vm2209_vm1, %v2599_v14  ;;  %v2597_v53 = vpack.c.bf16 %v2074_v13, %v2074_v13  ;;  %v2936_v3 = vadd.f32 %v2935_v27, %v2934_v54  ;;  %v2035_v7 = vadd.f32 %v2034_v38, %v1874_v22 }
 0x1c9   : > { %v2937_v40 = vpop.f32.mrf.mxu0  ;;  %v3005_v61 = vpop.f32.mrf.mxu1 }
 0x1ca   : > { %2235 = vst.msk [vmem:[%s3873_s22 + $0x64] sm:$0xf] %vm2209_vm1, %v2597_v53  ;;  %v1882_v17 = vadd.f32 %v2936_v3, %v3848_v37  ;;  %v2077_v59 = vmax.f32 %v2035_v7, 0.0 }
 0x1cb   : > { %v2938_v34 = vpop.f32.mrf.mxu0  ;;  %v2037_v28 = vpop.f32.mrf.mxu1 }
 0x1cc   : > { %v2043_v33 = vadd.f32 %v3004_v49, %v1882_v17  ;;  %v2600_v30 = vpack.c.bf16 %v2077_v59, %v2077_v59  ;;  %v2939_v36 = vadd.f32 %v2938_v34, %v2937_v40  ;;  %v2038_v11 = vadd.f32 %v2037_v28, %v1877_v10 }
 0x1ce   : > { %v2079_v45 = vmax.f32 %v2043_v33, 0.0  ;;  %2238 = vst.msk [vmem:[%s3873_s22 + $0x70] sm:$0xf] %vm2209_vm1, %v2600_v30  ;;  %v1885_v18 = vadd.f32 %v2939_v36, %v3861_v24  ;;  %v2078_v12 = vmax.f32 %v2038_v11, 0.0 }
 0x1d0   : > { %v2602_v55 = vpack.c.bf16 %v2079_v45, %v2079_v45  ;;  %v2046_v37 = vadd.f32 %v3005_v61, %v1885_v18  ;;  %v2601_v32 = vpack.c.bf16 %v2078_v12, %v2078_v12 }
 0x1d2   : > { %2240 = vst.msk [vmem:[%s3873_s22 + $0x78] sm:$0xf] %vm2209_vm1, %v2602_v55  ;;  %v2080_v5 = vmax.f32 %v2046_v37, 0.0  ;;  %2239 = vst.msk [vmem:[%s3873_s22 + $0x74] sm:$0xf] %vm2209_vm1, %v2601_v32 }
 0x1d4   : > { %v2603_v16 = vpack.c.bf16 %v2080_v5, %v2080_v5 }
 0x1d6   : > { %2241 = vst.msk [vmem:[%s3873_s22 + $0x7c] sm:$0xf] %vm2209_vm1, %v2603_v16 }
 0x1d7 PF: > { %s13_s14 = sadd.s32 1, %s3283_s14   ;;  %s4059_s12 = smov %s3279_s13 }
 0x1d8   : > { %p10_p5 = scmp.ge.s32.totalorder %s13_s14, 4   ;;  %s4060_s13 = smov %s4062_s15 }
 0x1da   :  { %12 = sbr.rel (!%p10_p5) target bundleno = 2 (0x2), region = 68 }

// kernel: hourglass_forward.8
= control target key start
LH: loop header
LB: loop body
LE: loop exit
PB: predicated region body
PF: predicated region fallthrough
CT: control target
= control target key end

     0   :  { %s1427_s12 = smov 0   ;;  %s1429_s13 = smov 0   ;;  %s1652_s0 = inlined_call_operand.vmem [shape: bf16[64,864], index: 0, kind: input, shape index: {}]   ;;  %s1653_s1 = inlined_call_operand.vmem [shape: bf16[864,64], index: 1, kind: input, shape index: {}]   ;;  %s1654_s2 = inlined_call_operand.vmem [shape: f32[1,64], index: 2, kind: input, shape index: {}]   ;;  %s1655_s3 = inlined_call_operand.vmem [shape: bf16[64,64], index: 3, kind: output, shape index: {}]  }
   0x1   :  { %s1431_s14 = smov 0  }
   0x2 LB: > { %s25_s15 = sadd.s32 1, %s1401_s13  ;;  %p1090_p0 = scmp.ge.s32.totalorder %s1405_s14, 1  ;;  %s1405_s14 = sphi %s1431_s14, %s13_s14   ;;  %s1401_s13 = sphi %s1429_s13, %s1657_s13   ;;  %s1397_s12 = sphi %s1427_s12, %s1656_s12  }
   0x3   : > { %p27_p1 = scmp.ge.s32.totalorder %s25_s15, 2  ;;  %p170_p2 = scmp.lt.s32.totalorder %s1405_s14, 3 }
   0x5   : > { %s1659_s15 = smov (%p27_p1, %s25_s15), 0  ;;  %p171_p3 = pnand %p1090_p0, %p170_p2 }
   0x6   : > { %s1091_s21 = sshll.u32 (!%p171_p3), %s1397_s12, 2 }
   0x7   : > { %174 = sbr.rel (%p171_p3) target bundleno = 295 (0x127), region = 32  ;;  %p206_p4 = scmp.lt.s32.totalorder (!%p171_p3), %s1091_s21, 7 }
   0xc   : > { %v1309_v0 = vld [vmem:[%s1653_s1 + $0x78] sm:$0xff]   ;;  %v1313_v4 = vld [vmem:[%s1653_s1 + $0x70] sm:$0xff]   ;;  %v1317_v8 = vld [vmem:[%s1653_s1 + $0x68] sm:$0xff]   ;;  %s1661_s21 = smov (!%p206_p4, %s1091_s21), 7  ;;  %vm754_vm0 = vcmask 785408   ;;  %vm977_vm1 = vcmask 519168  }
   0xd   : > { %v1310_v1 = vld [vmem:[%s1653_s1 + $0x38] sm:$0xff]   ;;  %1176 = vmatprep.subr.bf16.mxu0 %v1309_v0  ;;  %v1314_v5 = vld [vmem:[%s1653_s1 + $0x30] sm:$0xff]   ;;  %v1318_v9 = vld [vmem:[%s1653_s1 + $0x28] sm:$0xff]   ;;  %s1284_s20 = smul.u32 28, %s1661_s21 }
   0xe   : > { %v1311_v2 = vld [vmem:[%s1653_s1 + $0xf8] sm:$0xff]   ;;  %1177 = vmatpush3.bf16.msra.mxu0 %v1310_v1  ;;  %v1315_v6 = vld [vmem:[%s1653_s1 + $0xf0] sm:$0xff]   ;;  %v1319_v10 = vld [vmem:[%s1653_s1 + $0xe8] sm:$0xff]  }
   0xf   : > { %v1312_v3 = vld [vmem:[%s1653_s1 + $0xb8] sm:$0xff]   ;;  %1204 = vmatprep.subr.bf16.mxu1 %v1311_v2  ;;  %1178 = vmatprep.subr.bf16.mxu0 %v1313_v4  ;;  %v1316_v7 = vld [vmem:[%s1653_s1 + $0xb0] sm:$0xff]   ;;  %v1320_v11 = vld [vmem:[%s1653_s1 + $0xa8] sm:$0xff]   ;;  %s1541_s4 = scalar_lea.vmem %s1652_s0, %s1284_s20 }
  0x10   : > { %1205 = vmatpush3.bf16.msra.mxu1 %v1312_v3  ;;  %v1321_v12 = vld [vmem:[%s1653_s1 + $0x60] sm:$0xff]   ;;  %v1325_v16 = vld [vmem:[%s1653_s1 + $0x58] sm:$0xff]   ;;  %v1329_v20 = vld [vmem:[%s1653_s1 + $0x50] sm:$0xff]  }
  0x11   : > { %1206 = vmatprep.subr.bf16.mxu1 %v1315_v6  ;;  %v1322_v13 = vld [vmem:[%s1653_s1 + $0x20] sm:$0xff]   ;;  %v1326_v17 = vld [vmem:[%s1653_s1 + $0x18] sm:$0xff]   ;;  %v1330_v21 = vld [vmem:[%s1653_s1 + $0x10] sm:$0xff]  }
  0x12   : > { %1179 = vmatpush3.bf16.msra.mxu0 %v1314_v5  ;;  %v1323_v14 = vld [vmem:[%s1653_s1 + $0xe0] sm:$0xff]   ;;  %v1327_v18 = vld [vmem:[%s1653_s1 + $0xd8] sm:$0xff]   ;;  %v1331_v22 = vld [vmem:[%s1653_s1 + $0xd0] sm:$0xff]  }
  0x13   : > { %1180 = vmatprep.subr.bf16.mxu0 %v1317_v8  ;;  %v1324_v15 = vld [vmem:[%s1653_s1 + $0xa0] sm:$0xff]   ;;  %v1328_v19 = vld [vmem:[%s1653_s1 + $0x98] sm:$0xff]   ;;  %v1332_v23 = vld [vmem:[%s1653_s1 + $0x90] sm:$0xff]  }
  0x14   : > { %1207 = vmatpush3.bf16.msra.mxu1 %v1316_v7  ;;  %v1333_v24 = vld [vmem:[%s1653_s1 + $0x48] sm:$0xff]   ;;  %v1337_v28 = vld [vmem:[%s1653_s1 + $0x40] sm:$0xff]   ;;  %v1344_v34 = vld [vmem:[%s1653_s1 + $0x178] sm:$0xff]  }
  0x15   : > { %1208 = vmatprep.subr.bf16.mxu1 %v1319_v10  ;;  %v1334_v25 = vld [vmem:[%s1653_s1 + $0x8] sm:$0xff]   ;;  %v1338_v29 = vld [vmem:[%s1653_s1] sm:$0xff]   ;;  %v1348_v37 = vld [vmem:[%s1653_s1 + $0x138] sm:$0xff]  }
  0x16   : > { %1181 = vmatpush3.bf16.msra.mxu0 %v1318_v9  ;;  %v1335_v26 = vld [vmem:[%s1653_s1 + $0xc8] sm:$0xff]   ;;  %v1339_v30 = vld [vmem:[%s1653_s1 + $0xc0] sm:$0xff]   ;;  %v1349_v38 = vld [vmem:[%s1653_s1 + $0x170] sm:$0xff]  }
  0x17   : > { %1182 = vmatprep.subr.bf16.mxu0 %v1321_v12  ;;  %v1336_v27 = vld [vmem:[%s1653_s1 + $0x88] sm:$0xff]   ;;  %v1340_v31 = vld [vmem:[%s1541_s4] ss:$28 sps:$4 sm:$0xff]   ;;  %v1350_v39 = vld [vmem:[%s1653_s1 + $0x130] sm:$0xff]  }
  0x18   : > { %1209 = vmatpush3.bf16.msra.mxu1 %v1320_v11  ;;  %v1342_v32 = vld [vmem:[%s1541_s4 + $0x4] ss:$28 sps:$4 sm:$0xff]   ;;  %v1347_v36 = vld [vmem:[%s1541_s4 + $0xc] ss:$28 sps:$4 sm:$0xff]   ;;  %v1358_v46 = vld [vmem:[%s1541_s4 + $0x3c] ss:$28 sps:$4 sm:$0xff]  }
  0x19   : > { %1210 = vmatprep.subr.bf16.mxu1 %v1323_v14  ;;  %v1343_v33 = vld [vmem:[%s1653_s1 + $0x80] sm:$0xff]   ;;  %793 = vmatprep.mubr.bf16.mxu0 %v1342_v32  ;;  %v1351_v40 = vld [vmem:[%s1653_s1 + $0x168] sm:$0xff]   ;;  %v1356_v47 = vld [vmem:[%s1653_s1 + $0x158] sm:$0xff]  }
  0x1a   : > { %1183 = vmatpush3.bf16.msra.mxu0 %v1322_v13  ;;  %v1345_v35 = vld [vmem:[%s1541_s4 + $0x8] ss:$28 sps:$4 sm:$0xff]   ;;  %842 = vmatprep.mubr.bf16.mxu1 %v1347_v36  ;;  %v1361_v48 = vld [vmem:[%s1541_s4 + $0x38] ss:$28 sps:$4 sm:$0xff]   ;;  %v1364_v51 = vld [vmem:[%s1541_s4 + $0x40] ss:$28 sps:$4 sm:$0xff]  }
  0x1b   : > { %1184 = vmatprep.subr.bf16.mxu0 %v1325_v16  ;;  %v1352_v41 = vld [vmem:[%s1653_s1 + $0x128] sm:$0xff]   ;;  %v1353_v43 = vld [vmem:[%s1653_s1 + $0x160] sm:$0xff]   ;;  %v1360_v49 = vld [vmem:[%s1653_s1 + $0x118] sm:$0xff]  }
  0x1c   : > { %1211 = vmatpush3.bf16.msra.mxu1 %v1324_v15  ;;  %v1354_v42 = vld [vmem:[%s1653_s1 + $0x1a8] sm:$0xff]   ;;  %v1355_v44 = vld [vmem:[%s1653_s1 + $0x120] sm:$0xff]   ;;  %v1365_v52 = vld [vmem:[%s1653_s1 + $0x150] sm:$0xff]  }
  0x1d   : > { %1212 = vmatprep.subr.bf16.mxu1 %v1327_v18  ;;  %v1357_v45 = vld [vmem:[%s1653_s1 + $0x1a0] sm:$0xff]   ;;  %v1366_v53 = vld [vmem:[%s1653_s1 + $0x198] sm:$0xff]   ;;  %v1367_v54 = vld [vmem:[%s1653_s1 + $0x110] sm:$0xff]  }
  0x1e   : > { %1185 = vmatpush3.bf16.msra.mxu0 %v1326_v17  ;;  %v1362_v50 = vld [vmem:[%s1541_s4 + $0x44] ss:$28 sps:$4 sm:$0xff]   ;;  %v1369_v55 = vld [vmem:[%s1653_s1 + $0x190] sm:$0xff]   ;;  %v1368_v56 = vld [vmem:[%s1653_s1 + $0x148] sm:$0xff]  }
  0x1f   : > { %1186 = vmatprep.subr.bf16.mxu0 %v1329_v20  ;;  %v1372_v57 = vld [vmem:[%s1653_s1 + $0x188] sm:$0xff]   ;;  %v1371_v59 = vld [vmem:[%s1653_s1 + $0x140] sm:$0xff]   ;;  %v1376_v60 = vld [vmem:[%s1541_s4 + $0x14] ss:$28 sps:$4 sm:$0xff]  }
  0x20   : > { %1213 = vmatpush3.bf16.msra.mxu1 %v1328_v19  ;;  %v1370_v58 = vld [vmem:[%s1653_s1 + $0x108] sm:$0xff]   ;;  %v1377_v61 = vld [vmem:[%s1653_s1 + $0x180] sm:$0xff]   ;;  %v1378_v62 = vld [vmem:[%s1541_s4 + $0x18] ss:$28 sps:$4 sm:$0xff]  }
  0x21   : > { %1214 = vmatprep.subr.bf16.mxu1 %v1331_v22  ;;  %v1373_v63 = vld [vmem:[%s1653_s1 + $0x100] sm:$0xff]   ;;  %v1374_v0 = vld [vmem:[%s1541_s4 + $0x10] ss:$28 sps:$4 sm:$0xff]  }
  0x22   : > { %1187 = vmatpush3.bf16.msra.mxu0 %v1330_v21  ;;  %v1379_v1 = vld [vmem:[%s1541_s4 + $0x50] ss:$28 sps:$4 sm:$0xff]   ;;  %v1382_v3 = vld [vmem:[%s1541_s4 + $0x48] ss:$28 sps:$4 sm:$0xff]   ;;  %v1095_v19 = vld [vmem:[%s1654_s2] ss:$0 sm:$0xff] }
  0x23   : > { %1188 = vmatprep.subr.bf16.mxu0 %v1333_v24  ;;  %v1380_v2 = vld [vmem:[%s1541_s4 + $0x4c] ss:$28 sps:$4 sm:$0xff]   ;;  %s1094_s4 = sshll.u32 %s1661_s21, 2 }
  0x24   : > { %1215 = vmatpush3.bf16.msra.mxu1 %v1332_v23  ;;  %s226_s19 = scalar_lea.vmem %s1655_s3, %s1094_s4 }
  0x25   : > { %1216 = vmatprep.subr.bf16.mxu1 %v1335_v26 }
  0x26   : > { %1189 = vmatpush3.bf16.msra.mxu0 %v1334_v25 }
  0x27   : > { %1190 = vmatprep.subr.bf16.mxu0 %v1337_v28 }
  0x28   : > { %1217 = vmatpush3.bf16.msra.mxu1 %v1336_v27 }
  0x29   : > { %1218 = vmatprep.subr.bf16.mxu1 %v1339_v30 }
  0x2a   : > { %1191 = vmatpush3.bf16.msra.mxu0 %v1338_v29 }
  0x2b   : > { %1232 = vmatprep.subr.bf16.mxu0 %v1344_v34 }
  0x2c   : > { %1219 = vmatpush3.bf16.msra.mxu1 %v1343_v33 }
  0x2d   : > { %794 = vmatmul.mubr.bf16.vlgmr.msra.gmra.mxu0 %v1340_v31  ;;  %1268 = vmatprep.subr.bf16.mxu1 %v1354_v42 }
  0x2e   : > { %1233 = vmatpush3.bf16.msra.mxu0 %v1348_v37  ;;  %801 = vmatprep.mubr.bf16.mxu0 %v1358_v46 }
  0x2f   : > { %843 = vmatmul.mubr.bf16.vlgmr.msra.gmra.mxu1 %v1345_v35  ;;  %1234 = vmatprep.subr.bf16.mxu0 %v1349_v38 }
  0x30   : > { %1269 = vmatpush3.bf16.msra.mxu1 %v1354_v42  ;;  %850 = vmatprep.mubr.bf16.mxu1 %v1362_v50 }
  0x31   : > { %1270 = vmatprep.subr.bf16.mxu1 %v1357_v45 }
  0x32   : > { %1235 = vmatpush3.bf16.msra.mxu0 %v1350_v39 }
  0x33   : > { %1236 = vmatprep.subr.bf16.mxu0 %v1351_v40 }
  0x34   : > { %1271 = vmatpush3.bf16.msra.mxu1 %v1357_v45 }
  0x35   : > { %802 = vmatmul.mubr.bf16.gmra.mxu0 %v1361_v48  ;;  %1272 = vmatprep.subr.bf16.mxu1 %v1366_v53 }
  0x36   : > { %1237 = vmatpush3.bf16.msra.mxu0 %v1352_v41  ;;  %891 = vmatprep.mubr.bf16.mxu0 %v1376_v60 }
  0x37   : > { %1238 = vmatprep.subr.bf16.mxu0 %v1353_v43  ;;  %851 = vmatmul.mubr.bf16.gmra.mxu1 %v1364_v51 }
  0x38   : > { %1273 = vmatpush3.bf16.msra.mxu1 %v1366_v53  ;;  %1280 = vmatprep.mubr.msk.bf16.mxu1 %vm754_vm0, %v1378_v62 }
  0x39   : > { %1274 = vmatprep.subr.bf16.mxu1 %v1369_v55 }
  0x3a   : > { %1239 = vmatpush3.bf16.msra.mxu0 %v1355_v44 }
  0x3b   : > { %1240 = vmatprep.subr.bf16.mxu0 %v1356_v47 }
  0x3c   : > { %1275 = vmatpush3.bf16.msra.mxu1 %v1369_v55 }
  0x3d   : > { %1276 = vmatprep.subr.bf16.mxu1 %v1372_v57 }
  0x3e   : > { %1241 = vmatpush3.bf16.msra.mxu0 %v1360_v49 }
  0x3f   : > { %1242 = vmatprep.subr.bf16.mxu0 %v1365_v52 }
  0x40   : > { %1277 = vmatpush3.bf16.msra.mxu1 %v1372_v57 }
  0x41   : > { %1278 = vmatprep.subr.bf16.mxu1 %v1377_v61 }
  0x42   : > { %1243 = vmatpush3.bf16.msra.mxu0 %v1367_v54 }
  0x43   : > { %1244 = vmatprep.subr.bf16.mxu0 %v1368_v56 }
  0x44   : > { %1279 = vmatpush3.bf16.msra.mxu1 %v1377_v61 }
  0x46   : > { %1245 = vmatpush3.bf16.msra.mxu0 %v1370_v58 }
  0x47   : > { %1246 = vmatprep.subr.bf16.mxu0 %v1371_v59  ;;  %1281 = vmatmul.mubr.msk.bf16.vlgmr.msra.gmra.mxu1 %vm754_vm0, %v1379_v1 }
  0x4a   : > { %1247 = vmatpush3.bf16.msra.mxu0 %v1373_v63 }
  0x4d   : > { %892 = vmatmul.mubr.bf16.vlgmr.msra.gmra.mxu0 %v1374_v0 }
  0x4e   : > { %899 = vmatprep.mubr.bf16.mxu0 %v1380_v2 }
  0x55   : > { %900 = vmatmul.mubr.bf16.gmra.mxu0 %v1382_v3 }
  0xed   : > { %v1192_v4 = vpop.f32.mrf.mxu0 }
  0xef   : > { %v1220_v5 = vpop.f32.mrf.mxu1  ;;  %v1193_v6 = vpop.f32.mrf.mxu0 }
  0xf0   : > { %v1194_v18 = vadd.f32 %v1193_v6, %v1192_v4 }
  0xf1   : > { %v1221_v7 = vpop.f32.mrf.mxu1  ;;  %v1195_v8 = vpop.f32.mrf.mxu0 }
  0xf2   : > { %v796_v22 = vadd.f32 %v1194_v18, %v1095_v19  ;;  %v1222_v23 = vadd.f32 %v1221_v7, %v1220_v5 }
  0xf3   : > { %v1223_v9 = vpop.f32.mrf.mxu1  ;;  %v1196_v10 = vpop.f32.mrf.mxu0 }
  0xf4   : > { %v1197_v24 = vadd.f32 %v1196_v10, %v1195_v8  ;;  %v845_v30 = vadd.f32 %v1222_v23, %v796_v22 }
  0xf5   : > { %v1224_v11 = vpop.f32.mrf.mxu1  ;;  %v1198_v12 = vpop.f32.mrf.mxu0 }
  0xf6   : > { %v799_v31 = vadd.f32 %v1197_v24, %v1095_v19  ;;  %v1225_v32 = vadd.f32 %v1224_v11, %v1223_v9 }
  0xf7   : > { %v1226_v13 = vpop.f32.mrf.mxu1  ;;  %v1199_v14 = vpop.f32.mrf.mxu0 }
  0xf8   : > { %v1200_v27 = vadd.f32 %v1199_v14, %v1198_v12  ;;  %v848_v41 = vadd.f32 %v1225_v32, %v799_v31 }
  0xf9   : > { %v1227_v15 = vpop.f32.mrf.mxu1  ;;  %v1201_v16 = vpop.f32.mrf.mxu0 }
  0xfa   : > { %v804_v37 = vadd.f32 %v1200_v27, %v1095_v19  ;;  %v1228_v38 = vadd.f32 %v1227_v15, %v1226_v13 }
  0xfb   : > { %v1229_v17 = vpop.f32.mrf.mxu1  ;;  %v1202_v20 = vpop.f32.mrf.mxu0 }
  0xfc   : > { %v1203_v39 = vadd.f32 %v1202_v20, %v1201_v16  ;;  %v853_v48 = vadd.f32 %v1228_v38, %v804_v37 }
  0xfd   : > { %v1230_v21 = vpop.f32.mrf.mxu1 }
  0xfe   : > { %v807_v49 = vadd.f32 %v1203_v39, %v1095_v19  ;;  %v1231_v51 = vadd.f32 %v1230_v21, %v1229_v17 }
 0x100   : > { %v856_v59 = vadd.f32 %v1231_v51, %v807_v49 }
 0x107   : > { %v1282_v26 = vpop.f32.mrf.mxu1 }
 0x109   : > { %v942_v29 = vpop.f32.mrf.mxu1 }
 0x10b   : > { %v1283_v35 = vpop.f32.mrf.mxu1 }
 0x10d   : > { %v1248_v25 = vpop.f32.mrf.mxu0  ;;  %v945_v45 = vpop.f32.mrf.mxu1 }
 0x10f   : > { %v1249_v28 = vpop.f32.mrf.mxu0 }
 0x110   : > { %v1250_v33 = vadd.f32 %v1249_v28, %v1248_v25 }
 0x111   : > { %v1251_v34 = vpop.f32.mrf.mxu0 }
 0x112   : > { %v894_v36 = vadd.f32 %v1250_v33, %v845_v30 }
 0x113   : > { %v1252_v40 = vpop.f32.mrf.mxu0 }
 0x114   : > { %v1253_v42 = vadd.f32 %v1252_v40, %v1251_v34  ;;  %v943_v43 = vadd.f32 %v942_v29, %v894_v36 }
 0x115   : > { %v1254_v44 = vpop.f32.mrf.mxu0 }
 0x116   : > { %v957_v46 = vmax.f32 %v943_v43, 0.0  ;;  %v897_v47 = vadd.f32 %v1253_v42, %v848_v41 }
 0x117   : > { %v1255_v50 = vpop.f32.mrf.mxu0 }
 0x118   : > { %v1172_v52 = vpack.c.bf16 %v957_v46, %v957_v46  ;;  %v1256_v53 = vadd.f32 %v1255_v50, %v1254_v44  ;;  %v946_v54 = vadd.f32 %v945_v45, %v897_v47 }
 0x119   : > { %v1257_v55 = vpop.f32.mrf.mxu0 }
 0x11a   : > { %978 = vst.msk [vmem:[%s226_s19] sm:$0xf] %vm977_vm1, %v1172_v52  ;;  %v902_v56 = vadd.f32 %v1256_v53, %v853_v48  ;;  %v958_v57 = vmax.f32 %v946_v54, 0.0 }
 0x11b   : > { %v1258_v58 = vpop.f32.mrf.mxu0 }
 0x11c   : > { %v951_v60 = vadd.f32 %v1282_v26, %v902_v56  ;;  %v1173_v61 = vpack.c.bf16 %v958_v57, %v958_v57  ;;  %v1259_v62 = vadd.f32 %v1258_v58, %v1257_v55 }
 0x11e   : > { %v959_v63 = vmax.f32 %v951_v60, 0.0  ;;  %979 = vst.msk [vmem:[%s226_s19 + $0x4] sm:$0xf] %vm977_vm1, %v1173_v61  ;;  %v905_v0 = vadd.f32 %v1259_v62, %v856_v59 }
 0x120   : > { %v1174_v1 = vpack.c.bf16 %v959_v63, %v959_v63  ;;  %v954_v2 = vadd.f32 %v1283_v35, %v905_v0 }
 0x122   : > { %980 = vst.msk [vmem:[%s226_s19 + $0x8] sm:$0xf] %vm977_vm1, %v1174_v1  ;;  %v960_v3 = vmax.f32 %v954_v2, 0.0 }
 0x124   : > { %v1175_v4 = vpack.c.bf16 %v960_v3, %v960_v3 }
 0x126   : > { %981 = vst.msk [vmem:[%s226_s19 + $0xc] sm:$0xf] %vm977_vm1, %v1175_v4 }
 0x127 PF: > { %s13_s14 = sadd.s32 1, %s1405_s14   ;;  %s1656_s12 = smov %s1401_s13 }
 0x128   : > { %p10_p5 = scmp.ge.s32.totalorder %s13_s14, 4   ;;  %s1657_s13 = smov %s1659_s15 }
 0x12a   :  { %12 = sbr.rel (!%p10_p5) target bundleno = 2 (0x2), region = 68 }

// kernel: hourglass_forward.9
= control target key start
LH: loop header
LB: loop body
LE: loop exit
PB: predicated region body
PF: predicated region fallthrough
CT: control target
= control target key end

     0   :  { %s2292_s12 = smov 0   ;;  %s2294_s13 = smov 0   ;;  %s2707_s0 = inlined_call_operand.vmem [shape: bf16[64,1728], index: 0, kind: input, shape index: {}]   ;;  %s2708_s1 = inlined_call_operand.vmem [shape: bf16[1728,64], index: 1, kind: input, shape index: {}]   ;;  %s2709_s2 = inlined_call_operand.vmem [shape: f32[1,64], index: 2, kind: input, shape index: {}]   ;;  %s2710_s3 = inlined_call_operand.vmem [shape: bf16[64,64], index: 3, kind: output, shape index: {}]  }
   0x1   :  { %s2296_s14 = smov 0  }
   0x2 LB: > { %s25_s15 = sadd.s32 1, %s2265_s13  ;;  %p1749_p0 = scmp.ge.s32.totalorder %s2269_s14, 1  ;;  %s2269_s14 = sphi %s2296_s14, %s13_s14   ;;  %s2265_s13 = sphi %s2294_s13, %s2712_s13   ;;  %s2261_s12 = sphi %s2292_s12, %s2711_s12  }
   0x3   : > { %p27_p1 = scmp.ge.s32.totalorder %s25_s15, 2  ;;  %p170_p2 = scmp.lt.s32.totalorder %s2269_s14, 3 }
   0x5   : > { %s2714_s15 = smov (%p27_p1, %s25_s15), 0  ;;  %p171_p3 = pnand %p1749_p0, %p170_p2 }
   0x6   : > { %s1750_s28 = sshll.u32 (!%p171_p3), %s2261_s12, 2 }
   0x7   : > { %174 = sbr.rel (%p171_p3) target bundleno = 359 (0x167), region = 32  ;;  %p206_p4 = scmp.lt.s32.totalorder (!%p171_p3), %s1750_s28, 7 }
   0xc   : > { %v2097_v0 = vld [vmem:[%s2708_s1 + $0x78] sm:$0xff]   ;;  %v2099_v2 = vld [vmem:[%s2708_s1 + $0x70] sm:$0xff]   ;;  %v2101_v4 = vld [vmem:[%s2708_s1 + $0x68] sm:$0xff]   ;;  %s2716_s28 = smov (!%p206_p4, %s1750_s28), 7  ;;  %vm1266_vm0 = vcmask 523264   ;;  %vm1636_vm1 = vcmask 519168  }
   0xd   : > { %v2098_v1 = vld [vmem:[%s2708_s1 + $0x38] sm:$0xff]   ;;  %1903 = vmatprep.subr.bf16.mxu1 %v2097_v0  ;;  %v2100_v3 = vld [vmem:[%s2708_s1 + $0x30] sm:$0xff]   ;;  %v2102_v5 = vld [vmem:[%s2708_s1 + $0x28] sm:$0xff]   ;;  %s2071_s27 = smul.u32 56, %s2716_s28  ;;  %s1753_s11 = sshll.u32 %s2716_s28, 2 }
   0xe   : > { %1904 = vmatpush3.bf16.msra.mxu1 %v2098_v1  ;;  %v2103_v6 = vld [vmem:[%s2708_s1 + $0x60] sm:$0xff]   ;;  %v2106_v7 = vld [vmem:[%s2708_s1 + $0x178] sm:$0xff]   ;;  %v2110_v11 = vld [vmem:[%s2708_s1 + $0x170] sm:$0xff]   ;;  %s226_s18 = scalar_lea.vmem %s2710_s3, %s1753_s11 }
   0xf   : > { %1905 = vmatprep.subr.bf16.mxu1 %v2099_v2  ;;  %v2104_v8 = vld [vmem:[%s2708_s1 + $0x20] sm:$0xff]   ;;  %1959 = vmatprep.subr.bf16.mxu0 %v2106_v7  ;;  %v2108_v9 = vld [vmem:[%s2708_s1 + $0x138] sm:$0xff]   ;;  %v2112_v13 = vld [vmem:[%s2708_s1 + $0x130] sm:$0xff]   ;;  %s2382_s12 = scalar_lea.vmem %s2707_s0, %s2071_s27 }
  0x10   : > { %v2105_v10 = vld [vmem:[%s2708_s1 + $0x58] sm:$0xff]   ;;  %1960 = vmatpush3.bf16.msra.mxu0 %v2108_v9  ;;  %v2109_v14 = vld [vmem:[%s2708_s1 + $0x50] sm:$0xff]   ;;  %v2114_v15 = vld [vmem:[%s2708_s1 + $0x168] sm:$0xff]  }
  0x11   : > { %v2107_v12 = vld [vmem:[%s2708_s1 + $0x18] sm:$0xff]   ;;  %1961 = vmatprep.subr.bf16.mxu0 %v2110_v11  ;;  %v2111_v16 = vld [vmem:[%s2708_s1 + $0x10] sm:$0xff]   ;;  %v2116_v17 = vld [vmem:[%s2708_s1 + $0x128] sm:$0xff]  }
  0x12   : > { %1906 = vmatpush3.bf16.msra.mxu1 %v2100_v3  ;;  %v2113_v18 = vld [vmem:[%s2708_s1 + $0x48] sm:$0xff]   ;;  %v2118_v19 = vld [vmem:[%s2708_s1 + $0x160] sm:$0xff]   ;;  %v2125_v25 = vld [vmem:[%s2708_s1 + $0x158] sm:$0xff]  }
  0x13   : > { %1907 = vmatprep.subr.bf16.mxu1 %v2101_v4  ;;  %v2115_v20 = vld [vmem:[%s2708_s1 + $0x8] sm:$0xff]   ;;  %v2120_v21 = vld [vmem:[%s2708_s1 + $0x120] sm:$0xff]   ;;  %v2124_v27 = vld [vmem:[%s2708_s1 + $0xf8] sm:$0xff]  }
  0x14   : > { %1962 = vmatpush3.bf16.msra.mxu0 %v2112_v13  ;;  %v2117_v22 = vld [vmem:[%s2708_s1 + $0x40] sm:$0xff]   ;;  %v2127_v28 = vld [vmem:[%s2708_s1 + $0x118] sm:$0xff]   ;;  %v2129_v30 = vld [vmem:[%s2708_s1 + $0x150] sm:$0xff]  }
  0x15   : > { %1963 = vmatprep.subr.bf16.mxu0 %v2114_v15  ;;  %v2123_v23 = vld [vmem:[%s2382_s12 + $0x4] ss:$56 sps:$4 sm:$0xff]   ;;  %v2121_v26 = vld [vmem:[%s2382_s12] ss:$56 sps:$4 sm:$0xff]   ;;  %v2128_v31 = vld [vmem:[%s2708_s1 + $0xf0] sm:$0xff]  }
  0x16   : > { %1908 = vmatpush3.bf16.msra.mxu1 %v2102_v5  ;;  %v2119_v24 = vld [vmem:[%s2708_s1] sm:$0xff]   ;;  %1305 = vmatprep.mubr.bf16.mxu1 %v2123_v23  ;;  %v2126_v29 = vld [vmem:[%s2708_s1 + $0xb8] sm:$0xff]   ;;  %v2131_v32 = vld [vmem:[%s2708_s1 + $0x110] sm:$0xff]   ;;  %v2271_v23 = vmov 0  }
  0x17   : > { %1909 = vmatprep.subr.bf16.mxu1 %v2103_v6  ;;  %v2130_v33 = vld [vmem:[%s2708_s1 + $0xb0] sm:$0xff]   ;;  %v2133_v34 = vld [vmem:[%s2708_s1 + $0x148] sm:$0xff]   ;;  %v2137_v38 = vld [vmem:[%s2708_s1 + $0x140] sm:$0xff]  }
  0x18   : > { %1964 = vmatpush3.bf16.msra.mxu0 %v2116_v17  ;;  %v2132_v35 = vld [vmem:[%s2708_s1 + $0xe8] sm:$0xff]   ;;  %v2136_v39 = vld [vmem:[%s2708_s1 + $0xe0] sm:$0xff]   ;;  %v2140_v42 = vld [vmem:[%s2708_s1 + $0xd8] sm:$0xff]  }
  0x19   : > { %1965 = vmatprep.subr.bf16.mxu0 %v2118_v19  ;;  %v2135_v36 = vld [vmem:[%s2708_s1 + $0x108] sm:$0xff]   ;;  %v2138_v40 = vld [vmem:[%s2708_s1 + $0xa0] sm:$0xff]   ;;  %v2144_v45 = vld [vmem:[%s2708_s1 + $0x278] sm:$0xff]  }
  0x1a   : > { %1910 = vmatpush3.bf16.msra.mxu1 %v2104_v8  ;;  %v2134_v37 = vld [vmem:[%s2708_s1 + $0xa8] sm:$0xff]   ;;  %v2139_v41 = vld [vmem:[%s2708_s1 + $0x100] sm:$0xff]   ;;  %v2145_v46 = vld [vmem:[%s2708_s1 + $0x98] sm:$0xff]  }
  0x1b   : > { %1911 = vmatprep.subr.bf16.mxu1 %v2105_v10  ;;  %v2141_v43 = vld [vmem:[%s2382_s12 + $0x10] ss:$56 sps:$4 sm:$0xff]   ;;  %v2143_v44 = vld [vmem:[%s2382_s12 + $0x14] ss:$56 sps:$4 sm:$0xff]   ;;  %v2146_v47 = vld [vmem:[%s2708_s1 + $0x238] sm:$0xff]  }
  0x1c   : > { %1966 = vmatpush3.bf16.msra.mxu0 %v2120_v21  ;;  %1403 = vmatprep.mubr.bf16.mxu0 %v2143_v44  ;;  %v2147_v48 = vld [vmem:[%s2382_s12 + $0x74] ss:$56 sps:$4 sm:$0xff]   ;;  %v2149_v49 = vld [vmem:[%s2382_s12 + $0x70] ss:$56 sps:$4 sm:$0xff]   ;;  %v2158_v58 = vld [vmem:[%s2708_s1 + $0xc0] sm:$0xff]  }
  0x1d   : > { %1967 = vmatprep.subr.bf16.mxu0 %v2125_v25  ;;  %v2150_v50 = vld [vmem:[%s2708_s1 + $0xd0] sm:$0xff]   ;;  %v2154_v54 = vld [vmem:[%s2708_s1 + $0xc8] sm:$0xff]   ;;  %v2159_v59 = vld [vmem:[%s2708_s1 + $0x260] sm:$0xff]  }
  0x1e   : > { %1912 = vmatpush3.bf16.msra.mxu1 %v2107_v12  ;;  %v2151_v51 = vld [vmem:[%s2708_s1 + $0x270] sm:$0xff]   ;;  %v2155_v55 = vld [vmem:[%s2708_s1 + $0x268] sm:$0xff]   ;;  %v2160_v60 = vld [vmem:[%s2708_s1 + $0x80] sm:$0xff]  }
  0x1f   : > { %1913 = vmatprep.subr.bf16.mxu1 %v2109_v14  ;;  %v2152_v52 = vld [vmem:[%s2708_s1 + $0x90] sm:$0xff]   ;;  %v2156_v56 = vld [vmem:[%s2708_s1 + $0x88] sm:$0xff]   ;;  %v2161_v61 = vld [vmem:[%s2708_s1 + $0x220] sm:$0xff]  }
  0x20   : > { %1968 = vmatpush3.bf16.msra.mxu0 %v2127_v28  ;;  %v2153_v53 = vld [vmem:[%s2708_s1 + $0x230] sm:$0xff]   ;;  %v2157_v57 = vld [vmem:[%s2708_s1 + $0x228] sm:$0xff]   ;;  %v2165_v0 = vld [vmem:[%s2708_s1 + $0x1f8] sm:$0xff]  }
  0x21   : > { %1969 = vmatprep.subr.bf16.mxu0 %v2129_v30  ;;  %v2162_v62 = vld [vmem:[%s2382_s12 + $0x8] ss:$56 sps:$4 sm:$0xff]   ;;  %v2164_v63 = vld [vmem:[%s2382_s12 + $0xc] ss:$56 sps:$4 sm:$0xff]   ;;  %v2166_v1 = vld [vmem:[%s2708_s1 + $0x258] sm:$0xff]  }
  0x22   : > { %1914 = vmatpush3.bf16.msra.mxu1 %v2111_v16  ;;  %v2167_v2 = vld [vmem:[%s2708_s1 + $0x1b8] sm:$0xff]   ;;  %v2169_v4 = vld [vmem:[%s2708_s1 + $0x1f0] sm:$0xff]   ;;  %v2178_v11 = vld [vmem:[%s2708_s1 + $0x1e8] sm:$0xff]  }
  0x23   : > { %1915 = vmatprep.subr.bf16.mxu1 %v2113_v18  ;;  %v2168_v3 = vld [vmem:[%s2708_s1 + $0x218] sm:$0xff]   ;;  %v2170_v5 = vld [vmem:[%s2708_s1 + $0x250] sm:$0xff]   ;;  %v2179_v12 = vld [vmem:[%s2708_s1 + $0x248] sm:$0xff]  }
  0x24   : > { %1970 = vmatpush3.bf16.msra.mxu0 %v2131_v32  ;;  %v2171_v6 = vld [vmem:[%s2708_s1 + $0x1b0] sm:$0xff]   ;;  %v2176_v10 = vld [vmem:[%s2382_s12 + $0x84] ss:$56 sps:$4 sm:$0xff]   ;;  %v2180_v13 = vld [vmem:[%s2382_s12 + $0x80] ss:$56 sps:$4 sm:$0xff]  }
  0x25   : > { %1971 = vmatprep.subr.bf16.mxu0 %v2133_v34  ;;  %v2172_v7 = vld [vmem:[%s2708_s1 + $0x210] sm:$0xff]   ;;  %v2181_v14 = vld [vmem:[%s2708_s1 + $0x1a8] sm:$0xff]   ;;  %v2183_v16 = vld [vmem:[%s2708_s1 + $0x1e0] sm:$0xff]  }
  0x26   : > { %1916 = vmatpush3.bf16.msra.mxu1 %v2115_v20  ;;  %v2173_v8 = vld [vmem:[%s2382_s12 + $0x7c] ss:$56 sps:$4 sm:$0xff]   ;;  %v2175_v9 = vld [vmem:[%s2382_s12 + $0x78] ss:$56 sps:$4 sm:$0xff]   ;;  %v2182_v15 = vld [vmem:[%s2708_s1 + $0x208] sm:$0xff]  }
  0x27   : > { %1917 = vmatprep.subr.bf16.mxu1 %v2117_v22  ;;  %v2184_v17 = vld [vmem:[%s2708_s1 + $0x240] sm:$0xff]   ;;  %v2187_v20 = vld [vmem:[%s2708_s1 + $0x1d8] sm:$0xff]   ;;  %v2195_v28 = vld [vmem:[%s2708_s1 + $0x330] sm:$0xff]  }
  0x28   : > { %1972 = vmatpush3.bf16.msra.mxu0 %v2135_v36  ;;  %v2185_v18 = vld [vmem:[%s2708_s1 + $0x1a0] sm:$0xff]   ;;  %v2192_v25 = vld [vmem:[%s2708_s1 + $0x338] sm:$0xff]   ;;  %v2197_v30 = vld [vmem:[%s2708_s1 + $0x188] sm:$0xff]  }
  0x29   : > { %1973 = vmatprep.subr.bf16.mxu0 %v2137_v38  ;;  %v2186_v19 = vld [vmem:[%s2708_s1 + $0x200] sm:$0xff]   ;;  %v2204_v36 = vld [vmem:[%s2382_s12 + $0x1c] ss:$56 sps:$4 sm:$0xff]  }
  0x2a   : > { %1918 = vmatpush3.bf16.msra.mxu1 %v2119_v24  ;;  %v2188_v21 = vld [vmem:[%s2382_s12 + $0x20] ss:$56 sps:$4 sm:$0xff]   ;;  %v2190_v22 = vld [vmem:[%s2382_s12 + $0x24] ss:$56 sps:$4 sm:$0xff]  }
  0x2b   : > { %1931 = vmatprep.subr.bf16.mxu1 %v2124_v27  ;;  %v2191_v24 = vld [vmem:[%s2708_s1 + $0x198] sm:$0xff]   ;;  %v2194_v27 = vld [vmem:[%s2708_s1 + $0x190] sm:$0xff]   ;;  %v2199_v32 = vld [vmem:[%s2708_s1 + $0x1c0] sm:$0xff]  }
  0x2c   : > { %1974 = vmatpush3.bf16.msra.mxu0 %v2139_v41  ;;  %v2201_v34 = vld [vmem:[%s2708_s1 + $0x320] sm:$0xff]   ;;  %v2206_v38 = vld [vmem:[%s2708_s1 + $0x2b8] sm:$0xff]   ;;  %v2209_v41 = vld [vmem:[%s2708_s1 + $0x2b0] sm:$0xff]  }
  0x2d   : > { %1306 = vmatmul.mubr.bf16.vlgmr.msra.gmra.mxu1 %v2121_v26  ;;  %2015 = vmatprep.subr.bf16.mxu0 %v2144_v45  ;;  %v2193_v26 = vld [vmem:[%s2708_s1 + $0x1d0] sm:$0xff]   ;;  %v2213_v44 = vld [vmem:[%s2382_s12 + $0x88] ss:$56 sps:$4 sm:$0xff]  }
  0x2e   : > { %1932 = vmatpush3.bf16.msra.mxu1 %v2126_v29  ;;  %1313 = vmatprep.mubr.bf16.mxu1 %v2147_v48  ;;  %v2196_v29 = vld [vmem:[%s2708_s1 + $0x1c8] sm:$0xff]  }
  0x2f   : > { %1933 = vmatprep.subr.bf16.mxu1 %v2128_v31  ;;  %1404 = vmatmul.mubr.bf16.vlgmr.msra.gmra.mxu0 %v2141_v43  ;;  %v2198_v31 = vld [vmem:[%s2708_s1 + $0x328] sm:$0xff]  }
  0x30   : > { %2016 = vmatpush3.bf16.msra.mxu0 %v2146_v47  ;;  %1411 = vmatprep.mubr.bf16.mxu0 %v2176_v10  ;;  %v2211_v43 = vld [vmem:[%s2382_s12 + $0x8c] ss:$56 sps:$4 sm:$0xff]  }
  0x31   : > { %2017 = vmatprep.subr.bf16.mxu0 %v2151_v51  ;;  %v2214_v45 = vld [vmem:[%s2708_s1 + $0x2e8] sm:$0xff]   ;;  %v2221_v51 = vld [vmem:[%s2708_s1 + $0x2a0] sm:$0xff]  }
  0x32   : > { %1934 = vmatpush3.bf16.msra.mxu1 %v2130_v33  ;;  %v2200_v33 = vld [vmem:[%s2708_s1 + $0x180] sm:$0xff]   ;;  %v2217_v47 = vld [vmem:[%s2708_s1 + $0x2a8] sm:$0xff]  }
  0x33   : > { %1935 = vmatprep.subr.bf16.mxu1 %v2132_v35  ;;  %v2202_v35 = vld [vmem:[%s2382_s12 + $0x18] ss:$56 sps:$4 sm:$0xff]   ;;  %v2218_v48 = vld [vmem:[%s2708_s1 + $0x308] sm:$0xff]  }
  0x34   : > { %2018 = vmatpush3.bf16.msra.mxu0 %v2153_v53  ;;  %v2223_v53 = vld [vmem:[%s2708_s1 + $0x2d8] sm:$0xff]  }
  0x35   : > { %1314 = vmatmul.mubr.bf16.gmra.mxu1 %v2149_v49  ;;  %2019 = vmatprep.subr.bf16.mxu0 %v2155_v55  ;;  %v2219_v49 = vld [vmem:[%s2382_s12 + $0x90] ss:$56 sps:$4 sm:$0xff]   ;;  %v2225_v55 = vld [vmem:[%s2708_s1 + $0x358] sm:$0xff]  }
  0x36   : > { %1936 = vmatpush3.bf16.msra.mxu1 %v2134_v37  ;;  %1354 = vmatprep.mubr.bf16.mxu1 %v2164_v63  ;;  %v2205_v37 = vld [vmem:[%s2708_s1 + $0x2f8] sm:$0xff]   ;;  %v2237_v63 = vld [vmem:[%s2382_s12 + $0x2c] ss:$56 sps:$4 sm:$0xff]  }
  0x37   : > { %1937 = vmatprep.subr.bf16.mxu1 %v2136_v39  ;;  %1412 = vmatmul.mubr.bf16.gmra.mxu0 %v2180_v13  ;;  %v2207_v39 = vld [vmem:[%s2708_s1 + $0x318] sm:$0xff]  }
  0x38   : > { %2020 = vmatpush3.bf16.msra.mxu0 %v2157_v57  ;;  %1501 = vmatprep.mubr.bf16.mxu0 %v2190_v22  ;;  %v2227_v57 = vld [vmem:[%s2708_s1 + $0x290] sm:$0xff]  }
  0x39   : > { %2021 = vmatprep.subr.bf16.mxu0 %v2159_v59  ;;  %v2229_v59 = vld [vmem:[%s2708_s1 + $0x2c8] sm:$0xff]  }
  0x3a   : > { %1938 = vmatpush3.bf16.msra.mxu1 %v2138_v40  ;;  %v2208_v40 = vld [vmem:[%s2708_s1 + $0x2f0] sm:$0xff]  }
  0x3b   : > { %1939 = vmatprep.subr.bf16.mxu1 %v2140_v42  ;;  %v2210_v42 = vld [vmem:[%s2708_s1 + $0x310] sm:$0xff]  }
  0x3c   : > { %2022 = vmatpush3.bf16.msra.mxu0 %v2161_v61  ;;  %v2231_v61 = vld [vmem:[%s2708_s1 + $0x348] sm:$0xff]  }
  0x3d   : > { %2023 = vmatprep.subr.bf16.mxu0 %v2166_v1  ;;  %v2233_v1 = vld [vmem:[%s2708_s1 + $0x280] sm:$0xff]  }
  0x3e   : > { %1940 = vmatpush3.bf16.msra.mxu1 %v2145_v46  ;;  %v2215_v46 = vld [vmem:[%s2382_s12 + $0x94] ss:$56 sps:$4 sm:$0xff]  }
  0x3f   : > { %1941 = vmatprep.subr.bf16.mxu1 %v2150_v50  ;;  %v2220_v50 = vld [vmem:[%s2708_s1 + $0x2e0] sm:$0xff]  }
  0x40   : > { %2024 = vmatpush3.bf16.msra.mxu0 %v2168_v3  ;;  %v2235_v3 = vld [vmem:[%s2382_s12 + $0x28] ss:$56 sps:$4 sm:$0xff]  }
  0x41   : > { %2025 = vmatprep.subr.bf16.mxu0 %v2170_v5  ;;  %v2241_v5 = vld [vmem:[%s2382_s12 + $0x9c] ss:$56 sps:$4 sm:$0xff]  }
  0x42   : > { %1942 = vmatpush3.bf16.msra.mxu1 %v2152_v52  ;;  %v2222_v52 = vld [vmem:[%s2708_s1 + $0x300] sm:$0xff]  }
  0x43   : > { %1943 = vmatprep.subr.bf16.mxu1 %v2154_v54  ;;  %v2224_v54 = vld [vmem:[%s2708_s1 + $0x298] sm:$0xff]  }
  0x44   : > { %2026 = vmatpush3.bf16.msra.mxu0 %v2172_v7  ;;  %v2245_v7 = vld [vmem:[%s2382_s12 + $0x98] ss:$56 sps:$4 sm:$0xff]  }
  0x45   : > { %2027 = vmatprep.subr.bf16.mxu0 %v2179_v12 }
  0x46   : > { %1944 = vmatpush3.bf16.msra.mxu1 %v2156_v56  ;;  %v2226_v56 = vld [vmem:[%s2708_s1 + $0x2d0] sm:$0xff]  }
  0x47   : > { %1945 = vmatprep.subr.bf16.mxu1 %v2158_v58  ;;  %v2228_v58 = vld [vmem:[%s2708_s1 + $0x350] sm:$0xff]  }
  0x48   : > { %2028 = vmatpush3.bf16.msra.mxu0 %v2182_v15 }
  0x49   : > { %2029 = vmatprep.subr.bf16.mxu0 %v2184_v17 }
  0x4a   : > { %1946 = vmatpush3.bf16.msra.mxu1 %v2160_v60  ;;  %v2230_v60 = vld [vmem:[%s2708_s1 + $0x288] sm:$0xff]  }
  0x4b   : > { %1987 = vmatprep.subr.bf16.mxu1 %v2165_v0  ;;  %v2240_v0 = vld [vmem:[%s2382_s12 + $0x34] ss:$56 sps:$4 sm:$0xff]  }
  0x4c   : > { %2030 = vmatpush3.bf16.msra.mxu0 %v2186_v19 }
  0x4d   : > { %1355 = vmatmul.mubr.bf16.vlgmr.msra.gmra.mxu1 %v2162_v62  ;;  %1567 = vmatprep.subr.bf16.mxu0 %v2271_v23  ;;  %v2232_v62 = vld [vmem:[%s2708_s1 + $0x2c0] sm:$0xff]  }
  0x4e   : > { %1988 = vmatpush3.bf16.msra.mxu1 %v2167_v2  ;;  %1362 = vmatprep.mubr.bf16.mxu1 %v2173_v8  ;;  %v2234_v2 = vld [vmem:[%s2708_s1 + $0x340] sm:$0xff]  }
  0x4f   : > { %1989 = vmatprep.subr.bf16.mxu1 %v2169_v4  ;;  %1502 = vmatmul.mubr.bf16.vlgmr.msra.gmra.mxu0 %v2188_v21  ;;  %v2238_v4 = vld [vmem:[%s2382_s12 + $0x30] ss:$56 sps:$4 sm:$0xff]   ;;  %v2246_v8 = vld [vmem:[%s2382_s12 + $0xa0] ss:$56 sps:$4 sm:$0xff]  }
  0x50   : > { %1568 = vmatpush1.bf16.msra.mxu0 %v2192_v25  ;;  %1509 = vmatprep.mubr.bf16.mxu0 %v2215_v46 }
  0x51   : > { %1569 = vmatprep.subr.bf16.mxu0 %v2271_v23 }
  0x52   : > { %1990 = vmatpush3.bf16.msra.mxu1 %v2171_v6  ;;  %v2243_v6 = vld [vmem:[%s2382_s12 + $0xa4] ss:$56 sps:$4 sm:$0xff]  }
  0x53   : > { %1991 = vmatprep.subr.bf16.mxu1 %v2178_v11 }
  0x54   : > { %1570 = vmatpush1.bf16.msra.mxu0 %v2195_v28 }
  0x55   : > { %1363 = vmatmul.mubr.bf16.gmra.mxu1 %v2175_v9  ;;  %1571 = vmatprep.subr.bf16.mxu0 %v2271_v23 }
  0x56   : > { %1992 = vmatpush3.bf16.msra.mxu1 %v2181_v14  ;;  %1452 = vmatprep.mubr.bf16.mxu1 %v2204_v36 }
  0x57   : > { %1993 = vmatprep.subr.bf16.mxu1 %v2183_v16  ;;  %1510 = vmatmul.mubr.bf16.gmra.mxu0 %v2219_v49 }
  0x58   : > { %1572 = vmatpush1.bf16.msra.mxu0 %v2198_v31  ;;  %1891 = vmatprep.mubr.msk.bf16.mxu0 %vm1266_vm0, %v2240_v0 }
  0x59   : > { %1573 = vmatprep.subr.bf16.mxu0 %v2271_v23 }
  0x5a   : > { %1994 = vmatpush3.bf16.msra.mxu1 %v2185_v18 }
  0x5b   : > { %1995 = vmatprep.subr.bf16.mxu1 %v2187_v20 }
  0x5c   : > { %1574 = vmatpush1.bf16.msra.mxu0 %v2201_v34 }
  0x5d   : > { %1575 = vmatprep.subr.bf16.mxu0 %v2271_v23 }
  0x5e   : > { %1996 = vmatpush3.bf16.msra.mxu1 %v2191_v24 }
  0x5f   : > { %1997 = vmatprep.subr.bf16.mxu1 %v2193_v26 }
  0x60   : > { %1576 = vmatpush1.bf16.msra.mxu0 %v2207_v39 }
  0x61   : > { %1577 = vmatprep.subr.bf16.mxu0 %v2271_v23 }
  0x62   : > { %1998 = vmatpush3.bf16.msra.mxu1 %v2194_v27 }
  0x63   : > { %1999 = vmatprep.subr.bf16.mxu1 %v2196_v29 }
  0x64   : > { %1578 = vmatpush1.bf16.msra.mxu0 %v2210_v42 }
  0x65   : > { %1579 = vmatprep.subr.bf16.mxu0 %v2271_v23 }
  0x66   : > { %2000 = vmatpush3.bf16.msra.mxu1 %v2197_v30 }
  0x67   : > { %2001 = vmatprep.subr.bf16.mxu1 %v2199_v32 }
  0x68   : > { %1580 = vmatpush1.bf16.msra.mxu0 %v2218_v48 }
  0x69   : > { %1581 = vmatprep.subr.bf16.mxu0 %v2271_v23 }
  0x6a   : > { %2002 = vmatpush3.bf16.msra.mxu1 %v2200_v33 }
  0x6b   : > { %2043 = vmatprep.subr.bf16.mxu1 %v2205_v37 }
  0x6c   : > { %1582 = vmatpush1.bf16.msra.mxu0 %v2222_v52 }
  0x6d   : > { %1453 = vmatmul.mubr.bf16.vlgmr.msra.gmra.mxu1 %v2202_v35  ;;  %1591 = vmatprep.subr.bf16.mxu0 %v2271_v23 }
  0x6e   : > { %2044 = vmatpush3.bf16.msra.mxu1 %v2206_v38  ;;  %1460 = vmatprep.mubr.bf16.mxu1 %v2211_v43 }
  0x6f   : > { %2045 = vmatprep.subr.bf16.mxu1 %v2208_v40 }
  0x70   : > { %1592 = vmatpush2.bf16.msra.mxu0 %v2225_v55 }
  0x71   : > { %1593 = vmatprep.subr.bf16.mxu0 %v2271_v23 }
  0x72   : > { %2046 = vmatpush3.bf16.msra.mxu1 %v2209_v41 }
  0x73   : > { %2047 = vmatprep.subr.bf16.mxu1 %v2214_v45 }
  0x74   : > { %1594 = vmatpush2.bf16.msra.mxu0 %v2228_v58 }
  0x75   : > { %1461 = vmatmul.mubr.bf16.gmra.mxu1 %v2213_v44  ;;  %1595 = vmatprep.subr.bf16.mxu0 %v2271_v23  ;;  %v1754_v44 = vld [vmem:[%s2709_s2] ss:$0 sm:$0xff] }
  0x76   : > { %2048 = vmatpush3.bf16.msra.mxu1 %v2217_v47  ;;  %1550 = vmatprep.mubr.bf16.mxu1 %v2237_v63 }
  0x77   : > { %2049 = vmatprep.subr.bf16.mxu1 %v2220_v50 }
  0x78   : > { %1596 = vmatpush2.bf16.msra.mxu0 %v2231_v61 }
  0x79   : > { %1597 = vmatprep.subr.bf16.mxu0 %v2271_v23 }
  0x7a   : > { %2050 = vmatpush3.bf16.msra.mxu1 %v2221_v51 }
  0x7b   : > { %2051 = vmatprep.subr.bf16.mxu1 %v2223_v53 }
  0x7c   : > { %1598 = vmatpush2.bf16.msra.mxu0 %v2234_v2 }
  0x7e   : > { %2052 = vmatpush3.bf16.msra.mxu1 %v2224_v54 }
  0x7f   : > { %2053 = vmatprep.subr.bf16.mxu1 %v2226_v56  ;;  %1600 = vmatmul.mubr.bf16.vlgmr.msra.gmra.mxu0 %v2238_v4 }
  0x80   : > { %1892 = vmatprep.mubr.msk.bf16.mxu0 %vm1266_vm0, %v2243_v6 }
  0x82   : > { %2054 = vmatpush3.bf16.msra.mxu1 %v2227_v57 }
  0x83   : > { %2055 = vmatprep.subr.bf16.mxu1 %v2229_v59 }
  0x86   : > { %2056 = vmatpush3.bf16.msra.mxu1 %v2230_v60 }
  0x87   : > { %2057 = vmatprep.subr.bf16.mxu1 %v2232_v62  ;;  %1608 = vmatmul.mubr.bf16.gmra.mxu0 %v2246_v8 }
  0x8a   : > { %2058 = vmatpush3.bf16.msra.mxu1 %v2233_v1 }
  0x8d   : > { %1551 = vmatmul.mubr.bf16.vlgmr.msra.gmra.mxu1 %v2235_v3 }
  0x8e   : > { %1558 = vmatprep.mubr.bf16.mxu1 %v2241_v5 }
  0x95   : > { %1559 = vmatmul.mubr.bf16.gmra.mxu1 %v2245_v7 }
  0xed   : > { %v1919_v9 = vpop.f32.mrf.mxu1 }
  0xef   : > { %v1920_v10 = vpop.f32.mrf.mxu1  ;;  %v1975_v18 = vpop.f32.mrf.mxu0 }
  0xf0   : > { %v1921_v42 = vadd.f32 %v1920_v10, %v1919_v9 }
  0xf1   : > { %v1922_v11 = vpop.f32.mrf.mxu1  ;;  %v1976_v20 = vpop.f32.mrf.mxu0 }
  0xf2   : > { %v1308_v47 = vadd.f32 %v1921_v42, %v1754_v44  ;;  %v1977_v55 = vadd.f32 %v1976_v20, %v1975_v18 }
  0xf3   : > { %v1923_v12 = vpop.f32.mrf.mxu1  ;;  %v1978_v22 = vpop.f32.mrf.mxu0 }
  0xf4   : > { %v1924_v48 = vadd.f32 %v1923_v12, %v1922_v11 }
  0xf5   : > { %v1925_v13 = vpop.f32.mrf.mxu1  ;;  %v1979_v24 = vpop.f32.mrf.mxu0 }
  0xf6   : > { %v1311_v54 = vadd.f32 %v1924_v48, %v1754_v44  ;;  %v1980_v63 = vadd.f32 %v1979_v24, %v1978_v22 }
  0xf7   : > { %v1926_v14 = vpop.f32.mrf.mxu1  ;;  %v1981_v26 = vpop.f32.mrf.mxu0 }
  0xf8   : > { %v1927_v52 = vadd.f32 %v1926_v14, %v1925_v13 }
  0xf9   : > { %v1928_v15 = vpop.f32.mrf.mxu1  ;;  %v1982_v28 = vpop.f32.mrf.mxu0 }
  0xfa   : > { %v1316_v61 = vadd.f32 %v1927_v52, %v1754_v44  ;;  %v1983_v5 = vadd.f32 %v1982_v28, %v1981_v26 }
  0xfb   : > { %v1929_v16 = vpop.f32.mrf.mxu1  ;;  %v1984_v30 = vpop.f32.mrf.mxu0 }
  0xfc   : > { %v1930_v0 = vadd.f32 %v1929_v16, %v1928_v15 }
  0xfd   : > { %v1985_v32 = vpop.f32.mrf.mxu0 }
  0xfe   : > { %v1319_v13 = vadd.f32 %v1930_v0, %v1754_v44 }
 0x10d   : > { %v1947_v17 = vpop.f32.mrf.mxu1 }
 0x10f   : > { %v1948_v19 = vpop.f32.mrf.mxu1  ;;  %v2031_v34 = vpop.f32.mrf.mxu0 }
 0x110   : > { %v1949_v45 = vadd.f32 %v1948_v19, %v1947_v17 }
 0x111   : > { %v1950_v21 = vpop.f32.mrf.mxu1  ;;  %v2032_v36 = vpop.f32.mrf.mxu0 }
 0x112   : > { %v1357_v50 = vadd.f32 %v1949_v45, %v1308_v47  ;;  %v2033_v8 = vadd.f32 %v2032_v36, %v2031_v34 }
 0x113   : > { %v1951_v23 = vpop.f32.mrf.mxu1  ;;  %v2034_v38 = vpop.f32.mrf.mxu0 }
 0x114   : > { %v1952_v51 = vadd.f32 %v1951_v23, %v1950_v21  ;;  %v1406_v60 = vadd.f32 %v1977_v55, %v1357_v50  ;;  %v1986_v21 = vadd.f32 %v1985_v32, %v1984_v30 }
 0x115   : > { %v1953_v25 = vpop.f32.mrf.mxu1  ;;  %v2035_v40 = vpop.f32.mrf.mxu0 }
 0x116   : > { %v1360_v59 = vadd.f32 %v1952_v51, %v1311_v54  ;;  %v2036_v22 = vadd.f32 %v2035_v40, %v2034_v38 }
 0x117   : > { %v1954_v27 = vpop.f32.mrf.mxu1  ;;  %v2037_v43 = vpop.f32.mrf.mxu0 }
 0x118   : > { %v1955_v58 = vadd.f32 %v1954_v27, %v1953_v25  ;;  %v1409_v9 = vadd.f32 %v1980_v63, %v1360_v59 }
 0x119   : > { %v1956_v29 = vpop.f32.mrf.mxu1  ;;  %v2038_v49 = vpop.f32.mrf.mxu0 }
 0x11a   : > { %v1365_v4 = vadd.f32 %v1955_v58, %v1316_v61  ;;  %v2039_v26 = vadd.f32 %v2038_v49, %v2037_v43 }
 0x11b   : > { %v1957_v31 = vpop.f32.mrf.mxu1  ;;  %v2040_v57 = vpop.f32.mrf.mxu0 }
 0x11c   : > { %v1958_v7 = vadd.f32 %v1957_v31, %v1956_v29  ;;  %v1414_v20 = vadd.f32 %v1983_v5, %v1365_v4 }
 0x11d   : > { %v2041_v3 = vpop.f32.mrf.mxu0 }
 0x11e   : > { %v1368_v16 = vadd.f32 %v1958_v7, %v1319_v13  ;;  %v2042_v44 = vadd.f32 %v2041_v3, %v2040_v57 }
 0x120   : > { %v1417_v36 = vadd.f32 %v1986_v21, %v1368_v16 }
 0x12d   : > { %v2003_v33 = vpop.f32.mrf.mxu1 }
 0x12f   : > { %v2004_v35 = vpop.f32.mrf.mxu1 }
 0x130   : > { %v2005_v56 = vadd.f32 %v2004_v35, %v2003_v33 }
 0x131   : > { %v2006_v37 = vpop.f32.mrf.mxu1 }
 0x132   : > { %v1455_v1 = vadd.f32 %v2005_v56, %v1406_v60 }
 0x133   : > { %v2007_v39 = vpop.f32.mrf.mxu1 }
 0x134   : > { %v2008_v2 = vadd.f32 %v2007_v39, %v2006_v37  ;;  %v1504_v17 = vadd.f32 %v2033_v8, %v1455_v1 }
 0x135   : > { %v2009_v41 = vpop.f32.mrf.mxu1 }
 0x136   : > { %v1458_v14 = vadd.f32 %v2008_v2, %v1409_v9 }
 0x137   : > { %v2010_v46 = vpop.f32.mrf.mxu1 }
 0x138   : > { %v2011_v11 = vadd.f32 %v2010_v46, %v2009_v41  ;;  %v1507_v31 = vadd.f32 %v2036_v22, %v1458_v14 }
 0x139   : > { %v2012_v53 = vpop.f32.mrf.mxu1 }
 0x13a   : > { %v1463_v25 = vadd.f32 %v2011_v11, %v1414_v20 }
 0x13b   : > { %v2013_v62 = vpop.f32.mrf.mxu1 }
 0x13c   : > { %v2014_v28 = vadd.f32 %v2013_v62, %v2012_v53  ;;  %v1512_v42 = vadd.f32 %v2039_v26, %v1463_v25 }
 0x13e   : > { %v1466_v32 = vadd.f32 %v2014_v28, %v1417_v36 }
 0x13f   : > { %v1601_v10 = vpop.f32.mrf.mxu0 }
 0x140   : > { %v1515_v51 = vadd.f32 %v2042_v44, %v1466_v32 }
 0x141   : > { %v1603_v19 = vpop.f32.mrf.mxu0 }
 0x143   : > { %v1604_v24 = vpop.f32.mrf.mxu0 }
 0x145   : > { %v1606_v34 = vpop.f32.mrf.mxu0 }
 0x147   : > { %v1609_v41 = vpop.f32.mrf.mxu0 }
 0x149   : > { %v1611_v45 = vpop.f32.mrf.mxu0 }
 0x14b   : > { %v1612_v49 = vpop.f32.mrf.mxu0 }
 0x14d   : > { %v2059_v6 = vpop.f32.mrf.mxu1  ;;  %v1614_v55 = vpop.f32.mrf.mxu0 }
 0x14f   : > { %v2060_v12 = vpop.f32.mrf.mxu1 }
 0x150   : > { %v2061_v18 = vadd.f32 %v2060_v12, %v2059_v6 }
 0x151   : > { %v2062_v15 = vpop.f32.mrf.mxu1 }
 0x152   : > { %v1553_v23 = vadd.f32 %v2061_v18, %v1504_v17 }
 0x153   : > { %v2063_v27 = vpop.f32.mrf.mxu1 }
 0x154   : > { %v1602_v29 = vadd.f32 %v1601_v10, %v1553_v23  ;;  %v2064_v33 = vadd.f32 %v2063_v27, %v2062_v15 }
 0x155   : > { %v2065_v35 = vpop.f32.mrf.mxu1 }
 0x156   : > { %v1616_v37 = vmax.f32 %v1602_v29, 0.0  ;;  %v1556_v39 = vadd.f32 %v2064_v33, %v1507_v31 }
 0x157   : > { %v2066_v30 = vpop.f32.mrf.mxu1 }
 0x158   : > { %v1899_v38 = vpack.c.bf16 %v1616_v37, %v1616_v37  ;;  %v1605_v40 = vadd.f32 %v1604_v24, %v1556_v39  ;;  %v2067_v43 = vadd.f32 %v2066_v30, %v2065_v35 }
 0x159   : > { %v2068_v46 = vpop.f32.mrf.mxu1 }
 0x15a   : > { %1637 = vst.msk [vmem:[%s226_s18] sm:$0xf] %vm1636_vm1, %v1899_v38  ;;  %v1617_v47 = vmax.f32 %v1605_v40, 0.0  ;;  %v1561_v48 = vadd.f32 %v2067_v43, %v1512_v42 }
 0x15b   : > { %v2069_v50 = vpop.f32.mrf.mxu1 }
 0x15c   : > { %v1900_v52 = vpack.c.bf16 %v1617_v47, %v1617_v47  ;;  %v1610_v53 = vadd.f32 %v1609_v41, %v1561_v48  ;;  %v2070_v54 = vadd.f32 %v2069_v50, %v2068_v46 }
 0x15e   : > { %1638 = vst.msk [vmem:[%s226_s18 + $0x4] sm:$0xf] %vm1636_vm1, %v1900_v52  ;;  %v1618_v56 = vmax.f32 %v1610_v53, 0.0  ;;  %v1564_v57 = vadd.f32 %v2070_v54, %v1515_v51 }
 0x160   : > { %v1901_v58 = vpack.c.bf16 %v1618_v56, %v1618_v56  ;;  %v1613_v59 = vadd.f32 %v1612_v49, %v1564_v57 }
 0x162   : > { %1639 = vst.msk [vmem:[%s226_s18 + $0x8] sm:$0xf] %vm1636_vm1, %v1901_v58  ;;  %v1619_v60 = vmax.f32 %v1613_v59, 0.0 }
 0x164   : > { %v1902_v61 = vpack.c.bf16 %v1619_v60, %v1619_v60 }
 0x166   : > { %1640 = vst.msk [vmem:[%s226_s18 + $0xc] sm:$0xf] %vm1636_vm1, %v1902_v61 }
 0x167 PF: > { %s13_s14 = sadd.s32 1, %s2269_s14   ;;  %s2711_s12 = smov %s2265_s13 }
 0x168   : > { %p10_p5 = scmp.ge.s32.totalorder %s13_s14, 4   ;;  %s2712_s13 = smov %s2714_s15 }
 0x16a   :  { %12 = sbr.rel (!%p10_p5) target bundleno = 2 (0x2), region = 68 }

// kernel: hourglass_forward.10
= control target key start
LH: loop header
LB: loop body
LE: loop exit
PB: predicated region body
PF: predicated region fallthrough
CT: control target
= control target key end

     0   :  { %s1755_s18 = smov 0   ;;  %s1757_s19 = smov 0   ;;  %s2109_s0 = inlined_call_operand.vmem [shape: bf16[64,512], index: 0, kind: input, shape index: {}]   ;;  %s2110_s1 = inlined_call_operand.vmem [shape: bf16[512,256], index: 1, kind: input, shape index: {}]   ;;  %s2111_s2 = inlined_call_operand.vmem [shape: bf16[64,256], index: 2, kind: input, shape index: {}]   ;;  %s2112_s3 = inlined_call_operand.vmem [shape: bf16[256,256], index: 3, kind: input, shape index: {}]   ;;  %s2113_s4 = inlined_call_operand.vmem [shape: f32[1,256], index: 4, kind: input, shape index: {}]   ;;  %s2114_s5 = inlined_call_operand.vmem [shape: bf16[64,256], index: 5, kind: output, shape index: {}]  }
   0x1   :  { %s1759_s20 = smov 0  }
   0x2 LB: > { %s27_s21 = sadd.s32 1, %s1719_s19  ;;  %p1352_p0 = scmp.ge.s32.totalorder %s1723_s20, 1  ;;  %s1723_s20 = sphi %s1759_s20, %s15_s20   ;;  %s1719_s19 = sphi %s1757_s19, %s2116_s19   ;;  %s1715_s18 = sphi %s1755_s18, %s2115_s18  }
   0x3   : > { %p29_p1 = scmp.ge.s32.totalorder %s27_s21, 2  ;;  %p247_p2 = scmp.lt.s32.totalorder %s1723_s20, 3 }
   0x5   : > { %s2118_s21 = smov (%p29_p1, %s27_s21), 0  ;;  %p248_p3 = pnand %p1352_p0, %p247_p2 }
   0x6   : > { %s1353_s15 = sshll.u32 (!%p248_p3), %s1715_s18, 2 }
   0x7   : > { %251 = sbr.rel (%p248_p3) target bundleno = 350 (0x15e), region = 40  ;;  %p302_p4 = scmp.lt.s32.totalorder (!%p248_p3), %s1353_s15, 7 }
   0xc   : > { %v1539_v0 = vld [vmem:[%s2112_s3 + $0x74] ss:$8 sps:$4 sm:$0xff]   ;;  %v1543_v2 = vld [vmem:[%s2112_s3 + $0x70] ss:$8 sps:$4 sm:$0xff]   ;;  %v1545_v4 = vld [vmem:[%s2112_s3 + $0x64] ss:$8 sps:$4 sm:$0xff]  }
   0xd   : > { %v1541_v1 = vld [vmem:[%s2110_s1 + $0x74] ss:$8 sps:$4 sm:$0xff]   ;;  %632 = vmatprep.subr.bf16.mxu0 %v1539_v0  ;;  %v1544_v3 = vld [vmem:[%s2110_s1 + $0x70] ss:$8 sps:$4 sm:$0xff]   ;;  %v1547_v5 = vld [vmem:[%s2110_s1 + $0x64] ss:$8 sps:$4 sm:$0xff]  }
   0xe   : > { %1045 = vmatprep.subr.bf16.mxu1 %v1541_v1  ;;  %633 = vmatpush1.bf16.msra.mxu0 %v1543_v2  ;;  %v1549_v6 = vld [vmem:[%s2112_s3 + $0x60] ss:$8 sps:$4 sm:$0xff]   ;;  %v1551_v8 = vld [vmem:[%s2112_s3 + $0x54] ss:$8 sps:$4 sm:$0xff]   ;;  %v1555_v10 = vld [vmem:[%s2112_s3 + $0x50] ss:$8 sps:$4 sm:$0xff]  }
   0xf   : > { %1046 = vmatpush1.bf16.msra.mxu1 %v1544_v3  ;;  %634 = vmatprep.subr.bf16.mxu0 %v1545_v4  ;;  %v1550_v7 = vld [vmem:[%s2110_s1 + $0x60] ss:$8 sps:$4 sm:$0xff]   ;;  %v1553_v9 = vld [vmem:[%s2110_s1 + $0x54] ss:$8 sps:$4 sm:$0xff]   ;;  %v1556_v11 = vld [vmem:[%s2110_s1 + $0x50] ss:$8 sps:$4 sm:$0xff]  }
  0x10   : > { %1047 = vmatprep.subr.bf16.mxu1 %v1547_v5  ;;  %v1557_v12 = vld [vmem:[%s2112_s3 + $0x44] ss:$8 sps:$4 sm:$0xff]   ;;  %v1561_v14 = vld [vmem:[%s2112_s3 + $0x40] ss:$8 sps:$4 sm:$0xff]   ;;  %v1563_v16 = vld [vmem:[%s2112_s3 + $0x34] ss:$8 sps:$4 sm:$0xff]  }
  0x11   : > { %v1559_v13 = vld [vmem:[%s2110_s1 + $0x44] ss:$8 sps:$4 sm:$0xff]   ;;  %v1562_v15 = vld [vmem:[%s2110_s1 + $0x40] ss:$8 sps:$4 sm:$0xff]   ;;  %v1565_v17 = vld [vmem:[%s2110_s1 + $0x34] ss:$8 sps:$4 sm:$0xff]  }
  0x12   : > { %635 = vmatpush1.bf16.msra.mxu0 %v1549_v6  ;;  %v1567_v18 = vld [vmem:[%s2112_s3 + $0x30] ss:$8 sps:$4 sm:$0xff]   ;;  %v1569_v20 = vld [vmem:[%s2112_s3 + $0x24] ss:$8 sps:$4 sm:$0xff]   ;;  %v1573_v22 = vld [vmem:[%s2112_s3 + $0x20] ss:$8 sps:$4 sm:$0xff]  }
  0x13   : > { %1048 = vmatpush1.bf16.msra.mxu1 %v1550_v7  ;;  %636 = vmatprep.subr.bf16.mxu0 %v1551_v8  ;;  %v1568_v19 = vld [vmem:[%s2110_s1 + $0x30] ss:$8 sps:$4 sm:$0xff]   ;;  %v1571_v21 = vld [vmem:[%s2110_s1 + $0x24] ss:$8 sps:$4 sm:$0xff]   ;;  %v1574_v23 = vld [vmem:[%s2110_s1 + $0x20] ss:$8 sps:$4 sm:$0xff]  }
  0x14   : > { %1049 = vmatprep.subr.bf16.mxu1 %v1553_v9  ;;  %v1575_v24 = vld [vmem:[%s2112_s3 + $0x14] ss:$8 sps:$4 sm:$0xff]   ;;  %v1579_v26 = vld [vmem:[%s2112_s3 + $0x10] ss:$8 sps:$4 sm:$0xff]   ;;  %v1581_v28 = vld [vmem:[%s2112_s3 + $0x4] ss:$8 sps:$4 sm:$0xff]  }
  0x15   : > { %v1577_v25 = vld [vmem:[%s2110_s1 + $0x14] ss:$8 sps:$4 sm:$0xff]   ;;  %v1580_v27 = vld [vmem:[%s2110_s1 + $0x10] ss:$8 sps:$4 sm:$0xff]   ;;  %v1583_v29 = vld [vmem:[%s2110_s1 + $0x4] ss:$8 sps:$4 sm:$0xff]  }
  0x16   : > { %637 = vmatpush1.bf16.msra.mxu0 %v1555_v10  ;;  %v1585_v30 = vld [vmem:[%s2112_s3] ss:$8 sps:$4 sm:$0xff]   ;;  %v1587_v32 = vld [vmem:[%s2112_s3 + $0xf4] ss:$8 sps:$4 sm:$0xff]   ;;  %v1591_v34 = vld [vmem:[%s2112_s3 + $0xf0] ss:$8 sps:$4 sm:$0xff]  }
  0x17   : > { %1050 = vmatpush1.bf16.msra.mxu1 %v1556_v11  ;;  %638 = vmatprep.subr.bf16.mxu0 %v1557_v12  ;;  %v1586_v31 = vld [vmem:[%s2110_s1] ss:$8 sps:$4 sm:$0xff]   ;;  %v1589_v33 = vld [vmem:[%s2110_s1 + $0xf4] ss:$8 sps:$4 sm:$0xff]   ;;  %v1592_v35 = vld [vmem:[%s2110_s1 + $0xf0] ss:$8 sps:$4 sm:$0xff]  }
  0x18   : > { %1051 = vmatprep.subr.bf16.mxu1 %v1559_v13  ;;  %v1593_v36 = vld [vmem:[%s2112_s3 + $0xe4] ss:$8 sps:$4 sm:$0xff]   ;;  %s2120_s15 = smov (!%p302_p4, %s1353_s15), 7  ;;  %v1597_v38 = vld [vmem:[%s2112_s3 + $0xe0] ss:$8 sps:$4 sm:$0xff]  }
  0x19   : > { %v1595_v37 = vld [vmem:[%s2110_s1 + $0xe4] ss:$8 sps:$4 sm:$0xff]   ;;  %v1598_v39 = vld [vmem:[%s2110_s1 + $0xe0] ss:$8 sps:$4 sm:$0xff]   ;;  %v1599_v40 = vld [vmem:[%s2112_s3 + $0xd4] ss:$8 sps:$4 sm:$0xff]  }
  0x1a   : > { %639 = vmatpush1.bf16.msra.mxu0 %v1561_v14  ;;  %v1601_v41 = vld [vmem:[%s2110_s1 + $0xd4] ss:$8 sps:$4 sm:$0xff]   ;;  %s1477_s23 = sshll.u32 %s2120_s15, 3  ;;  %v1603_v42 = vld [vmem:[%s2112_s3 + $0xd0] ss:$8 sps:$4 sm:$0xff]   ;;  %s1476_s18 = sshll.u32 %s2120_s15, 4 }
  0x1b   : > { %1052 = vmatpush1.bf16.msra.mxu1 %v1562_v15  ;;  %640 = vmatprep.subr.bf16.mxu0 %v1563_v16  ;;  %v1604_v43 = vld [vmem:[%s2110_s1 + $0xd0] ss:$8 sps:$4 sm:$0xff]   ;;  %v1605_v44 = vld [vmem:[%s2112_s3 + $0xc4] ss:$8 sps:$4 sm:$0xff]   ;;  %s1920_s7 = scalar_lea.vmem %s2111_s2, %s1477_s23  ;;  %v1609_v46 = vld [vmem:[%s2112_s3 + $0xc0] ss:$8 sps:$4 sm:$0xff]   ;;  %s1934_s17 = scalar_lea.vmem %s2109_s0, %s1476_s18 }
  0x1c   : > { %1053 = vmatprep.subr.bf16.mxu1 %v1565_v17  ;;  %v1607_v45 = vld [vmem:[%s2110_s1 + $0xc4] ss:$8 sps:$4 sm:$0xff]   ;;  %v1610_v47 = vld [vmem:[%s2110_s1 + $0xc0] ss:$8 sps:$4 sm:$0xff]   ;;  %v1611_v48 = vld [vmem:[%s2112_s3 + $0xb4] ss:$8 sps:$4 sm:$0xff]   ;;  %s341_s18 = scalar_lea.vmem %s2114_s5, %s1477_s23 }
  0x1d   : > { %v1637_v49 = vld [vmem:[%s1920_s7 + $0x4] ss:$8 sps:$4 sm:$0xff]   ;;  %v1613_v50 = vld [vmem:[%s2110_s1 + $0xb4] ss:$8 sps:$4 sm:$0xff]   ;;  %v1615_v52 = vld [vmem:[%s2112_s3 + $0xb0] ss:$8 sps:$4 sm:$0xff]  }
  0x1e   : > { %641 = vmatpush1.bf16.msra.mxu0 %v1567_v18  ;;  %v1640_v51 = vld [vmem:[%s1934_s17 + $0x4] ss:$16 sps:$4 sm:$0xff]   ;;  %664 = vmatprep.mubr.bf16.mxu0 %v1637_v49  ;;  %v1616_v53 = vld [vmem:[%s2110_s1 + $0xb0] ss:$8 sps:$4 sm:$0xff]   ;;  %v1621_v56 = vld [vmem:[%s2112_s3 + $0xa0] ss:$8 sps:$4 sm:$0xff]  }
  0x1f   : > { %1054 = vmatpush1.bf16.msra.mxu1 %v1568_v19  ;;  %642 = vmatprep.subr.bf16.mxu0 %v1569_v20  ;;  %v1617_v54 = vld [vmem:[%s2112_s3 + $0xa4] ss:$8 sps:$4 sm:$0xff]   ;;  %v1622_v57 = vld [vmem:[%s2110_s1 + $0xa0] ss:$8 sps:$4 sm:$0xff]   ;;  %v1623_v58 = vld [vmem:[%s2112_s3 + $0x94] ss:$8 sps:$4 sm:$0xff]  }
  0x20   : > { %1055 = vmatprep.subr.bf16.mxu1 %v1571_v21  ;;  %1077 = vmatprep.mubr.bf16.mxu1 %v1640_v51  ;;  %v1619_v55 = vld [vmem:[%s2110_s1 + $0xa4] ss:$8 sps:$4 sm:$0xff]   ;;  %v1625_v59 = vld [vmem:[%s2110_s1 + $0x94] ss:$8 sps:$4 sm:$0xff]   ;;  %v1627_v60 = vld [vmem:[%s2112_s3 + $0x90] ss:$8 sps:$4 sm:$0xff]  }
  0x21   : > { %v1628_v61 = vld [vmem:[%s2110_s1 + $0x90] ss:$8 sps:$4 sm:$0xff]   ;;  %v1629_v62 = vld [vmem:[%s2112_s3 + $0x84] ss:$8 sps:$4 sm:$0xff]   ;;  %v1633_v0 = vld [vmem:[%s2112_s3 + $0x80] ss:$8 sps:$4 sm:$0xff]  }
  0x22   : > { %643 = vmatpush1.bf16.msra.mxu0 %v1573_v22  ;;  %v1631_v63 = vld [vmem:[%s2110_s1 + $0x84] ss:$8 sps:$4 sm:$0xff]   ;;  %v1634_v1 = vld [vmem:[%s2110_s1 + $0x80] ss:$8 sps:$4 sm:$0xff]   ;;  %v1643_v2 = vld [vmem:[%s2110_s1 + $0x174] ss:$8 sps:$4 sm:$0xff]  }
  0x23   : > { %1056 = vmatpush1.bf16.msra.mxu1 %v1574_v23  ;;  %644 = vmatprep.subr.bf16.mxu0 %v1575_v24  ;;  %v1635_v3 = vld [vmem:[%s1920_s7] ss:$8 sps:$4 sm:$0xff]   ;;  %v1641_v5 = vld [vmem:[%s2110_s1 + $0x170] ss:$8 sps:$4 sm:$0xff]   ;;  %v1646_v6 = vld [vmem:[%s2110_s1 + $0x164] ss:$8 sps:$4 sm:$0xff]  }
  0x24   : > { %1057 = vmatprep.subr.bf16.mxu1 %v1577_v25  ;;  %v1638_v4 = vld [vmem:[%s1934_s17] ss:$16 sps:$4 sm:$0xff]   ;;  %v1680_v7 = vld [vmem:[%s1920_s7 + $0x14] ss:$8 sps:$4 sm:$0xff]   ;;  %v1652_v14 = vld [vmem:[%s2110_s1 + $0x144] ss:$8 sps:$4 sm:$0xff]  }
  0x25   : > { %v1682_v8 = vld [vmem:[%s1934_s17 + $0x24] ss:$16 sps:$4 sm:$0xff]   ;;  %v1644_v9 = vld [vmem:[%s2110_s1 + $0x160] ss:$8 sps:$4 sm:$0xff]   ;;  %v1684_v11 = vld [vmem:[%s1920_s7 + $0x10] ss:$8 sps:$4 sm:$0xff]  }
  0x26   : > { %645 = vmatpush1.bf16.msra.mxu0 %v1579_v26  ;;  %v1649_v10 = vld [vmem:[%s2110_s1 + $0x154] ss:$8 sps:$4 sm:$0xff]   ;;  %v1685_v12 = vld [vmem:[%s1934_s17 + $0x20] ss:$16 sps:$4 sm:$0xff]   ;;  %v1658_v20 = vld [vmem:[%s2110_s1 + $0x124] ss:$8 sps:$4 sm:$0xff]  }
  0x27   : > { %1058 = vmatpush1.bf16.msra.mxu1 %v1580_v27  ;;  %646 = vmatprep.subr.bf16.mxu0 %v1581_v28  ;;  %v1647_v13 = vld [vmem:[%s2110_s1 + $0x150] ss:$8 sps:$4 sm:$0xff]   ;;  %v1697_v15 = vld [vmem:[%s1934_s17 + $0xc] ss:$16 sps:$4 sm:$0xff]   ;;  %v1650_v17 = vld [vmem:[%s2110_s1 + $0x140] ss:$8 sps:$4 sm:$0xff]  }
  0x28   : > { %1059 = vmatprep.subr.bf16.mxu1 %v1583_v29  ;;  %v1700_v16 = vld [vmem:[%s1934_s17 + $0x2c] ss:$16 sps:$4 sm:$0xff]   ;;  %v1653_v19 = vld [vmem:[%s2110_s1 + $0x130] ss:$8 sps:$4 sm:$0xff]   ;;  %v1656_v21 = vld [vmem:[%s2110_s1 + $0x120] ss:$8 sps:$4 sm:$0xff]  }
  0x29   : > { %v1655_v18 = vld [vmem:[%s2110_s1 + $0x134] ss:$8 sps:$4 sm:$0xff]   ;;  %v1659_v23 = vld [vmem:[%s2110_s1 + $0x110] ss:$8 sps:$4 sm:$0xff]   ;;  %v1664_v24 = vld [vmem:[%s2110_s1 + $0x104] ss:$8 sps:$4 sm:$0xff]  }
  0x2a   : > { %647 = vmatpush1.bf16.msra.mxu0 %v1585_v30  ;;  %v1661_v22 = vld [vmem:[%s2110_s1 + $0x114] ss:$8 sps:$4 sm:$0xff]   ;;  %v1662_v25 = vld [vmem:[%s2110_s1 + $0x100] ss:$8 sps:$4 sm:$0xff]   ;;  %v1665_v27 = vld [vmem:[%s2110_s1 + $0x1f0] ss:$8 sps:$4 sm:$0xff]  }
  0x2b   : > { %1060 = vmatpush1.bf16.msra.mxu1 %v1586_v31  ;;  %648 = vmatprep.subr.bf16.mxu0 %v1587_v32  ;;  %v1667_v26 = vld [vmem:[%s2110_s1 + $0x1f4] ss:$8 sps:$4 sm:$0xff]   ;;  %v1670_v28 = vld [vmem:[%s2110_s1 + $0x1e4] ss:$8 sps:$4 sm:$0xff]   ;;  %v1668_v29 = vld [vmem:[%s2110_s1 + $0x1e0] ss:$8 sps:$4 sm:$0xff]  }
  0x2c   : > { %1061 = vmatprep.subr.bf16.mxu1 %v1589_v33  ;;  %v1673_v30 = vld [vmem:[%s2110_s1 + $0x1d4] ss:$8 sps:$4 sm:$0xff]   ;;  %v1671_v31 = vld [vmem:[%s2110_s1 + $0x1d0] ss:$8 sps:$4 sm:$0xff]   ;;  %v1676_v32 = vld [vmem:[%s2110_s1 + $0x1c4] ss:$8 sps:$4 sm:$0xff]  }
  0x2d   : > { %v1674_v33 = vld [vmem:[%s2110_s1 + $0x1c0] ss:$8 sps:$4 sm:$0xff]  }
  0x2e   : > { %649 = vmatpush2.bf16.msra.mxu0 %v1591_v34  ;;  %v1679_v34 = vld [vmem:[%s2110_s1 + $0x1b4] ss:$8 sps:$4 sm:$0xff]  }
  0x2f   : > { %1062 = vmatpush2.bf16.msra.mxu1 %v1592_v35  ;;  %650 = vmatprep.subr.bf16.mxu0 %v1593_v36  ;;  %v1677_v35 = vld [vmem:[%s2110_s1 + $0x1b0] ss:$8 sps:$4 sm:$0xff]   ;;  %v1688_v36 = vld [vmem:[%s2110_s1 + $0x1a4] ss:$8 sps:$4 sm:$0xff]  }
  0x30   : > { %1063 = vmatprep.subr.bf16.mxu1 %v1595_v37  ;;  %v1686_v37 = vld [vmem:[%s2110_s1 + $0x1a0] ss:$8 sps:$4 sm:$0xff]  }
  0x32   : > { %651 = vmatpush2.bf16.msra.mxu0 %v1597_v38  ;;  %v1691_v38 = vld [vmem:[%s2110_s1 + $0x194] ss:$8 sps:$4 sm:$0xff]  }
  0x33   : > { %1064 = vmatpush2.bf16.msra.mxu1 %v1598_v39  ;;  %652 = vmatprep.subr.bf16.mxu0 %v1599_v40  ;;  %v1689_v39 = vld [vmem:[%s2110_s1 + $0x190] ss:$8 sps:$4 sm:$0xff]   ;;  %v1694_v40 = vld [vmem:[%s2110_s1 + $0x184] ss:$8 sps:$4 sm:$0xff]  }
  0x34   : > { %1065 = vmatprep.subr.bf16.mxu1 %v1601_v41  ;;  %v1692_v41 = vld [vmem:[%s2110_s1 + $0x180] ss:$8 sps:$4 sm:$0xff]  }
  0x36   : > { %653 = vmatpush2.bf16.msra.mxu0 %v1603_v42  ;;  %v1695_v42 = vld [vmem:[%s1934_s17 + $0x8] ss:$16 sps:$4 sm:$0xff]  }
  0x37   : > { %1066 = vmatpush2.bf16.msra.mxu1 %v1604_v43  ;;  %654 = vmatprep.subr.bf16.mxu0 %v1605_v44  ;;  %v1698_v43 = vld [vmem:[%s1934_s17 + $0x28] ss:$16 sps:$4 sm:$0xff]  }
  0x38   : > { %1067 = vmatprep.subr.bf16.mxu1 %v1607_v45 }
  0x3a   : > { %655 = vmatpush2.bf16.msra.mxu0 %v1609_v46 }
  0x3b   : > { %1068 = vmatpush2.bf16.msra.mxu1 %v1610_v47  ;;  %656 = vmatprep.subr.bf16.mxu0 %v1611_v48 }
  0x3c   : > { %1069 = vmatprep.subr.bf16.mxu1 %v1613_v50 }
  0x3e   : > { %657 = vmatpush2.bf16.msra.mxu0 %v1615_v52 }
  0x3f   : > { %1070 = vmatpush2.bf16.msra.mxu1 %v1616_v53  ;;  %658 = vmatprep.subr.bf16.mxu0 %v1617_v54  ;;  %v1153_v54 = vlaneseq }
  0x40   : > { %1071 = vmatprep.subr.bf16.mxu1 %v1619_v55 }
  0x42   : > { %659 = vmatpush2.bf16.msra.mxu0 %v1621_v56 }
  0x43   : > { %1072 = vmatpush2.bf16.msra.mxu1 %v1622_v57  ;;  %660 = vmatprep.subr.bf16.mxu0 %v1623_v58  ;;  %v1154_v57 = vshrl.u32 %v1153_v54, 7 }
  0x44   : > { %1073 = vmatprep.subr.bf16.mxu1 %v1625_v59 }
  0x46   : > { %661 = vmatpush2.bf16.msra.mxu0 %v1627_v60  ;;  %v1155_v60 = vsub.s32 0, %v1154_v57 }
  0x47   : > { %1074 = vmatpush2.bf16.msra.mxu1 %v1628_v61  ;;  %662 = vmatprep.subr.bf16.mxu0 %v1629_v62  ;;  %v1151_v61 = vld [vmem:[%s2113_s4] sm:$0x3]  ;;  %v1159_v62 = vsub.s32 1, %v1154_v57 }
  0x48   : > { %1075 = vmatprep.subr.bf16.mxu1 %v1631_v63 }
  0x4a   : > { %663 = vmatpush2.bf16.msra.mxu0 %v1633_v0 }
  0x4b   : > { %1076 = vmatpush2.bf16.msra.mxu1 %v1634_v1  ;;  %1098 = vmatprep.subr.bf16.mxu0 %v1643_v2 }
  0x4c   : > { %1483 = vmatprep.subr.bf16.mxu1 %v1643_v2  ;;  %v1156_v2 = vrot.slane %v1151_v61, %v1155_v60 }
  0x4d   : > { %665 = vmatmul.mubr.bf16.vlgmr.msra.gmra.mxu0 %v1635_v3 }
  0x4e   : > { %1078 = vmatmul.mubr.bf16.vlgmr.msra.gmra.mxu1 %v1638_v4  ;;  %1099 = vmatpush1.bf16.msra.mxu0 %v1641_v5 }
  0x4f   : > { %1499 = vmatpush1.bf16.msra.mxu1 %v1641_v5  ;;  %1100 = vmatprep.subr.bf16.mxu0 %v1646_v6 }
  0x50   : > { %1484 = vmatprep.subr.bf16.mxu1 %v1646_v6  ;;  %674 = vmatprep.mubr.bf16.mxu0 %v1680_v7 }
  0x51   : > { %1087 = vmatprep.mubr.bf16.mxu1 %v1682_v8  ;;  %v1160_v8 = vrot.slane %v1151_v61, %v1159_v62 }
  0x52   : > { %1101 = vmatpush1.bf16.msra.mxu0 %v1644_v9 }
  0x53   : > { %1500 = vmatpush1.bf16.msra.mxu1 %v1644_v9  ;;  %1102 = vmatprep.subr.bf16.mxu0 %v1649_v10 }
  0x54   : > { %1485 = vmatprep.subr.bf16.mxu1 %v1649_v10 }
  0x55   : > { %675 = vmatmul.mubr.bf16.gmra.mxu0 %v1684_v11 }
  0x56   : > { %1088 = vmatmul.mubr.bf16.gmra.mxu1 %v1685_v12  ;;  %1103 = vmatpush1.bf16.msra.mxu0 %v1647_v13 }
  0x57   : > { %1501 = vmatpush1.bf16.msra.mxu1 %v1647_v13  ;;  %1104 = vmatprep.subr.bf16.mxu0 %v1652_v14 }
  0x58   : > { %1486 = vmatprep.subr.bf16.mxu1 %v1652_v14  ;;  %1130 = vmatprep.mubr.bf16.mxu0 %v1697_v15 }
  0x59   : > { %1140 = vmatprep.mubr.bf16.mxu1 %v1700_v16 }
  0x5a   : > { %1105 = vmatpush1.bf16.msra.mxu0 %v1650_v17 }
  0x5b   : > { %1502 = vmatpush1.bf16.msra.mxu1 %v1650_v17  ;;  %1106 = vmatprep.subr.bf16.mxu0 %v1655_v18 }
  0x5c   : > { %1487 = vmatprep.subr.bf16.mxu1 %v1655_v18 }
  0x5e   : > { %1107 = vmatpush1.bf16.msra.mxu0 %v1653_v19 }
  0x5f   : > { %1503 = vmatpush1.bf16.msra.mxu1 %v1653_v19  ;;  %1108 = vmatprep.subr.bf16.mxu0 %v1658_v20 }
  0x60   : > { %1488 = vmatprep.subr.bf16.mxu1 %v1658_v20 }
  0x62   : > { %1109 = vmatpush1.bf16.msra.mxu0 %v1656_v21 }
  0x63   : > { %1504 = vmatpush1.bf16.msra.mxu1 %v1656_v21  ;;  %1110 = vmatprep.subr.bf16.mxu0 %v1661_v22 }
  0x64   : > { %1489 = vmatprep.subr.bf16.mxu1 %v1661_v22 }
  0x66   : > { %1111 = vmatpush1.bf16.msra.mxu0 %v1659_v23 }
  0x67   : > { %1505 = vmatpush1.bf16.msra.mxu1 %v1659_v23  ;;  %1112 = vmatprep.subr.bf16.mxu0 %v1664_v24 }
  0x68   : > { %1490 = vmatprep.subr.bf16.mxu1 %v1664_v24 }
  0x6a   : > { %1113 = vmatpush1.bf16.msra.mxu0 %v1662_v25 }
  0x6b   : > { %1506 = vmatpush1.bf16.msra.mxu1 %v1662_v25  ;;  %1114 = vmatprep.subr.bf16.mxu0 %v1667_v26 }
  0x6c   : > { %1491 = vmatprep.subr.bf16.mxu1 %v1667_v26 }
  0x6e   : > { %1115 = vmatpush2.bf16.msra.mxu0 %v1665_v27 }
  0x6f   : > { %1507 = vmatpush2.bf16.msra.mxu1 %v1665_v27  ;;  %1116 = vmatprep.subr.bf16.mxu0 %v1670_v28 }
  0x70   : > { %1492 = vmatprep.subr.bf16.mxu1 %v1670_v28 }
  0x72   : > { %1117 = vmatpush2.bf16.msra.mxu0 %v1668_v29 }
  0x73   : > { %1508 = vmatpush2.bf16.msra.mxu1 %v1668_v29  ;;  %1118 = vmatprep.subr.bf16.mxu0 %v1673_v30 }
  0x74   : > { %1493 = vmatprep.subr.bf16.mxu1 %v1673_v30 }
  0x76   : > { %1119 = vmatpush2.bf16.msra.mxu0 %v1671_v31 }
  0x77   : > { %1509 = vmatpush2.bf16.msra.mxu1 %v1671_v31  ;;  %1120 = vmatprep.subr.bf16.mxu0 %v1676_v32 }
  0x78   : > { %1494 = vmatprep.subr.bf16.mxu1 %v1676_v32 }
  0x7a   : > { %1121 = vmatpush2.bf16.msra.mxu0 %v1674_v33 }
  0x7b   : > { %1510 = vmatpush2.bf16.msra.mxu1 %v1674_v33  ;;  %1122 = vmatprep.subr.bf16.mxu0 %v1679_v34 }
  0x7c   : > { %1495 = vmatprep.subr.bf16.mxu1 %v1679_v34 }
  0x7e   : > { %1123 = vmatpush2.bf16.msra.mxu0 %v1677_v35 }
  0x7f   : > { %1511 = vmatpush2.bf16.msra.mxu1 %v1677_v35  ;;  %1124 = vmatprep.subr.bf16.mxu0 %v1688_v36 }
  0x80   : > { %1496 = vmatprep.subr.bf16.mxu1 %v1688_v36 }
  0x82   : > { %1125 = vmatpush2.bf16.msra.mxu0 %v1686_v37 }
  0x83   : > { %1512 = vmatpush2.bf16.msra.mxu1 %v1686_v37  ;;  %1126 = vmatprep.subr.bf16.mxu0 %v1691_v38 }
  0x84   : > { %1497 = vmatprep.subr.bf16.mxu1 %v1691_v38 }
  0x86   : > { %1127 = vmatpush2.bf16.msra.mxu0 %v1689_v39 }
  0x87   : > { %1513 = vmatpush2.bf16.msra.mxu1 %v1689_v39  ;;  %1128 = vmatprep.subr.bf16.mxu0 %v1694_v40 }
  0x88   : > { %1498 = vmatprep.subr.bf16.mxu1 %v1694_v40 }
  0x8a   : > { %1129 = vmatpush2.bf16.msra.mxu0 %v1692_v41 }
  0x8b   : > { %1514 = vmatpush2.bf16.msra.mxu1 %v1692_v41 }
  0x8d   : > { %1131 = vmatmul.mubr.bf16.vlgmr.msra.gmra.mxu0 %v1695_v42 }
  0x8e   : > { %1141 = vmatmul.mubr.bf16.vlgmr.msra.gmra.mxu1 %v1698_v43 }
 0x10d   : > { %v666_v44 = vpop.f32.mrf.mxu0 }
 0x10e   : > { %v1079_v45 = vpop.f32.mrf.mxu1 }
 0x10f   : > { %v668_v46 = vpop.f32.mrf.mxu0  ;;  %v1080_v1 = vadd.f32 %v1079_v45, %v666_v44 }
 0x110   : > { %v1081_v47 = vpop.f32.mrf.mxu1 }
 0x111   : > { %v670_v48 = vpop.f32.mrf.mxu0  ;;  %v1082_v5 = vadd.f32 %v1081_v47, %v668_v46 }
 0x112   : > { %v1083_v49 = vpop.f32.mrf.mxu1 }
 0x113   : > { %v672_v50 = vpop.f32.mrf.mxu0  ;;  %v1084_v15 = vadd.f32 %v1083_v49, %v670_v48 }
 0x114   : > { %v1085_v51 = vpop.f32.mrf.mxu1 }
 0x115   : > { %v676_v52 = vpop.f32.mrf.mxu0  ;;  %v1086_v20 = vadd.f32 %v1085_v51, %v672_v50 }
 0x116   : > { %v1089_v53 = vpop.f32.mrf.mxu1 }
 0x117   : > { %v678_v55 = vpop.f32.mrf.mxu0  ;;  %v1090_v9 = vadd.f32 %v1089_v53, %v676_v52 }
 0x118   : > { %v1091_v56 = vpop.f32.mrf.mxu1 }
 0x119   : > { %v680_v58 = vpop.f32.mrf.mxu0  ;;  %v1092_v6 = vadd.f32 %v1091_v56, %v678_v55 }
 0x11a   : > { %v1093_v59 = vpop.f32.mrf.mxu1 }
 0x11b   : > { %v682_v63 = vpop.f32.mrf.mxu0  ;;  %v1094_v16 = vadd.f32 %v1093_v59, %v680_v58 }
 0x11c   : > { %v1095_v0 = vpop.f32.mrf.mxu1 }
 0x11d   : > { %v1096_v21 = vadd.f32 %v1095_v0, %v682_v63 }
 0x14d   : > { %v1132_v3 = vpop.f32.mrf.mxu0 }
 0x14e   : > { %v1142_v4 = vpop.f32.mrf.mxu1  ;;  %v1133_v7 = vadd.f32 %v1132_v3, %v1080_v1 }
 0x14f   : > { %v1134_v10 = vpop.f32.mrf.mxu0  ;;  %v1143_v17 = vadd.f32 %v1142_v4, %v1090_v9 }
 0x150   : > { %v1144_v11 = vpop.f32.mrf.mxu1  ;;  %v1163_v12 = vadd.f32 %v1156_v2, %v1133_v7  ;;  %v1135_v13 = vadd.f32 %v1134_v10, %v1082_v5 }
 0x151   : > { %v1145_v14 = vadd.f32 %v1144_v11, %v1092_v6  ;;  %v1136_v18 = vpop.f32.mrf.mxu0  ;;  %v1167_v32 = vadd.f32 %v1156_v2, %v1143_v17 }
 0x152   : > { %v1146_v19 = vpop.f32.mrf.mxu1  ;;  %v1164_v22 = vadd.f32 %v1160_v8, %v1135_v13  ;;  %v1137_v24 = vadd.f32 %v1136_v18, %v1084_v15  ;;  %v1171_v28 = vmax.f32 %v1163_v12, 0.0 }
 0x153   : > { %v1168_v23 = vadd.f32 %v1160_v8, %v1145_v14  ;;  %v1147_v25 = vadd.f32 %v1146_v19, %v1094_v16  ;;  %v1138_v26 = vpop.f32.mrf.mxu0  ;;  %v1175_v42 = vmax.f32 %v1167_v32, 0.0 }
 0x154   : > { %v1148_v27 = vpop.f32.mrf.mxu1  ;;  %v1172_v29 = vmax.f32 %v1164_v22, 0.0  ;;  %v1139_v30 = vadd.f32 %v1138_v26, %v1086_v20  ;;  %v1165_v33 = vadd.f32 %v1156_v2, %v1137_v24 }
 0x155   : > { %v1149_v31 = vadd.f32 %v1148_v27, %v1096_v21  ;;  %v1169_v35 = vadd.f32 %v1156_v2, %v1147_v25  ;;  %v1176_v38 = vmax.f32 %v1168_v23, 0.0 }
 0x156   : > { %v1479_v34 = vpack.c.bf16 %v1172_v29, %v1171_v28  ;;  %v1166_v36 = vadd.f32 %v1160_v8, %v1139_v30  ;;  %v1173_v39 = vmax.f32 %v1165_v33, 0.0 }
 0x157   : > { %v1170_v37 = vadd.f32 %v1160_v8, %v1149_v31  ;;  %v1177_v43 = vmax.f32 %v1169_v35, 0.0  ;;  %v1481_v45 = vpack.c.bf16 %v1176_v38, %v1175_v42 }
 0x158   : > { %1203 = vst [vmem:[%s341_s18] sm:$0xff] %v1479_v34  ;;  %v1174_v40 = vmax.f32 %v1166_v36, 0.0 }
 0x159   : > { %v1178_v41 = vmax.f32 %v1170_v37, 0.0  ;;  %1205 = vst [vmem:[%s341_s18 + $0x10] sm:$0xff] %v1481_v45 }
 0x15a   : > { %v1480_v44 = vpack.c.bf16 %v1174_v40, %v1173_v39 }
 0x15b   : > { %v1482_v46 = vpack.c.bf16 %v1178_v41, %v1177_v43 }
 0x15c   : > { %1204 = vst [vmem:[%s341_s18 + $0x8] sm:$0xff] %v1480_v44 }
 0x15d   : > { %1206 = vst [vmem:[%s341_s18 + $0x18] sm:$0xff] %v1482_v46 }
 0x15e PF: > { %s15_s20 = sadd.s32 1, %s1723_s20   ;;  %s2115_s18 = smov %s1719_s19 }
 0x15f   : > { %p12_p5 = scmp.ge.s32.totalorder %s15_s20, 4   ;;  %s2116_s19 = smov %s2118_s21 }
 0x161   :  { %14 = sbr.rel (!%p12_p5) target bundleno = 2 (0x2), region = 82 }

// kernel: hourglass_forward.11
= control target key start
LH: loop header
LB: loop body
LE: loop exit
PB: predicated region body
PF: predicated region fallthrough
CT: control target
= control target key end

     0   :  { %s2132_s18 = smov 0   ;;  %s2134_s19 = smov 0   ;;  %s2452_s0 = inlined_call_operand.vmem [shape: bf16[512,256], index: 0, kind: input, shape index: {}]   ;;  %s2453_s1 = inlined_call_operand.vmem [shape: bf16[256,128], index: 1, kind: input, shape index: {}]   ;;  %s2454_s2 = inlined_call_operand.vmem [shape: bf16[512,128], index: 2, kind: input, shape index: {}]   ;;  %s2455_s3 = inlined_call_operand.vmem [shape: bf16[128,128], index: 3, kind: input, shape index: {}]   ;;  %s2456_s4 = inlined_call_operand.vmem [shape: f32[1,128], index: 4, kind: input, shape index: {}]   ;;  %s2457_s5 = inlined_call_operand.vmem [shape: bf16[512,128], index: 5, kind: output, shape index: {}]  }
   0x1   :  { %s2136_s20 = smov 0  }
   0x2 LB: > { %s27_s21 = sadd.s32 1, %s2096_s19  ;;  %p1523_p0 = scmp.ge.s32.totalorder %s2100_s20, 1  ;;  %s2100_s20 = sphi %s2136_s20, %s15_s20   ;;  %s2096_s19 = sphi %s2134_s19, %s2459_s19   ;;  %s2092_s18 = sphi %s2132_s18, %s2458_s18  }
   0x3   : > { %p29_p1 = scmp.ge.s32.totalorder %s27_s21, 2  ;;  %p240_p2 = scmp.lt.s32.totalorder %s2100_s20, 3 }
   0x5   : > { %s2461_s21 = smov (%p29_p1, %s27_s21), 0  ;;  %p241_p3 = pnand %p1523_p0, %p240_p2 }
   0x6   : > { %s1524_s13 = sshll.u32 (!%p241_p3), %s2092_s18, 5 }
   0x7   : > { %244 = sbr.rel (%p241_p3) target bundleno = 344 (0x158), region = 40  ;;  %p289_p4 = scmp.lt.s32.totalorder (!%p241_p3), %s1524_s13, 63 }
   0xc   : > { %v1990_v0 = vld [vmem:[%s2455_s3 + $0x38] sm:$0xff]   ;;  %v1993_v3 = vld [vmem:[%s2455_s3 + $0x30] sm:$0xff]   ;;  %v1996_v6 = vld [vmem:[%s2455_s3 + $0x28] sm:$0xff]   ;;  %s2463_s13 = smov (!%p289_p4, %s1524_s13), 63 }
   0xd   : > { %v2158_v1 = vld [vmem:[%s2453_s1 + $0x78] sm:$0xff]   ;;  %1902 = vmatprep.subr.bf16.mxu0 %v1990_v0  ;;  %v2173_v4 = vld [vmem:[%s2453_s1 + $0x70] sm:$0xff]   ;;  %v2187_v7 = vld [vmem:[%s2453_s1 + $0x68] sm:$0xff]   ;;  %s1528_s10 = sshll.u32 %s2463_s13, 2  ;;  %s1638_s16 = sshll.u32 %s2463_s13, 3 }
   0xe   : > { %v2163_v2 = vld [vmem:[%s2453_s1 + $0x38] sm:$0xff]   ;;  %1950 = vmatprep.subr.bf16.mxu1 %v2158_v1  ;;  %1903 = vmatpush3.bf16.msra.mxu0 %v1990_v0  ;;  %v2178_v5 = vld [vmem:[%s2453_s1 + $0x30] sm:$0xff]   ;;  %v2194_v8 = vld [vmem:[%s2453_s1 + $0x28] sm:$0xff]   ;;  %s2257_s24 = scalar_lea.vmem %s2454_s2, %s1528_s10  ;;  %s2270_s6 = scalar_lea.vmem %s2452_s0, %s1638_s16 }
   0xf   : > { %1958 = vmatpush3.bf16.msra.mxu1 %v2163_v2  ;;  %1904 = vmatprep.subr.bf16.mxu0 %v1993_v3  ;;  %v1999_v9 = vld [vmem:[%s2455_s3 + $0x20] sm:$0xff]   ;;  %v2002_v12 = vld [vmem:[%s2455_s3 + $0x18] sm:$0xff]   ;;  %v2005_v15 = vld [vmem:[%s2455_s3 + $0x10] sm:$0xff]   ;;  %s2371_s17 = scalar_lea.vmem %s2457_s5, %s1528_s10 }
  0x10   : > { %1951 = vmatprep.subr.bf16.mxu1 %v2173_v4  ;;  %v2203_v10 = vld [vmem:[%s2453_s1 + $0x60] sm:$0xff]   ;;  %v2218_v13 = vld [vmem:[%s2453_s1 + $0x58] sm:$0xff]   ;;  %v2235_v16 = vld [vmem:[%s2453_s1 + $0x50] sm:$0xff]  }
  0x11   : > { %v2208_v11 = vld [vmem:[%s2453_s1 + $0x20] sm:$0xff]   ;;  %v2225_v14 = vld [vmem:[%s2453_s1 + $0x18] sm:$0xff]   ;;  %v2241_v17 = vld [vmem:[%s2453_s1 + $0x10] sm:$0xff]  }
  0x12   : > { %1905 = vmatpush3.bf16.msra.mxu0 %v1993_v3  ;;  %v2008_v18 = vld [vmem:[%s2455_s3 + $0x8] sm:$0xff]   ;;  %v2011_v21 = vld [vmem:[%s2455_s3] sm:$0xff]   ;;  %v2019_v28 = vld [vmem:[%s2257_s24 + $0x10] sm:$0xff]  }
  0x13   : > { %1959 = vmatpush3.bf16.msra.mxu1 %v2178_v5  ;;  %1906 = vmatprep.subr.bf16.mxu0 %v1996_v6  ;;  %v2009_v19 = vld [vmem:[%s2453_s1 + $0x48] sm:$0xff]   ;;  %v2014_v22 = vld [vmem:[%s2257_s24] sm:$0xff]   ;;  %v2020_v29 = vld [vmem:[%s2270_s6 + $0x54] ss:$8 sps:$4 sm:$0xff]  }
  0x14   : > { %1952 = vmatprep.subr.bf16.mxu1 %v2187_v7  ;;  %v2262_v20 = vld [vmem:[%s2453_s1 + $0x8] sm:$0xff]   ;;  %v2012_v23 = vld [vmem:[%s2453_s1 + $0x40] sm:$0xff]   ;;  %1918 = vmatprep.mubr.bf16.mxu0 %v2014_v22  ;;  %v2022_v30 = vld [vmem:[%s2257_s24 + $0x18] sm:$0xff]  }
  0x15   : > { %v2017_v24 = vld [vmem:[%s2270_s6 + $0x44] ss:$8 sps:$4 sm:$0xff]   ;;  %v2015_v26 = vld [vmem:[%s2270_s6 + $0x40] ss:$8 sps:$4 sm:$0xff]   ;;  %v2023_v31 = vld [vmem:[%s2270_s6 + $0x50] ss:$8 sps:$4 sm:$0xff]  }
  0x16   : > { %1907 = vmatpush3.bf16.msra.mxu0 %v1996_v6  ;;  %v2013_v25 = vld [vmem:[%s2453_s1] sm:$0xff]   ;;  %1059 = vmatprep.mubr.bf16.mxu1 %v2017_v24  ;;  %v2018_v27 = vld [vmem:[%s2257_s24 + $0x8] sm:$0xff]   ;;  %v2029_v36 = vld [vmem:[%s2257_s24 + $0x30] sm:$0xff]  }
  0x17   : > { %1960 = vmatpush3.bf16.msra.mxu1 %v2194_v8  ;;  %1908 = vmatprep.subr.bf16.mxu0 %v1999_v9  ;;  %v2024_v32 = vld [vmem:[%s2257_s24 + $0x20] sm:$0xff]   ;;  %v2027_v34 = vld [vmem:[%s2257_s24 + $0x28] sm:$0xff]   ;;  %v2030_v37 = vld [vmem:[%s2270_s6 + $0x74] ss:$8 sps:$4 sm:$0xff]  }
  0x18   : > { %1953 = vmatprep.subr.bf16.mxu1 %v2203_v10  ;;  %v2025_v33 = vld [vmem:[%s2270_s6 + $0x64] ss:$8 sps:$4 sm:$0xff]   ;;  %v2028_v35 = vld [vmem:[%s2270_s6 + $0x60] ss:$8 sps:$4 sm:$0xff]   ;;  %v2032_v38 = vld [vmem:[%s2257_s24 + $0x38] sm:$0xff]  }
  0x19   : > { %v2033_v39 = vld [vmem:[%s2270_s6 + $0x70] ss:$8 sps:$4 sm:$0xff]   ;;  %v2034_v40 = vld [vmem:[%s2257_s24 + $0x40] sm:$0xff]   ;;  %v2037_v42 = vld [vmem:[%s2257_s24 + $0x48] sm:$0xff]  }
  0x1a   : > { %1909 = vmatpush3.bf16.msra.mxu0 %v1999_v9  ;;  %v2035_v41 = vld [vmem:[%s2270_s6 + $0x84] ss:$8 sps:$4 sm:$0xff]   ;;  %v2038_v43 = vld [vmem:[%s2270_s6 + $0x80] ss:$8 sps:$4 sm:$0xff]   ;;  %v2039_v44 = vld [vmem:[%s2257_s24 + $0x50] sm:$0xff]  }
  0x1b   : > { %1961 = vmatpush3.bf16.msra.mxu1 %v2208_v11  ;;  %1910 = vmatprep.subr.bf16.mxu0 %v2002_v12  ;;  %v2040_v45 = vld [vmem:[%s2270_s6 + $0x94] ss:$8 sps:$4 sm:$0xff]   ;;  %v2043_v47 = vld [vmem:[%s2270_s6 + $0x90] ss:$8 sps:$4 sm:$0xff]   ;;  %v2044_v48 = vld [vmem:[%s2257_s24 + $0x60] sm:$0xff]  }
  0x1c   : > { %1954 = vmatprep.subr.bf16.mxu1 %v2218_v13  ;;  %v2042_v46 = vld [vmem:[%s2257_s24 + $0x58] sm:$0xff]   ;;  %v2045_v49 = vld [vmem:[%s2270_s6 + $0xa4] ss:$8 sps:$4 sm:$0xff]   ;;  %v2048_v51 = vld [vmem:[%s2270_s6 + $0xa0] ss:$8 sps:$4 sm:$0xff]  }
  0x1d   : > { %v2047_v50 = vld [vmem:[%s2257_s24 + $0x68] sm:$0xff]   ;;  %v2049_v52 = vld [vmem:[%s2257_s24 + $0x70] sm:$0xff]   ;;  %v2052_v54 = vld [vmem:[%s2257_s24 + $0x78] sm:$0xff]  }
  0x1e   : > { %1911 = vmatpush3.bf16.msra.mxu0 %v2002_v12  ;;  %v2050_v53 = vld [vmem:[%s2270_s6 + $0xb4] ss:$8 sps:$4 sm:$0xff]   ;;  %v2053_v55 = vld [vmem:[%s2270_s6 + $0xb0] ss:$8 sps:$4 sm:$0xff]   ;;  %v2056_v56 = vld [vmem:[%s2270_s6 + $0x4] ss:$8 sps:$4 sm:$0xff]  }
  0x1f   : > { %1962 = vmatpush3.bf16.msra.mxu1 %v2225_v14  ;;  %1912 = vmatprep.subr.bf16.mxu0 %v2005_v15  ;;  %v2057_v57 = vld [vmem:[%s2270_s6 + $0xc4] ss:$8 sps:$4 sm:$0xff]   ;;  %v2054_v58 = vld [vmem:[%s2270_s6] ss:$8 sps:$4 sm:$0xff]   ;;  %v2060_v60 = vld [vmem:[%s2270_s6 + $0x14] ss:$8 sps:$4 sm:$0xff]  }
  0x20   : > { %1955 = vmatprep.subr.bf16.mxu1 %v2235_v16  ;;  %v2059_v59 = vld [vmem:[%s2270_s6 + $0xc0] ss:$8 sps:$4 sm:$0xff]   ;;  %v2062_v61 = vld [vmem:[%s2270_s6 + $0xd4] ss:$8 sps:$4 sm:$0xff]   ;;  %v2064_v62 = vld [vmem:[%s2270_s6 + $0x10] ss:$8 sps:$4 sm:$0xff]  }
  0x21   : > { %v2065_v63 = vld [vmem:[%s2270_s6 + $0xd0] ss:$8 sps:$4 sm:$0xff]   ;;  %v2066_v0 = vld [vmem:[%s2270_s6 + $0x24] ss:$8 sps:$4 sm:$0xff]   ;;  %v2071_v3 = vld [vmem:[%s2270_s6 + $0xe0] ss:$8 sps:$4 sm:$0xff]  }
  0x22   : > { %1913 = vmatpush3.bf16.msra.mxu0 %v2005_v15  ;;  %v2076_v6 = vld [vmem:[%s2270_s6 + $0x30] ss:$8 sps:$4 sm:$0xff]  }
  0x23   : > { %1963 = vmatpush3.bf16.msra.mxu1 %v2241_v17  ;;  %1914 = vmatprep.subr.bf16.mxu0 %v2008_v18 }
  0x24   : > { %1956 = vmatprep.subr.bf16.mxu1 %v2009_v19 }
  0x26   : > { %1915 = vmatpush3.bf16.msra.mxu0 %v2008_v18 }
  0x27   : > { %1964 = vmatpush3.bf16.msra.mxu1 %v2262_v20  ;;  %1916 = vmatprep.subr.bf16.mxu0 %v2011_v21 }
  0x28   : > { %1957 = vmatprep.subr.bf16.mxu1 %v2012_v23 }
  0x2a   : > { %1917 = vmatpush3.bf16.msra.mxu0 %v2011_v21 }
  0x2b   : > { %1965 = vmatpush3.bf16.msra.mxu1 %v2013_v25  ;;  %1790 = vmatprep.subr.bf16.mxu0 %v2158_v1  ;;  %v2068_v1 = vld [vmem:[%s2270_s6 + $0xe4] ss:$8 sps:$4 sm:$0xff]  }
  0x2d   : > { %1919 = vmatmul.mubr.bf16.vlgmr.msra.gmra.mxu0 %v2018_v27 }
  0x2e   : > { %1060 = vmatmul.mubr.bf16.vlgmr.msra.gmra.mxu1 %v2015_v26  ;;  %1791 = vmatpush3.bf16.msra.mxu0 %v2163_v2  ;;  %v2070_v2 = vld [vmem:[%s2270_s6 + $0x20] ss:$8 sps:$4 sm:$0xff]  }
  0x2f   : > { %1922 = vmatprep.mubr.bf16.mxu0 %v2019_v28  ;;  %1067 = vmatprep.mubr.bf16.mxu1 %v2020_v29  ;;  %v2360_v29 = vld [vmem:[%s2456_s4] ss:$0 sm:$0xff] }
  0x30   : > { %1792 = vmatprep.subr.bf16.mxu0 %v2173_v4  ;;  %v2072_v4 = vld [vmem:[%s2270_s6 + $0x34] ss:$8 sps:$4 sm:$0xff]  }
  0x32   : > { %1793 = vmatpush3.bf16.msra.mxu0 %v2178_v5  ;;  %v2074_v5 = vld [vmem:[%s2270_s6 + $0xf4] ss:$8 sps:$4 sm:$0xff]  }
  0x33   : > { %1794 = vmatprep.subr.bf16.mxu0 %v2187_v7  ;;  %v2077_v7 = vld [vmem:[%s2270_s6 + $0xf0] ss:$8 sps:$4 sm:$0xff]  }
  0x35   : > { %1923 = vmatmul.mubr.bf16.gmra.mxu0 %v2022_v30 }
  0x36   : > { %1068 = vmatmul.mubr.bf16.gmra.mxu1 %v2023_v31  ;;  %1926 = vmatprep.mubr.bf16.mxu0 %v2024_v32 }
  0x37   : > { %1075 = vmatprep.mubr.bf16.mxu1 %v2025_v33  ;;  %1795 = vmatpush3.bf16.msra.mxu0 %v2194_v8 }
  0x38   : > { %1796 = vmatprep.subr.bf16.mxu0 %v2203_v10 }
  0x3b   : > { %1797 = vmatpush3.bf16.msra.mxu0 %v2208_v11 }
  0x3c   : > { %1798 = vmatprep.subr.bf16.mxu0 %v2218_v13 }
  0x3d   : > { %1927 = vmatmul.mubr.bf16.gmra.mxu0 %v2027_v34 }
  0x3e   : > { %1076 = vmatmul.mubr.bf16.gmra.mxu1 %v2028_v35  ;;  %1930 = vmatprep.mubr.bf16.mxu0 %v2029_v36 }
  0x3f   : > { %1083 = vmatprep.mubr.bf16.mxu1 %v2030_v37  ;;  %1799 = vmatpush3.bf16.msra.mxu0 %v2225_v14 }
  0x40   : > { %1800 = vmatprep.subr.bf16.mxu0 %v2235_v16 }
  0x43   : > { %1801 = vmatpush3.bf16.msra.mxu0 %v2241_v17 }
  0x44   : > { %1802 = vmatprep.subr.bf16.mxu0 %v2009_v19 }
  0x45   : > { %1931 = vmatmul.mubr.bf16.gmra.mxu0 %v2032_v38 }
  0x46   : > { %1084 = vmatmul.mubr.bf16.gmra.mxu1 %v2033_v39  ;;  %1934 = vmatprep.mubr.bf16.mxu0 %v2034_v40 }
  0x47   : > { %1091 = vmatprep.mubr.bf16.mxu1 %v2035_v41  ;;  %1803 = vmatpush3.bf16.msra.mxu0 %v2262_v20 }
  0x48   : > { %1804 = vmatprep.subr.bf16.mxu0 %v2012_v23 }
  0x4b   : > { %1805 = vmatpush3.bf16.msra.mxu0 %v2013_v25 }
  0x4d   : > { %1935 = vmatmul.mubr.bf16.gmra.mxu0 %v2037_v42 }
  0x4e   : > { %1092 = vmatmul.mubr.bf16.gmra.mxu1 %v2038_v43  ;;  %1938 = vmatprep.mubr.bf16.mxu0 %v2039_v44 }
  0x4f   : > { %1099 = vmatprep.mubr.bf16.mxu1 %v2040_v45 }
  0x55   : > { %1939 = vmatmul.mubr.bf16.gmra.mxu0 %v2042_v46 }
  0x56   : > { %1100 = vmatmul.mubr.bf16.gmra.mxu1 %v2043_v47  ;;  %1942 = vmatprep.mubr.bf16.mxu0 %v2044_v48 }
  0x57   : > { %1107 = vmatprep.mubr.bf16.mxu1 %v2045_v49 }
  0x5d   : > { %1943 = vmatmul.mubr.bf16.gmra.mxu0 %v2047_v50 }
  0x5e   : > { %1108 = vmatmul.mubr.bf16.gmra.mxu1 %v2048_v51  ;;  %1946 = vmatprep.mubr.bf16.mxu0 %v2049_v52 }
  0x5f   : > { %1115 = vmatprep.mubr.bf16.mxu1 %v2050_v53 }
  0x65   : > { %1947 = vmatmul.mubr.bf16.gmra.mxu0 %v2052_v54 }
  0x66   : > { %1116 = vmatmul.mubr.bf16.gmra.mxu1 %v2053_v55  ;;  %1027 = vmatprep.mubr.bf16.mxu0 %v2056_v56 }
  0x67   : > { %1123 = vmatprep.mubr.bf16.mxu1 %v2057_v57 }
  0x6d   : > { %1028 = vmatmul.mubr.bf16.vlgmr.msra.gmra.mxu0 %v2054_v58 }
  0x6e   : > { %1124 = vmatmul.mubr.bf16.gmra.mxu1 %v2059_v59  ;;  %1035 = vmatprep.mubr.bf16.mxu0 %v2060_v60 }
  0x6f   : > { %1131 = vmatprep.mubr.bf16.mxu1 %v2062_v61 }
  0x75   : > { %1036 = vmatmul.mubr.bf16.gmra.mxu0 %v2064_v62 }
  0x76   : > { %1132 = vmatmul.mubr.bf16.gmra.mxu1 %v2065_v63  ;;  %1043 = vmatprep.mubr.bf16.mxu0 %v2066_v0 }
  0x77   : > { %1139 = vmatprep.mubr.bf16.mxu1 %v2068_v1 }
  0x7d   : > { %1044 = vmatmul.mubr.bf16.gmra.mxu0 %v2070_v2 }
  0x7e   : > { %1140 = vmatmul.mubr.bf16.gmra.mxu1 %v2071_v3  ;;  %1051 = vmatprep.mubr.bf16.mxu0 %v2072_v4 }
  0x7f   : > { %1147 = vmatprep.mubr.bf16.mxu1 %v2074_v5 }
  0x85   : > { %1052 = vmatmul.mubr.bf16.gmra.mxu0 %v2076_v6 }
  0x86   : > { %1148 = vmatmul.mubr.bf16.gmra.mxu1 %v2077_v7 }
  0xed   : > { %v2341_v8 = vpop.f32.mrf.mxu0 }
  0xee   : > { %v1830_v9 = vpop.f32.mrf.mxu1 }
  0xef   : > { %v2343_v10 = vpop.f32.mrf.mxu0 }
  0xf0   : > { %v1831_v11 = vpop.f32.mrf.mxu1 }
  0xf1   : > { %v2345_v12 = vpop.f32.mrf.mxu0  ;;  %v1832_v26 = vadd.f32 %v1831_v11, %v1830_v9 }
  0xf2   : > { %v1833_v13 = vpop.f32.mrf.mxu1 }
  0xf3   : > { %v2347_v14 = vpop.f32.mrf.mxu0 }
  0xf4   : > { %v1834_v15 = vpop.f32.mrf.mxu1 }
  0xf5   : > { %v2349_v16 = vpop.f32.mrf.mxu0  ;;  %v1835_v35 = vadd.f32 %v1834_v15, %v1833_v13 }
  0xf6   : > { %v1836_v17 = vpop.f32.mrf.mxu1 }
  0xf7   : > { %v2351_v18 = vpop.f32.mrf.mxu0 }
  0xf8   : > { %v1837_v19 = vpop.f32.mrf.mxu1 }
  0xf9   : > { %v2353_v20 = vpop.f32.mrf.mxu0  ;;  %v1838_v23 = vadd.f32 %v1837_v19, %v1836_v17 }
  0xfa   : > { %v1839_v21 = vpop.f32.mrf.mxu1 }
  0xfb   : > { %v2355_v22 = vpop.f32.mrf.mxu0 }
  0xfc   : > { %v1840_v24 = vpop.f32.mrf.mxu1 }
  0xfd   : > { %v1928_v25 = vpop.f32.mrf.mxu0  ;;  %v1841_v31 = vadd.f32 %v1840_v24, %v1839_v21 }
  0xfe   : > { %v1070_v27 = vadd.f32 %v1928_v25, %v1838_v23  ;;  %v1842_v28 = vpop.f32.mrf.mxu1 }
  0xff   : > { %v644_v30 = vpop.f32.mrf.mxu0 }
 0x100   : > { %v1062_v32 = vadd.f32 %v1832_v26, %v644_v30  ;;  %v1843_v33 = vpop.f32.mrf.mxu1  ;;  %v1173_v36 = vadd.f32 %v2360_v29, %v1070_v27 }
 0x101   : > { %v1929_v34 = vpop.f32.mrf.mxu0  ;;  %v1844_v46 = vadd.f32 %v1843_v33, %v1842_v28 }
 0x102   : > { %v1073_v37 = vadd.f32 %v1929_v34, %v1841_v31  ;;  %v1845_v38 = vpop.f32.mrf.mxu1  ;;  %v1171_v40 = vadd.f32 %v2360_v29, %v1062_v32  ;;  %v1205_v45 = vmax.f32 %v1173_v36, 0.0 }
 0x103   : > { %v647_v39 = vpop.f32.mrf.mxu0 }
 0x104   : > { %v1174_v41 = vadd.f32 %v2360_v29, %v1073_v37  ;;  %v1065_v42 = vadd.f32 %v1835_v35, %v647_v39  ;;  %v1846_v43 = vpop.f32.mrf.mxu1  ;;  %v1203_v51 = vmax.f32 %v1171_v40, 0.0 }
 0x105   : > { %v1932_v44 = vpop.f32.mrf.mxu0  ;;  %v1847_v59 = vadd.f32 %v1846_v43, %v1845_v38 }
 0x106   : > { %v1206_v47 = vmax.f32 %v1174_v41, 0.0  ;;  %v1172_v48 = vadd.f32 %v2360_v29, %v1065_v42  ;;  %v1848_v49 = vpop.f32.mrf.mxu1 }
 0x107   : > { %v660_v50 = vpop.f32.mrf.mxu0 }
 0x108   : > { %v1699_v52 = vpack.c.bf16 %v1206_v47, %v1205_v45  ;;  %v1204_v53 = vmax.f32 %v1172_v48, 0.0  ;;  %v1078_v54 = vadd.f32 %v1844_v46, %v660_v50  ;;  %v1849_v55 = vpop.f32.mrf.mxu1 }
 0x109   : > { %v1850_v56 = vadd.f32 %v1849_v55, %v1848_v49  ;;  %v1933_v57 = vpop.f32.mrf.mxu0 }
 0x10a   : > { %1755 = vst [vmem:[%s2371_s17 + $0x28] sm:$0xff] %v1699_v52   ;;  %v1694_v58 = vpack.c.bf16 %v1204_v53, %v1203_v51  ;;  %v1851_v60 = vpop.f32.mrf.mxu1  ;;  %v1175_v63 = vadd.f32 %v2360_v29, %v1078_v54 }
 0x10b   : > { %v1086_v61 = vadd.f32 %v1932_v44, %v1850_v56  ;;  %v663_v62 = vpop.f32.mrf.mxu0 }
 0x10c   : > { %1754 = vst [vmem:[%s2371_s17 + $0x20] sm:$0xff] %v1694_v58   ;;  %v1081_v0 = vadd.f32 %v1847_v59, %v663_v62  ;;  %v1852_v1 = vpop.f32.mrf.mxu1  ;;  %v1207_v11 = vmax.f32 %v1175_v63, 0.0 }
 0x10d   : > { %v1853_v2 = vadd.f32 %v1852_v1, %v1851_v60  ;;  %v1936_v3 = vpop.f32.mrf.mxu0  ;;  %v1177_v6 = vadd.f32 %v2360_v29, %v1086_v61 }
 0x10e   : > { %v1176_v4 = vadd.f32 %v2360_v29, %v1081_v0  ;;  %v1854_v5 = vpop.f32.mrf.mxu1 }
 0x10f   : > { %v1089_v7 = vadd.f32 %v1933_v57, %v1853_v2  ;;  %v676_v9 = vpop.f32.mrf.mxu0  ;;  %v1209_v25 = vmax.f32 %v1177_v6, 0.0 }
 0x110   : > { %v1208_v13 = vmax.f32 %v1176_v4, 0.0  ;;  %v1855_v15 = vpop.f32.mrf.mxu1 }
 0x111   : > { %v1178_v17 = vadd.f32 %v2360_v29, %v1089_v7  ;;  %v1856_v19 = vadd.f32 %v1855_v15, %v1854_v5  ;;  %v1937_v21 = vpop.f32.mrf.mxu0 }
 0x112   : > { %v1704_v23 = vpack.c.bf16 %v1208_v13, %v1207_v11  ;;  %v1857_v24 = vpop.f32.mrf.mxu1 }
 0x113   : > { %v1210_v26 = vmax.f32 %v1178_v17, 0.0  ;;  %v1094_v27 = vadd.f32 %v1856_v19, %v676_v9  ;;  %v679_v28 = vpop.f32.mrf.mxu0 }
 0x114   : > { %1756 = vst [vmem:[%s2371_s17 + $0x30] sm:$0xff] %v1704_v23   ;;  %v1858_v30 = vpop.f32.mrf.mxu1 }
 0x115   : > { %v1709_v31 = vpack.c.bf16 %v1210_v26, %v1209_v25  ;;  %v1859_v32 = vadd.f32 %v1858_v30, %v1857_v24  ;;  %v1940_v33 = vpop.f32.mrf.mxu0  ;;  %v1179_v35 = vadd.f32 %v2360_v29, %v1094_v27 }
 0x116   : > { %v1860_v34 = vpop.f32.mrf.mxu1 }
 0x117   : > { %1757 = vst [vmem:[%s2371_s17 + $0x38] sm:$0xff] %v1709_v31   ;;  %v1097_v36 = vadd.f32 %v1859_v32, %v679_v28  ;;  %v692_v37 = vpop.f32.mrf.mxu0  ;;  %v1211_v43 = vmax.f32 %v1179_v35, 0.0 }
 0x118   : > { %v1861_v38 = vpop.f32.mrf.mxu1 }
 0x119   : > { %v1180_v39 = vadd.f32 %v2360_v29, %v1097_v36  ;;  %v1862_v40 = vadd.f32 %v1861_v38, %v1860_v34  ;;  %v1941_v41 = vpop.f32.mrf.mxu0 }
 0x11a   : > { %v1863_v42 = vpop.f32.mrf.mxu1 }
 0x11b   : > { %v1212_v44 = vmax.f32 %v1180_v39, 0.0  ;;  %v1102_v45 = vadd.f32 %v1936_v3, %v1862_v40  ;;  %v695_v46 = vpop.f32.mrf.mxu0 }
 0x11c   : > { %v1864_v47 = vpop.f32.mrf.mxu1 }
 0x11d   : > { %v1714_v48 = vpack.c.bf16 %v1212_v44, %v1211_v43  ;;  %v1865_v49 = vadd.f32 %v1864_v47, %v1863_v42  ;;  %v2383_v50 = vpop.f32.mrf.mxu0  ;;  %v1181_v52 = vadd.f32 %v2360_v29, %v1102_v45 }
 0x11e   : > { %v1866_v51 = vpop.f32.mrf.mxu1 }
 0x11f   : > { %1758 = vst [vmem:[%s2371_s17 + $0x40] sm:$0xff] %v1714_v48   ;;  %v1105_v53 = vadd.f32 %v1937_v21, %v1865_v49  ;;  %v708_v54 = vpop.f32.mrf.mxu0  ;;  %v1213_v60 = vmax.f32 %v1181_v52, 0.0 }
 0x120   : > { %v1867_v55 = vpop.f32.mrf.mxu1 }
 0x121   : > { %v1182_v56 = vadd.f32 %v2360_v29, %v1105_v53  ;;  %v1868_v57 = vadd.f32 %v1867_v55, %v1866_v51  ;;  %v2388_v58 = vpop.f32.mrf.mxu0 }
 0x122   : > { %v1869_v59 = vpop.f32.mrf.mxu1 }
 0x123   : > { %v1214_v61 = vmax.f32 %v1182_v56, 0.0  ;;  %v1110_v62 = vadd.f32 %v1868_v57, %v692_v37  ;;  %v711_v63 = vpop.f32.mrf.mxu0 }
 0x124   : > { %v1870_v0 = vpop.f32.mrf.mxu1 }
 0x125   : > { %v1719_v1 = vpack.c.bf16 %v1214_v61, %v1213_v60  ;;  %v1871_v2 = vadd.f32 %v1870_v0, %v1869_v59  ;;  %v2390_v3 = vpop.f32.mrf.mxu0  ;;  %v1183_v5 = vadd.f32 %v2360_v29, %v1110_v62 }
 0x126   : > { %v1872_v4 = vpop.f32.mrf.mxu1 }
 0x127   : > { %1759 = vst [vmem:[%s2371_s17 + $0x48] sm:$0xff] %v1719_v1   ;;  %v1113_v6 = vadd.f32 %v1871_v2, %v695_v46  ;;  %v2394_v7 = vpop.f32.mrf.mxu0  ;;  %v1215_v19 = vmax.f32 %v1183_v5, 0.0 }
 0x128   : > { %v1873_v9 = vpop.f32.mrf.mxu1 }
 0x129   : > { %v1184_v11 = vadd.f32 %v2360_v29, %v1113_v6  ;;  %v1874_v13 = vadd.f32 %v1873_v9, %v1872_v4  ;;  %v2397_v15 = vpop.f32.mrf.mxu0 }
 0x12a   : > { %v1875_v17 = vpop.f32.mrf.mxu1 }
 0x12b   : > { %v1216_v21 = vmax.f32 %v1184_v11, 0.0  ;;  %v1118_v23 = vadd.f32 %v1940_v33, %v1874_v13  ;;  %v2399_v24 = vpop.f32.mrf.mxu0 }
 0x12c   : > { %v1876_v25 = vpop.f32.mrf.mxu1 }
 0x12d   : > { %v1724_v26 = vpack.c.bf16 %v1216_v21, %v1215_v19  ;;  %v1877_v27 = vadd.f32 %v1876_v25, %v1875_v17  ;;  %v1806_v28 = vpop.f32.mrf.mxu0  ;;  %v1185_v31 = vadd.f32 %v2360_v29, %v1118_v23 }
 0x12e   : > { %v1878_v30 = vpop.f32.mrf.mxu1 }
 0x12f   : > { %1760 = vst [vmem:[%s2371_s17 + $0x50] sm:$0xff] %v1724_v26   ;;  %v1121_v32 = vadd.f32 %v1941_v41, %v1877_v27  ;;  %v1807_v34 = vpop.f32.mrf.mxu0  ;;  %v1217_v42 = vmax.f32 %v1185_v31, 0.0 }
 0x130   : > { %v1808_v35 = vadd.f32 %v1807_v34, %v1806_v28  ;;  %v1879_v36 = vpop.f32.mrf.mxu1 }
 0x131   : > { %v1186_v37 = vadd.f32 %v2360_v29, %v1121_v32  ;;  %v1880_v38 = vadd.f32 %v1879_v36, %v1878_v30  ;;  %v1809_v39 = vpop.f32.mrf.mxu0 }
 0x132   : > { %v1030_v33 = vadd.f32 %v1808_v35, %v2343_v10  ;;  %v1881_v40 = vpop.f32.mrf.mxu1 }
 0x133   : > { %v1218_v43 = vmax.f32 %v1186_v37, 0.0  ;;  %v1126_v44 = vadd.f32 %v1880_v38, %v708_v54  ;;  %v1810_v45 = vpop.f32.mrf.mxu0 }
 0x134   : > { %v1811_v46 = vadd.f32 %v1810_v45, %v1809_v39  ;;  %v1882_v47 = vpop.f32.mrf.mxu1  ;;  %v1163_v51 = vadd.f32 %v2360_v29, %v1030_v33 }
 0x135   : > { %v1729_v48 = vpack.c.bf16 %v1218_v43, %v1217_v42  ;;  %v1883_v49 = vadd.f32 %v1882_v47, %v1881_v40  ;;  %v1812_v41 = vpop.f32.mrf.mxu0  ;;  %v1187_v55 = vadd.f32 %v2360_v29, %v1126_v44 }
 0x136   : > { %v1033_v52 = vadd.f32 %v1811_v46, %v2347_v14  ;;  %v1884_v53 = vpop.f32.mrf.mxu1  ;;  %v1195_v0 = vmax.f32 %v1163_v51, 0.0 }
 0x137   : > { %1761 = vst [vmem:[%s2371_s17 + $0x58] sm:$0xff] %v1729_v48   ;;  %v1129_v56 = vadd.f32 %v1883_v49, %v711_v63  ;;  %v1813_v10 = vpop.f32.mrf.mxu0  ;;  %v1219_v4 = vmax.f32 %v1187_v55, 0.0 }
 0x138   : > { %v1164_v57 = vadd.f32 %v2360_v29, %v1033_v52  ;;  %v1814_v59 = vadd.f32 %v1813_v10, %v1812_v41  ;;  %v1885_v54 = vpop.f32.mrf.mxu1 }
 0x139   : > { %v1188_v60 = vadd.f32 %v2360_v29, %v1129_v56  ;;  %v1886_v61 = vadd.f32 %v1885_v54, %v1884_v53  ;;  %v1815_v62 = vpop.f32.mrf.mxu0 }
 0x13a   : > { %v1196_v1 = vmax.f32 %v1164_v57, 0.0  ;;  %v1038_v2 = vadd.f32 %v2341_v8, %v1814_v59  ;;  %v1887_v14 = vpop.f32.mrf.mxu1 }
 0x13b   : > { %v1220_v5 = vmax.f32 %v1188_v60, 0.0  ;;  %v1134_v63 = vadd.f32 %v2383_v50, %v1886_v61  ;;  %v1816_v6 = vpop.f32.mrf.mxu0 }
 0x13c   : > { %v1674_v9 = vpack.c.bf16 %v1196_v1, %v1195_v0  ;;  %v1817_v11 = vadd.f32 %v1816_v6, %v1815_v62  ;;  %v1888_v13 = vpop.f32.mrf.mxu1  ;;  %v1165_v23 = vadd.f32 %v2360_v29, %v1038_v2 }
 0x13d   : > { %v1734_v17 = vpack.c.bf16 %v1220_v5, %v1219_v4  ;;  %v1889_v19 = vadd.f32 %v1888_v13, %v1887_v14  ;;  %v1818_v21 = vpop.f32.mrf.mxu0  ;;  %v1189_v8 = vadd.f32 %v2360_v29, %v1134_v63 }
 0x13e   : > { %1675 = vst [vmem:[%s2371_s17] sm:$0xff] %v1674_v9   ;;  %v1041_v25 = vadd.f32 %v2345_v12, %v1817_v11  ;;  %v1890_v26 = vpop.f32.mrf.mxu1  ;;  %v1197_v36 = vmax.f32 %v1165_v23, 0.0 }
 0x13f   : > { %1762 = vst [vmem:[%s2371_s17 + $0x60] sm:$0xff] %v1734_v17   ;;  %v1137_v27 = vadd.f32 %v2388_v58, %v1889_v19  ;;  %v1819_v28 = vpop.f32.mrf.mxu0  ;;  %v1221_v39 = vmax.f32 %v1189_v8, 0.0 }
 0x140   : > { %v1166_v50 = vadd.f32 %v2360_v29, %v1041_v25  ;;  %v1820_v30 = vadd.f32 %v1819_v28, %v1818_v21  ;;  %v1891_v31 = vpop.f32.mrf.mxu1 }
 0x141   : > { %v1190_v32 = vadd.f32 %v2360_v29, %v1137_v27  ;;  %v1892_v34 = vadd.f32 %v1891_v31, %v1890_v26  ;;  %v1821_v35 = vpop.f32.mrf.mxu0 }
 0x142   : > { %v1198_v37 = vmax.f32 %v1166_v50, 0.0  ;;  %v1046_v12 = vadd.f32 %v1820_v30, %v2351_v18  ;;  %v1893_v38 = vpop.f32.mrf.mxu1 }
 0x143   : > { %v1222_v33 = vmax.f32 %v1190_v32, 0.0  ;;  %v1142_v58 = vadd.f32 %v1892_v34, %v2394_v7  ;;  %v1822_v40 = vpop.f32.mrf.mxu0 }
 0x144   : > { %v1679_v42 = vpack.c.bf16 %v1198_v37, %v1197_v36  ;;  %v1823_v43 = vadd.f32 %v1822_v40, %v1821_v35  ;;  %v1894_v44 = vpop.f32.mrf.mxu1  ;;  %v1167_v48 = vadd.f32 %v2360_v29, %v1046_v12 }
 0x145   : > { %v1739_v45 = vpack.c.bf16 %v1222_v33, %v1221_v39  ;;  %v1895_v46 = vadd.f32 %v1894_v44, %v1893_v38  ;;  %v1824_v47 = vpop.f32.mrf.mxu0  ;;  %v1191_v18 = vadd.f32 %v2360_v29, %v1142_v58 }
 0x146   : > { %1751 = vst [vmem:[%s2371_s17 + $0x8] sm:$0xff] %v1679_v42   ;;  %v1049_v49 = vadd.f32 %v1823_v43, %v2355_v22  ;;  %v1896_v41 = vpop.f32.mrf.mxu1  ;;  %v1199_v59 = vmax.f32 %v1167_v48, 0.0 }
 0x147   : > { %1763 = vst [vmem:[%s2371_s17 + $0x68] sm:$0xff] %v1739_v45   ;;  %v1145_v51 = vadd.f32 %v1895_v46, %v2399_v24  ;;  %v1825_v52 = vpop.f32.mrf.mxu0  ;;  %v1223_v61 = vmax.f32 %v1191_v18, 0.0 }
 0x148   : > { %v1168_v7 = vadd.f32 %v2360_v29, %v1049_v49  ;;  %v1826_v53 = vadd.f32 %v1825_v52, %v1824_v47  ;;  %v1897_v55 = vpop.f32.mrf.mxu1 }
 0x149   : > { %v1192_v56 = vadd.f32 %v2360_v29, %v1145_v51  ;;  %v1898_v10 = vadd.f32 %v1897_v55, %v1896_v41  ;;  %v1827_v57 = vpop.f32.mrf.mxu0 }
 0x14a   : > { %v1200_v54 = vmax.f32 %v1168_v7, 0.0  ;;  %v1054_v22 = vadd.f32 %v2349_v16, %v1826_v53  ;;  %v1899_v60 = vpop.f32.mrf.mxu1 }
 0x14b   : > { %v1224_v62 = vmax.f32 %v1192_v56, 0.0  ;;  %v1150_v24 = vadd.f32 %v2390_v3, %v1898_v10  ;;  %v1828_v0 = vpop.f32.mrf.mxu0 }
 0x14c   : > { %v1684_v1 = vpack.c.bf16 %v1200_v54, %v1199_v59  ;;  %v1829_v2 = vadd.f32 %v1828_v0, %v1827_v57  ;;  %v1900_v14 = vpop.f32.mrf.mxu1  ;;  %v1169_v63 = vadd.f32 %v2360_v29, %v1054_v22 }
 0x14d   : > { %v1744_v4 = vpack.c.bf16 %v1224_v62, %v1223_v61  ;;  %v1901_v5 = vadd.f32 %v1900_v14, %v1899_v60  ;;  %v1193_v16 = vadd.f32 %v2360_v29, %v1150_v24 }
 0x14e   : > { %1752 = vst [vmem:[%s2371_s17 + $0x10] sm:$0xff] %v1684_v1   ;;  %v1057_v6 = vadd.f32 %v2353_v20, %v1829_v2  ;;  %v1201_v13 = vmax.f32 %v1169_v63, 0.0 }
 0x14f   : > { %1764 = vst [vmem:[%s2371_s17 + $0x70] sm:$0xff] %v1744_v4   ;;  %v1153_v9 = vadd.f32 %v2397_v15, %v1901_v5  ;;  %v1225_v19 = vmax.f32 %v1193_v16, 0.0 }
 0x150   : > { %v1170_v3 = vadd.f32 %v2360_v29, %v1057_v6 }
 0x151   : > { %v1194_v11 = vadd.f32 %v2360_v29, %v1153_v9 }
 0x152   : > { %v1202_v17 = vmax.f32 %v1170_v3, 0.0 }
 0x153   : > { %v1226_v21 = vmax.f32 %v1194_v11, 0.0 }
 0x154   : > { %v1689_v23 = vpack.c.bf16 %v1202_v17, %v1201_v13 }
 0x155   : > { %v1749_v25 = vpack.c.bf16 %v1226_v21, %v1225_v19 }
 0x156   : > { %1753 = vst [vmem:[%s2371_s17 + $0x18] sm:$0xff] %v1689_v23  }
 0x157   : > { %1765 = vst [vmem:[%s2371_s17 + $0x78] sm:$0xff] %v1749_v25  }
 0x158 PF: > { %s15_s20 = sadd.s32 1, %s2100_s20   ;;  %s2458_s18 = smov %s2096_s19 }
 0x159   : > { %p12_p5 = scmp.ge.s32.totalorder %s15_s20, 4   ;;  %s2459_s19 = smov %s2461_s21 }
 0x15b   :  { %14 = sbr.rel (!%p12_p5) target bundleno = 2 (0x2), region = 82 }

</bundles_post_ra>
